<compile_context>
chip_gen: v6e
topology: v6e:2x2x1
jax: 0.10.0
libtpu: 0.0.40
codegen_flags: <defaults>
</compile_context>

<pallas_src>
import math

import jax
import jax.numpy as jnp
from jax.experimental import pallas as pl
from jax.experimental.pallas import tpu as pltpu

BETA = 0.95
THRESHOLD = 1.66            # module's default __init__ argument
RESET_CONST = BETA * THRESHOLD

LANES = 128                 # vreg lane width
BLOCK_BYTES = 1 << 20       # ~1 MiB per buffer; 4 arrays x 2 buffers = 8 MiB live (< v5e 16 MiB)
SMALL_N = 64 * 1024         # below ~one block: plain jnp beats pallas_call fixed cost

_SUBLANES = {4: 8, 2: 16, 1: 32}   # min sublane multiple per itemsize


def _leaky_surrogate_kernel(input_ref, mem_ref, spk_ref, mem_out_ref):
    mem = mem_ref[...]
    inp = input_ref[...]
    # One compare feeds both the spike output and the reset selection.
    fired = (mem - THRESHOLD) > 0.0
    leaky = BETA * mem + inp
    spk_ref[...] = fired.astype(spk_ref.dtype)
    mem_out_ref[...] = jnp.where(fired, leaky - RESET_CONST, leaky)


def _leaky_surrogate_jnp(input_, mem, spk_dtype):
    fired = (mem - THRESHOLD) > 0.0
    leaky = BETA * mem + input_
    return fired.astype(spk_dtype), jnp.where(fired, leaky - RESET_CONST, leaky)


def _round_up(x, m):
    return (x + m - 1) // m * m


def _sublane(dtype):
    return _SUBLANES.get(jnp.dtype(dtype).itemsize, 8)


def _block_rows(rows, cols, itemsize, sub):
    # ~BLOCK_BYTES per buffer, rounded down to the sublane multiple.
    target = max(sub, (BLOCK_BYTES // (cols * itemsize)) // sub * sub)
    # Keep the grid >= 2 where possible so both v7x TensorCores issue DMAs.
    half = _round_up(pl.cdiv(rows, 2), sub)
    br = min(target, half)
    if br >= rows:
        return rows            # single full-extent block (allowed: equals array dim)
    return br


def leaky_surrogate(input_, mem, *, spk_dtype=None):
    assert input_.shape == mem.shape and input_.dtype == mem.dtype
    shape = input_.shape
    dtype = input_.dtype
    spk_dtype = dtype if spk_dtype is None else jnp.dtype(spk_dtype)
    n = math.prod(shape) if shape else 1

    # Small-input fast path: pallas_call fixed cost dwarfs ~KBs of work.
    if n <= SMALL_N:
        return _leaky_surrogate_jnp(input_, mem, spk_dtype)

    itemsize = jnp.dtype(dtype).itemsize
    sub = _sublane(dtype)

    if (len(shape) >= 2 and shape[-1] % LANES == 0
            and (BLOCK_BYTES // (shape[-1] * itemsize)) >= sub):
        # Native lane-dense layout: merge leading dims (metadata-only reshape),
        # tile (block_rows, full_last_dim).  No pads, no post-kernel slices.
        cols = shape[-1]
        rows = n // cols
        inp2 = jnp.reshape(input_, (rows, cols))
        mem2 = jnp.reshape(mem, (rows, cols))
        pad = 0
    else:
        # Fallback: flatten to (rows, 128); pad only to the sublane multiple,
        # not to a multiple of block_rows (Pallas handles the partial last block).
        cols = LANES
        rows = _round_up(pl.cdiv(n, cols), sub)
        pad = rows * cols - n

        def to_2d(x):
            flat = jnp.reshape(x, (-1,))
            if pad:
                flat = jnp.pad(flat, (0, pad))
            return jnp.reshape(flat, (rows, cols))

        inp2, mem2 = to_2d(input_), to_2d(mem)

    br = _block_rows(rows, cols, itemsize, sub)
    grid = (pl.cdiv(rows, br),)
    spec = pl.BlockSpec((br, cols), lambda i: (i, 0))

    spk2, mem_out2 = pl.pallas_call(
        _leaky_surrogate_kernel,
        grid=grid,
        in_specs=[spec, spec],
        out_specs=(spec, spec),
        out_shape=(
            jax.ShapeDtypeStruct((rows, cols), spk_dtype),  # spk
            jax.ShapeDtypeStruct((rows, cols), dtype),      # updated mem
        ),
        # mem (input 1) is fully overwritten by the updated-mem output (output 1);
        # for a copy-free alias the caller should donate `mem` at its jit boundary.
        input_output_aliases={1: 1},
        compiler_params=pltpu.CompilerParams(
            dimension_semantics=("parallel",)),
    )(inp2, mem2)

    if pad:
        spk = jnp.reshape(jnp.reshape(spk2, (-1,))[:n], shape)
        new_mem = jnp.reshape(jnp.reshape(mem_out2, (-1,))[:n], shape)
    else:
        spk = jnp.reshape(spk2, shape)
        new_mem = jnp.reshape(mem_out2, shape)
    return spk, new_mem


def _reference(input_, mem):
    spk = ((mem - THRESHOLD) > 0.0).astype(input_.dtype)
    new_mem = BETA * mem + input_ - BETA * spk * THRESHOLD
    return spk, new_mem


if __name__ == "__main__":
    key = jax.random.PRNGKey(0)
    k1, k2, k3, k4, k5, k6 = jax.random.split(key, 6)

    # 1) Small shape implied by the module (one LIF layer step): fast path.
    batch, hidden = 2, 32
    input_s = jax.random.normal(k1, (batch, hidden), dtype=jnp.float32)
    mem_s = jax.random.normal(k2, (batch, hidden), dtype=jnp.float32) + 1.0
    spk_ref_s, mem_ref_s = _reference(input_s, mem_s)         # before call (mem may be donated)
    spk_s, new_mem_s = leaky_surrogate(input_s, mem_s)
    jax.block_until_ready((spk_s, new_mem_s))
    assert jnp.allclose(spk_s, spk_ref_s), "spike mismatch (small)"
    assert jnp.allclose(new_mem_s, mem_ref_s, atol=1e-6), "membrane mismatch (small)"

    # 2) Lane-dense native 2-D path (last dim % 128 == 0), multi-block grid.
    input_b = jax.random.normal(k3, (256, 1024), dtype=jnp.float32)
    mem_b = jax.random.normal(k4, (256, 1024), dtype=jnp.float32) + 1.0
    spk_ref_b, mem_ref_b = _reference(input_b, mem_b)
    spk_b, new_mem_b = leaky_surrogate(input_b, mem_b)
    jax.block_until_ready((spk_b, new_mem_b))
    assert jnp.allclose(spk_b, spk_ref_b), "spike mismatch (lane-dense)"
    assert jnp.allclose(new_mem_b, mem_ref_b, atol=1e-6), "membrane mismatch (lane-dense)"

    # 3) Awkward shape: flatten + minimal pad path, multi-block grid.
    input_c = jax.random.normal(k5, (300, 333), dtype=jnp.float32)
    mem_c = jax.random.normal(k6, (300, 333), dtype=jnp.float32) + 1.0
    spk_ref_c, mem_ref_c = _reference(input_c, mem_c)
    spk_c, new_mem_c = leaky_surrogate(input_c, mem_c)
    jax.block_until_ready((spk_c, new_mem_c))
    assert jnp.allclose(spk_c, spk_ref_c), "spike mismatch (padded)"
    assert jnp.allclose(new_mem_c, mem_ref_c, atol=1e-6), "membrane mismatch (padded)"

    print("KERNEL_OK")
</pallas_src>

<mosaic_0001>
module attributes {stable_mosaic.version = 11 : i64} {
  func.func @_leaky_surrogate_kernel(%arg0: i32, %arg1: memref<128x1024xf32, #tpu.memory_space<vmem>>, %arg2: memref<128x1024xf32, #tpu.memory_space<vmem>>, %arg3: memref<128x1024xf32, #tpu.memory_space<vmem>>, %arg4: memref<128x1024xf32, #tpu.memory_space<vmem>>) attributes {dimension_semantics = [#tpu.dimension_semantics<parallel>], iteration_bounds = array<i64: 2>, scalar_prefetch = 0 : i64, scratch_operands = 0 : i64, tpu.core_type = #tpu.core_type<tc>, window_params = [{transform_indices = @transform_0, window_bounds = array<i64: 128, 1024>}, {transform_indices = @transform_1, window_bounds = array<i64: 128, 1024>}, {transform_indices = @transform_2, window_bounds = array<i64: 128, 1024>}, {transform_indices = @transform_3, window_bounds = array<i64: 128, 1024>}]} {
    %c0 = arith.constant 0 : index
    %c0_0 = arith.constant 0 : index
    %0 = vector.load %arg2[%c0, %c0_0] : memref<128x1024xf32, #tpu.memory_space<vmem>>, vector<128x1024xf32>
    %c0_1 = arith.constant 0 : index
    %c0_2 = arith.constant 0 : index
    %1 = vector.load %arg1[%c0_1, %c0_2] : memref<128x1024xf32, #tpu.memory_space<vmem>>, vector<128x1024xf32>
    %cst = arith.constant 1.660000e+00 : f32
    %2 = vector.broadcast %cst : f32 to vector<128x1024xf32>
    %3 = arith.subf %0, %2 : vector<128x1024xf32>
    %cst_3 = arith.constant 0.000000e+00 : f32
    %4 = vector.broadcast %cst_3 : f32 to vector<128x1024xf32>
    %5 = arith.cmpf ogt, %3, %4 : vector<128x1024xf32>
    %cst_4 = arith.constant 0.949999988 : f32
    %6 = vector.broadcast %cst_4 : f32 to vector<128x1024xf32>
    %7 = arith.mulf %6, %0 : vector<128x1024xf32>
    %8 = arith.addf %7, %1 : vector<128x1024xf32>
    %9 = arith.extui %5 : vector<128x1024xi1> to vector<128x1024xi32>
    %10 = arith.sitofp %9 : vector<128x1024xi32> to vector<128x1024xf32>
    %c0_5 = arith.constant 0 : index
    %c0_6 = arith.constant 0 : index
    %11 = vector.load %arg3[%c0_5, %c0_6] : memref<128x1024xf32, #tpu.memory_space<vmem>>, vector<128x1024xf32>
    tpu.vector_store %arg3[%c0_5, %c0_6], %10 {strides = array<i32>} : memref<128x1024xf32, #tpu.memory_space<vmem>>, vector<128x1024xf32>,
    %cst_7 = arith.constant 1.577000e+00 : f32
    %12 = vector.broadcast %cst_7 : f32 to vector<128x1024xf32>
    %13 = arith.subf %8, %12 : vector<128x1024xf32>
    %14 = arith.select %5, %13, %8 : vector<128x1024xi1>, vector<128x1024xf32>
    %c0_8 = arith.constant 0 : index
    %c0_9 = arith.constant 0 : index
    %15 = vector.load %arg4[%c0_8, %c0_9] : memref<128x1024xf32, #tpu.memory_space<vmem>>, vector<128x1024xf32>
    tpu.vector_store %arg4[%c0_8, %c0_9], %14 {strides = array<i32>} : memref<128x1024xf32, #tpu.memory_space<vmem>>, vector<128x1024xf32>,
    return
  }
  func.func @transform_0(%arg0: i32) -> (i32, i32) {
    %c0_i32 = arith.constant 0 : i32
    %c0_i32_0 = arith.constant 0 : i32
    return %arg0, %c0_i32 : i32, i32
  }
  func.func @transform_1(%arg0: i32) -> (i32, i32) {
    %c0_i32 = arith.constant 0 : i32
    %c0_i32_0 = arith.constant 0 : i32
    return %arg0, %c0_i32 : i32, i32
  }
  func.func @transform_2(%arg0: i32) -> (i32, i32) {
    %c0_i32 = arith.constant 0 : i32
    %c0_i32_0 = arith.constant 0 : i32
    return %arg0, %c0_i32 : i32, i32
  }
  func.func @transform_3(%arg0: i32) -> (i32, i32) {
    %c0_i32 = arith.constant 0 : i32
    %c0_i32_0 = arith.constant 0 : i32
    return %arg0, %c0_i32 : i32, i32
  }
}

</mosaic_0001>

<bundles_post_ra>
// kernel: tpu_custom_call.1
= control target key start
LH: loop header
LB: loop body
LE: loop exit
PB: predicated region body
PF: predicated region fallthrough
CT: control target
= control target key end

     0   :  { %9 = vsyncpa [#allocation3], 0  ;;  %s4688_s0 = inlined_call_operand.vmem [shape: f32[256,1024], index: 0, kind: input, shape index: {}]   ;;  %s4689_s1 = inlined_call_operand.hbm [shape: f32[256,1024], index: 1, kind: input, shape index: {}, may-alias: {1,3}]   ;;  %s4690_s2 = inlined_call_operand.hbm [shape: f32[256,1024], index: 2, kind: output, shape index: {0}]   ;;  %s4691_s3 = inlined_call_operand.hbm [shape: f32[256,1024], index: 3, kind: output, shape index: {1}, may-alias: {1,3}]  }
   0x1   :  { %11 = vsyncpa [#allocation3 + $0x1], 0 }
   0x2   :  { %12 = vsyncpa [#allocation4], 0 }
   0x3   :  { %14 = vsyncpa [#allocation4 + $0x1], 0 }
   0x4   :  { %15 = vsyncpa [#allocation7], 0 }
   0x5   :  { %17 = vsyncpa [#allocation7 + $0x1], 0  ;;  %s2542_s12 = smov 0   ;;  %s2544_s13 = smov 0  }
   0x6   :  { %s2546_s14 = smov 0   ;;  %s2548_s15 = smov 0  }
   0x7 LB: > { %s2563_s16 = sadd.s32 4294967295, %s2512_s15   ;;  %s1919_s17 = sadd.s32 4294967294, %s2512_s15   ;;  %s2512_s15 = sphi %s2548_s15, %s5457_s15   ;;  %s2508_s14 = sphi %s2546_s14, %s5456_s14   ;;  %s2504_s13 = sphi %s2544_s13, %s5455_s13   ;;  %s2500_s12 = sphi %s2542_s12, %s5454_s12  }
   0x8   : > { %s2567_s18 = sadd.s32 1, %s2512_s15   ;;  %s56_s19 = sadd.s32 1, %s2508_s14 }
   0x9   : > { %s53_s20 = ssub.s32 %s2512_s15, %s2567_s18  ;;  %p63_p0 = scmp.ne.s32.totalorder %s2508_s14, %s2504_s13 }
   0xa   : > { %p54_p1 = scmp.eq.s32.totalorder %s53_s20, 0  ;;  %p64_p2 = scmp.eq.s32.totalorder %s2512_s15, 0 }
   0xb   : > { %p69_p3 = scmp.ne.s32.totalorder %s2504_s13, %s2500_s12  ;;  %p70_p4 = scmp.eq.s32.totalorder %s2563_s16, 0 }
   0xc   : > { %s2579_s21 = scalar_select %p54_p1, %s2508_s14, %s56_s19  }
   0xd   : > { %p2581_p5 = por %p64_p2, %p63_p0  ;;  %p2585_p6 = por %p70_p4, %p69_p3 }
   0xe   : > { %p93_p7 = scmp.eq.s32.totalorder %s2563_s16, 1  ;;  %p99_p8 = scmp.eq.s32.totalorder %s1919_s17, 1 }
   0xf   : > { %s4913_s23 = scalar_select %p2585_p6, 1, 0 }
  0x10   : > { %p2351_p10 = scmp.lt.s32.totalorder %s2512_s15, 2  ;;  %p2592_p11 = por %p93_p7, %p63_p0 }
  0x11   : > { %p2596_p12 = por %p99_p8, %p69_p3  ;;  %s155_s26 = sand.u32 1, %s2508_s14  }
  0x12   : > { %s4914_s24 = scalar_select %p2592_p11, 1, 0 }
  0x13   : > { %s4915_s25 = scalar_select %p2596_p12, 1, 0 }
  0x14   : > { %s2328_s27 = sshll.u32 %s2512_s15, 14  ;;  %s1922_s28 = sshll.u32 %s155_s26, 10 }
  0x15   : > { %s2605_s4 = scalar_lea.hbm %s4689_s1, %s2328_s27  ;;  %s159_s5 = scalar_lea.vmem [#allocation2], %s1922_s28 }
  0x16   : > { %s167_s6 = sshll.u32 %s159_s5, 4  ;;  %p2609_p13 = pnand %p2351_p10, %p2581_p5  ;;  %s2613_s6 = int_to_ptr.vmem [resolvable:$true] %s167_s6 }
  0x17   : > { %s2615_s8 = scalar_lea.sflag [#allocation3], %s155_s26  ;;  %s2390_s9 = scalar_lea.hbm %s2605_s4, 16384 }
  0x18   : > { %p2391_p0 = scmp.ne.s32.totalorder %s2605_s4, %s2390_s9  ;;  %p2392_p1 = pneg %p2609_p13 }
  0x19   : > { %s2395_s17 = scalar_lea.hbm %s4689_s1, 32768  ;;  %p2396_p4 = scmp.lt.s32.totalorder %s2605_s4, %s4689_s1 }
  0x1a   : > { %p2393_p2 = pnand %p2392_p1, %p2391_p0  ;;  %p2397_p5 = scmp.lt.s32.totalorder %s2395_s17, %s2390_s9 }
  0x1c   : > { %p2394_p3 = pneg %p2393_p2  ;;  %p2398_p7 = por %p2397_p5, %p2396_p4 }
  0x1e   : > { %p2399_p8 = pnand %p2398_p7, %p2394_p3 }
  0x20   : > { %2402 = shalt.err (!%p2399_p8)
}
  0x21   : > { %s2403_s22 = scalar_lea.vmem %s2613_s6, 16384  ;;  %s2514_s26 = smov [#allocation2]  }
  0x22   : > { %p2404_p10 = scmp.ne.s32.totalorder %s2613_s6, %s2403_s22  ;;  %s2408_s27 = sshll.u32 %s2514_s26, 4  ;;  %s2409_s27 = int_to_ptr.vmem [resolvable:$false] %s2408_s27 }
  0x23   : > { %s2410_s28 = scalar_lea.vmem %s2409_s27, 32768  ;;  %p2411_p2 = scmp.lt.s32.totalorder %s2613_s6, %s2409_s27 }
  0x24   : > { %p2406_p9 = pnand %p2404_p10, %p2392_p1  ;;  %p2412_p12 = scmp.lt.s32.totalorder %s2410_s28, %s2403_s22 }
  0x26   : > { %p2407_p0 = pneg %p2406_p9  ;;  %p2413_p11 = por %p2412_p12, %p2411_p2 }
  0x28   : > { %p2414_p6 = pnand %p2413_p11, %p2407_p0 }
  0x2a   : > { %2417 = shalt.err (!%p2414_p6)
}
  0x2b   : > { %s2515_s29 = smov 1024   ;;  %s2516_s30 = smov 64  }
  0x2c   : > { %2343 = dma.hbm_to_vmem [thread:$0]  (!%p2609_p13), %s2605_s4, 16384, %s2613_s6, %s2615_s8, %s2515_s29, %s2515_s29, %s2516_s30  }
  0x2d   : > { %p1926_p9 = scmp.ge.s32.totalorder %s2512_s15, 1  ;;  %p175_p1 = scmp.lt.s32.totalorder %s2512_s15, 3 }
  0x2f   : > { %p176_p3 = pnand %p1926_p9, %p175_p1 }
  0x31   : > { %179 = sbr.rel (%p176_p3) target bundleno = 441 (0x1b9), region = 28 }
  0x36   : > { %s2639_s5 = sand.u32 1, %s2504_s13   ;;  %p4917_p6 = scmp.ne.s32.totalorder %s4913_s23, 0 }
  0x37   : > { %s2642_s9 = sshll.u32 %s2639_s5, 10  ;;  %s182_s10 = scalar_lea.sflag [#allocation3], %s2639_s5 }
  0x38   : > { %s2646_s11 = scalar_lea.vmem [#allocation2], %s2642_s9 }
  0x39   : > { %2487 = dma.done.wait (%p4917_p6), %s182_s10, 16384  }
  0x3a   : > { %2489 = vsyncadd (%p4917_p6), %s182_s10, 4294950912  ;;  %v229_v0 = vld [vmem:[%s2646_s11] sm:$0xff]  ;;  %v230_v1 = vld [vmem:[%s2646_s11 + $0x8] sm:$0xff]  ;;  %v2517_v12 = vmov 0.0   ;;  %s2683_s23 = scalar_lea.vmem [#allocation5], %s2642_s9  ;;  %s1930_s4 = sshll.u32 %s2563_s16, 4 }
  0x3b   : > { %v231_v2 = vld [vmem:[%s2646_s11 + $0x10] sm:$0xff]  ;;  %v2655_v3 = vadd.f32 -1.66, %v229_v0  ;;  %v2657_v4 = vmul.f32 0.95, %v229_v0  ;;  %v232_v9 = vld [vmem:[%s2646_s11 + $0x18] sm:$0xff] }
  0x3c   : > { %v2659_v5 = vadd.f32 -1.66, %v230_v1  ;;  %v2661_v6 = vmul.f32 0.95, %v230_v1  ;;  %v2663_v7 = vadd.f32 -1.66, %v231_v2 }
  0x3d   : > { %v2665_v8 = vmul.f32 0.95, %v231_v2  ;;  %vm613_vm0 = vcmp.gt.f32.partialorder %v2655_v3, 0.0  ;;  %v233_v10 = vld [vmem:[%s2646_s11 + $0x20] sm:$0xff]  ;;  %v234_v11 = vld [vmem:[%s2646_s11 + $0x28] sm:$0xff]  ;;  %v235_v16 = vld [vmem:[%s2646_s11 + $0x30] sm:$0xff] }
  0x3e   : > { %vm614_vm1 = vcmp.gt.f32.partialorder %v2659_v5, 0.0  ;;  %v2061_v13 = vsel %vm613_vm0, 1.0, %v2517_v12  ;;  %vm615_vm2 = vcmp.gt.f32.partialorder %v2663_v7, 0.0  ;;  %v2679_v15 = vadd.f32 -1.66, %v232_v9  ;;  %v236_v20 = vld [vmem:[%s2646_s11 + $0x38] sm:$0xff] }
  0x3f   : > { %v2062_v14 = vsel %vm614_vm1, 1.0, %v2517_v12  ;;  %1253 = vst [vmem:[%s2683_s23] sm:$0xff] %v2061_v13  ;;  %v2063_v17 = vsel %vm615_vm2, 1.0, %v2517_v12  ;;  %v2690_v18 = vmul.f32 0.95, %v232_v9  ;;  %v2692_v19 = vadd.f32 -1.66, %v233_v10 }
  0x40   : > { %1254 = vst [vmem:[%s2683_s23 + $0x8] sm:$0xff] %v2062_v14  ;;  %1255 = vst [vmem:[%s2683_s23 + $0x10] sm:$0xff] %v2063_v17  ;;  %vm616_vm3 = vcmp.gt.f32.partialorder %v2679_v15, 0.0  ;;  %v2697_v21 = vmul.f32 0.95, %v233_v10  ;;  %v237_v23 = vld [vmem:[%s2646_s11 + $0x40] sm:$0xff] }
  0x41   : > { %v2699_v22 = vadd.f32 -1.66, %v234_v11  ;;  %v2064_v24 = vsel %vm616_vm3, 1.0, %v2517_v12  ;;  %vm617_vm4 = vcmp.gt.f32.partialorder %v2692_v19, 0.0  ;;  %v2706_v25 = vmul.f32 0.95, %v234_v11 }
  0x42   : > { %v2708_v26 = vadd.f32 -1.66, %v235_v16  ;;  %1256 = vst [vmem:[%s2683_s23 + $0x18] sm:$0xff] %v2064_v24  ;;  %v2065_v27 = vsel %vm617_vm4, 1.0, %v2517_v12  ;;  %v2715_v28 = vmul.f32 0.95, %v235_v16 }
  0x43   : > { %vm618_vm5 = vcmp.gt.f32.partialorder %v2699_v22, 0.0  ;;  %v2717_v29 = vadd.f32 -1.66, %v236_v20  ;;  %1257 = vst [vmem:[%s2683_s23 + $0x20] sm:$0xff] %v2065_v27  ;;  %v2724_v31 = vmul.f32 0.95, %v236_v20 }
  0x44   : > { %v2066_v30 = vsel %vm618_vm5, 1.0, %v2517_v12  ;;  %vm619_vm6 = vcmp.gt.f32.partialorder %v2708_v26, 0.0  ;;  %v2726_v32 = vadd.f32 -1.66, %v237_v23  ;;  %v2733_v34 = vmul.f32 0.95, %v237_v23 }
  0x45   : > { %1258 = vst [vmem:[%s2683_s23 + $0x28] sm:$0xff] %v2066_v30  ;;  %v2067_v33 = vsel %vm619_vm6, 1.0, %v2517_v12  ;;  %vm620_vm7 = vcmp.gt.f32.partialorder %v2717_v29, 0.0  ;;  %v238_v35 = vld [vmem:[%s2646_s11 + $0x48] sm:$0xff]  ;;  %v239_v36 = vld [vmem:[%s2646_s11 + $0x50] sm:$0xff]  ;;  %v240_v43 = vld [vmem:[%s2646_s11 + $0x58] sm:$0xff] }
  0x46   : > { %1259 = vst [vmem:[%s2683_s23 + $0x30] sm:$0xff] %v2067_v33  ;;  %v2068_v37 = vsel %vm620_vm7, 1.0, %v2517_v12  ;;  %vm621_vm8 = vcmp.gt.f32.partialorder %v2726_v32, 0.0  ;;  %v2742_v38 = vadd.f32 -1.66, %v238_v35  ;;  %v241_v46 = vld [vmem:[%s2646_s11 + $0x60] sm:$0xff] }
  0x47   : > { %v2744_v39 = vmul.f32 0.95, %v238_v35  ;;  %1260 = vst [vmem:[%s2683_s23 + $0x38] sm:$0xff] %v2068_v37  ;;  %v2069_v40 = vsel %vm621_vm8, 1.0, %v2517_v12  ;;  %v2750_v41 = vadd.f32 -1.66, %v239_v36 }
  0x48   : > { %v2752_v42 = vmul.f32 0.95, %v239_v36  ;;  %1261 = vst [vmem:[%s2683_s23 + $0x40] sm:$0xff] %v2069_v40  ;;  %vm622_vm9 = vcmp.gt.f32.partialorder %v2742_v38, 0.0  ;;  %v2757_v44 = vadd.f32 -1.66, %v240_v43 }
  0x49   : > { %v2759_v45 = vmul.f32 0.95, %v240_v43  ;;  %v2070_v47 = vsel %vm622_vm9, 1.0, %v2517_v12  ;;  %vm623_vm10 = vcmp.gt.f32.partialorder %v2750_v41, 0.0  ;;  %v2766_v48 = vadd.f32 -1.66, %v241_v46 }
  0x4a   : > { %v2768_v49 = vmul.f32 0.95, %v241_v46  ;;  %1262 = vst [vmem:[%s2683_s23 + $0x48] sm:$0xff] %v2070_v47  ;;  %v2071_v50 = vsel %vm623_vm10, 1.0, %v2517_v12  ;;  %vm624_vm11 = vcmp.gt.f32.partialorder %v2757_v44, 0.0  ;;  %v242_v51 = vld [vmem:[%s2646_s11 + $0x68] sm:$0xff] }
  0x4b   : > { %v243_v52 = vld [vmem:[%s2646_s11 + $0x70] sm:$0xff]  ;;  %v244_v53 = vld [vmem:[%s2646_s11 + $0x78] sm:$0xff]  ;;  %1263 = vst [vmem:[%s2683_s23 + $0x50] sm:$0xff] %v2071_v50  ;;  %v2072_v54 = vsel %vm624_vm11, 1.0, %v2517_v12  ;;  %vm625_vm12 = vcmp.gt.f32.partialorder %v2766_v48, 0.0  ;;  %v245_v60 = vld [vmem:[%s2646_s11 + $0x80] sm:$0xff] }
  0x4c   : > { %v2783_v55 = vadd.f32 -1.66, %v242_v51  ;;  %v2785_v56 = vmul.f32 0.95, %v242_v51  ;;  %1264 = vst [vmem:[%s2683_s23 + $0x58] sm:$0xff] %v2072_v54  ;;  %v2073_v57 = vsel %vm625_vm12, 1.0, %v2517_v12 }
  0x4d   : > { %v2791_v58 = vadd.f32 -1.66, %v243_v52  ;;  %v2793_v59 = vmul.f32 0.95, %v243_v52  ;;  %1265 = vst [vmem:[%s2683_s23 + $0x60] sm:$0xff] %v2073_v57  ;;  %v246_v63 = vld [vmem:[%s2646_s11 + $0x88] sm:$0xff] }
  0x4e   : > { %vm4694_vm13 = vcmp.gt.f32.partialorder %v2783_v55, 0.0  ;;  %v2798_v61 = vadd.f32 -1.66, %v244_v53  ;;  %v2800_v62 = vmul.f32 0.95, %v244_v53  ;;  %v247_v14 = vld [vmem:[%s2646_s11 + $0x90] sm:$0xff] }
  0x4f   : > { %v2074_v0 = vsel %vm4694_vm13, 1.0, %v2517_v12  ;;  %vm4695_vm14 = vcmp.gt.f32.partialorder %v2791_v58, 0.0  ;;  %v2807_v1 = vadd.f32 -1.66, %v245_v60  ;;  %v2809_v2 = vmul.f32 0.95, %v245_v60 }
  0x50   : > { %1266 = vst [vmem:[%s2683_s23 + $0x68] sm:$0xff] %v2074_v0  ;;  %v2075_v9 = vsel %vm4695_vm14, 1.0, %v2517_v12  ;;  %vm4698_vm15 = vcmp.gt.f32.partialorder %v2798_v61, 0.0  ;;  %v2816_v10 = vadd.f32 -1.66, %v246_v63  ;;  %v248_v16 = vld [vmem:[%s2646_s11 + $0x98] sm:$0xff] }
  0x51   : > { %v2818_v11 = vmul.f32 0.95, %v246_v63  ;;  %1267 = vst [vmem:[%s2683_s23 + $0x70] sm:$0xff] %v2075_v9  ;;  %v2076_v13 = vsel %vm4698_vm15, 1.0, %v2517_v12  ;;  %vm4696_vm13 = vcmp.gt.f32.partialorder %v2807_v1, 0.0  ;;  %v249_v17 = vld [vmem:[%s2646_s11 + $0xa0] sm:$0xff] }
  0x52   : > { %1268 = vst [vmem:[%s2683_s23 + $0x78] sm:$0xff] %v2076_v13  ;;  %v2077_v20 = vsel %vm4696_vm13, 1.0, %v2517_v12  ;;  %vm4697_vm14 = vcmp.gt.f32.partialorder %v2816_v10, 0.0  ;;  %v2833_v23 = vadd.f32 -1.66, %v247_v14  ;;  %v250_v35 = vld [vmem:[%s2646_s11 + $0xa8] sm:$0xff] }
  0x53   : > { %v2835_v24 = vmul.f32 0.95, %v247_v14  ;;  %1269 = vst [vmem:[%s2683_s23 + $0x80] sm:$0xff] %v2077_v20  ;;  %v2078_v27 = vsel %vm4697_vm14, 1.0, %v2517_v12  ;;  %v2841_v30 = vadd.f32 -1.66, %v248_v16 }
  0x54   : > { %v2843_v33 = vmul.f32 0.95, %v248_v16  ;;  %1270 = vst [vmem:[%s2683_s23 + $0x88] sm:$0xff] %v2078_v27  ;;  %vm4699_vm13 = vcmp.gt.f32.partialorder %v2833_v23, 0.0  ;;  %v2848_v36 = vadd.f32 -1.66, %v249_v17 }
  0x55   : > { %v2850_v37 = vmul.f32 0.95, %v249_v17  ;;  %v251_v40 = vld [vmem:[%s2646_s11 + $0xb0] sm:$0xff]  ;;  %v2079_v43 = vsel %vm4699_vm13, 1.0, %v2517_v12  ;;  %vm4700_vm14 = vcmp.gt.f32.partialorder %v2841_v30, 0.0  ;;  %v252_v54 = vld [vmem:[%s2646_s11 + $0xb8] sm:$0xff] }
  0x56   : > { %v2857_v46 = vadd.f32 -1.66, %v250_v35  ;;  %v2859_v47 = vmul.f32 0.95, %v250_v35  ;;  %1271 = vst [vmem:[%s2683_s23 + $0x90] sm:$0xff] %v2079_v43  ;;  %v2080_v50 = vsel %vm4700_vm14, 1.0, %v2517_v12 }
  0x57   : > { %vm4703_vm15 = vcmp.gt.f32.partialorder %v2848_v36, 0.0  ;;  %v2866_v51 = vadd.f32 -1.66, %v251_v40  ;;  %v2868_v52 = vmul.f32 0.95, %v251_v40  ;;  %1272 = vst [vmem:[%s2683_s23 + $0x98] sm:$0xff] %v2080_v50 }
  0x58   : > { %v2081_v53 = vsel %vm4703_vm15, 1.0, %v2517_v12  ;;  %vm4701_vm13 = vcmp.gt.f32.partialorder %v2857_v46, 0.0  ;;  %v253_v57 = vld [vmem:[%s2646_s11 + $0xc0] sm:$0xff]  ;;  %v254_v60 = vld [vmem:[%s2646_s11 + $0xc8] sm:$0xff]  ;;  %v2883_v0 = vadd.f32 -1.66, %v252_v54 }
  0x59   : > { %4918 = vst [vmem:[#allocation11_spill] sm:$0xff] %v2866_v51  ;;  %1273 = vst [vmem:[%s2683_s23 + $0xa0] sm:$0xff] %v2081_v53  ;;  %v2082_v63 = vsel %vm4701_vm13, 1.0, %v2517_v12  ;;  %vm4702_vm14 = vcmp.gt.f32.partialorder %v2866_v51, 0.0  ;;  %v2885_v9 = vmul.f32 0.95, %v252_v54 }
  0x5a   : > { %4919 = vst [vmem:[#allocation12_spill] sm:$0xff] %v2883_v0  ;;  %1274 = vst [vmem:[%s2683_s23 + $0xa8] sm:$0xff] %v2082_v63  ;;  %v2083_v13 = vsel %vm4702_vm14, 1.0, %v2517_v12  ;;  %v2891_v14 = vadd.f32 -1.66, %v253_v57  ;;  %v255_v17 = vld [vmem:[%s2646_s11 + $0xd0] sm:$0xff] }
  0x5b   : > { %v2893_v16 = vmul.f32 0.95, %v253_v57  ;;  %1275 = vst [vmem:[%s2683_s23 + $0xb0] sm:$0xff] %v2083_v13  ;;  %vm4704_vm13 = vcmp.gt.f32.partialorder %v2883_v0, 0.0  ;;  %v2898_v20 = vadd.f32 -1.66, %v254_v60 }
  0x5c   : > { %4920 = vst [vmem:[#allocation13_spill] sm:$0xff] %v2891_v14  ;;  %v2900_v27 = vmul.f32 0.95, %v254_v60  ;;  %v256_v35 = vld [vmem:[%s2646_s11 + $0xd8] sm:$0xff]  ;;  %v2084_v40 = vsel %vm4704_vm13, 1.0, %v2517_v12  ;;  %vm4705_vm14 = vcmp.gt.f32.partialorder %v2891_v14, 0.0 }
  0x5d   : > { %4921 = vst [vmem:[#allocation14_spill] sm:$0xff] %v2893_v16  ;;  %4922 = vst [vmem:[#allocation15_spill] sm:$0xff] %v2898_v20  ;;  %v2907_v43 = vadd.f32 -1.66, %v255_v17  ;;  %v2909_v50 = vmul.f32 0.95, %v255_v17 }
  0x5e   : > { %4923 = vst [vmem:[#allocation16_spill] sm:$0xff] %v2900_v27  ;;  %1276 = vst [vmem:[%s2683_s23 + $0xb8] sm:$0xff] %v2084_v40  ;;  %v2085_v53 = vsel %vm4705_vm14, 1.0, %v2517_v12  ;;  %vm4712_vm15 = vcmp.gt.f32.partialorder %v2898_v20, 0.0  ;;  %v2916_v54 = vadd.f32 -1.66, %v256_v35 }
  0x5f   : > { %4924 = vst [vmem:[#allocation17_spill] sm:$0xff] %v2907_v43  ;;  %4925 = vst [vmem:[#allocation18_spill] sm:$0xff] %v2909_v50  ;;  %v2918_v57 = vmul.f32 0.95, %v256_v35  ;;  %v2086_v60 = vsel %vm4712_vm15, 1.0, %v2517_v12  ;;  %vm4708_vm13 = vcmp.gt.f32.partialorder %v2907_v43, 0.0 }
  0x60   : > { %4926 = vst [vmem:[#allocation19_spill] sm:$0xff] %v2916_v54  ;;  %1277 = vst [vmem:[%s2683_s23 + $0xc0] sm:$0xff] %v2085_v53  ;;  %v257_v63 = vld [vmem:[%s2646_s11 + $0xe0] sm:$0xff]  ;;  %v258_v13 = vld [vmem:[%s2646_s11 + $0xe8] sm:$0xff]  ;;  %v2087_v40 = vsel %vm4708_vm13, 1.0, %v2517_v12  ;;  %vm4711_vm14 = vcmp.gt.f32.partialorder %v2916_v54, 0.0 }
  0x61   : > { %4927 = vst [vmem:[#allocation20_spill] sm:$0xff] %v2918_v57  ;;  %v259_v17 = vld [vmem:[%s2646_s11 + $0xf0] sm:$0xff]  ;;  %1278 = vst [vmem:[%s2683_s23 + $0xc8] sm:$0xff] %v2086_v60  ;;  %v2933_v35 = vadd.f32 -1.66, %v257_v63  ;;  %v2088_v20 = vsel %vm4711_vm14, 1.0, %v2517_v12 }
  0x62   : > { %v2935_v53 = vmul.f32 0.95, %v257_v63  ;;  %1279 = vst [vmem:[%s2683_s23 + $0xd0] sm:$0xff] %v2087_v40  ;;  %v2941_v14 = vadd.f32 -1.66, %v258_v13  ;;  %v260_v60 = vld [vmem:[%s2646_s11 + $0xf8] sm:$0xff] }
  0x63   : > { %4928 = vst [vmem:[#allocation21_spill] sm:$0xff] %v2933_v35  ;;  %v2943_v57 = vmul.f32 0.95, %v258_v13  ;;  %1280 = vst [vmem:[%s2683_s23 + $0xd8] sm:$0xff] %v2088_v20  ;;  %vm4713_vm13 = vcmp.gt.f32.partialorder %v2933_v35, 0.0  ;;  %v261_v40 = vld [vmem:[%s2646_s11 + $0x100] sm:$0xff] }
  0x64   : > { %4929 = vst [vmem:[#allocation22_spill] sm:$0xff] %v2935_v53  ;;  %4930 = vst [vmem:[#allocation23_spill] sm:$0xff] %v2941_v14  ;;  %v2948_v43 = vadd.f32 -1.66, %v259_v17  ;;  %v2950_v63 = vmul.f32 0.95, %v259_v17 }
  0x65   : > { %4931 = vst [vmem:[#allocation24_spill] sm:$0xff] %v2943_v57  ;;  %v2089_v54 = vsel %vm4713_vm13, 1.0, %v2517_v12  ;;  %vm4716_vm14 = vcmp.gt.f32.partialorder %v2941_v14, 0.0  ;;  %v2957_v13 = vadd.f32 -1.66, %v260_v60  ;;  %v263_v35 = vld [vmem:[%s2646_s11 + $0x110] sm:$0xff] }
  0x66   : > { %4932 = vst [vmem:[#allocation25_spill] sm:$0xff] %v2948_v43  ;;  %4933 = vst [vmem:[#allocation26_spill] sm:$0xff] %v2950_v63  ;;  %v2959_v20 = vmul.f32 0.95, %v260_v60  ;;  %v2090_v17 = vsel %vm4716_vm14, 1.0, %v2517_v12  ;;  %vm4722_vm15 = vcmp.gt.f32.partialorder %v2948_v43, 0.0 }
  0x67   : > { %4934 = vst [vmem:[#allocation27_spill] sm:$0xff] %v2957_v13  ;;  %1281 = vst [vmem:[%s2683_s23 + $0xe0] sm:$0xff] %v2089_v54  ;;  %v2966_v63 = vadd.f32 -1.66, %v261_v40  ;;  %v2968_v57 = vmul.f32 0.95, %v261_v40 }
  0x68   : > { %4935 = vst [vmem:[#allocation28_spill] sm:$0xff] %v2959_v20  ;;  %1282 = vst [vmem:[%s2683_s23 + $0xe8] sm:$0xff] %v2090_v17  ;;  %v2091_v60 = vsel %vm4722_vm15, 1.0, %v2517_v12  ;;  %vm4718_vm13 = vcmp.gt.f32.partialorder %v2957_v13, 0.0  ;;  %v262_v54 = vld [vmem:[%s2646_s11 + $0x108] sm:$0xff]  ;;  %v264_v14 = vld [vmem:[%s2646_s11 + $0x118] sm:$0xff] }
  0x69   : > { %4936 = vst [vmem:[#allocation29_spill] sm:$0xff] %v2966_v63  ;;  %4937 = vst [vmem:[#allocation30_spill] sm:$0xff] %v2968_v57  ;;  %v2092_v20 = vsel %vm4718_vm13, 1.0, %v2517_v12  ;;  %vm4721_vm14 = vcmp.gt.f32.partialorder %v2966_v63, 0.0  ;;  %v2983_v40 = vadd.f32 -1.66, %v262_v54 }
  0x6a   : > { %1283 = vst [vmem:[%s2683_s23 + $0xf0] sm:$0xff] %v2091_v60  ;;  %v2985_v17 = vmul.f32 0.95, %v262_v54  ;;  %1284 = vst [vmem:[%s2683_s23 + $0xf8] sm:$0xff] %v2092_v20  ;;  %v2093_v57 = vsel %vm4721_vm14, 1.0, %v2517_v12  ;;  %v265_v60 = vld [vmem:[%s2646_s11 + $0x120] sm:$0xff] }
  0x6b   : > { %4938 = vst [vmem:[#allocation31_spill] sm:$0xff] %v2983_v40  ;;  %v2991_v43 = vadd.f32 -1.66, %v263_v35  ;;  %v2993_v53 = vmul.f32 0.95, %v263_v35  ;;  %1285 = vst [vmem:[%s2683_s23 + $0x100] sm:$0xff] %v2093_v57 }
  0x6c   : > { %4939 = vst [vmem:[#allocation32_spill] sm:$0xff] %v2985_v17  ;;  %vm4723_vm13 = vcmp.gt.f32.partialorder %v2983_v40, 0.0  ;;  %v2998_v13 = vadd.f32 -1.66, %v264_v14  ;;  %v3000_v54 = vmul.f32 0.95, %v264_v14 }
  0x6d   : > { %4940 = vst [vmem:[#allocation33_spill] sm:$0xff] %v2991_v43  ;;  %4941 = vst [vmem:[#allocation34_spill] sm:$0xff] %v2993_v53  ;;  %v266_v20 = vld [vmem:[%s2646_s11 + $0x128] sm:$0xff]  ;;  %v2094_v63 = vsel %vm4723_vm13, 1.0, %v2517_v12  ;;  %vm4726_vm14 = vcmp.gt.f32.partialorder %v2991_v43, 0.0  ;;  %v268_v40 = vld [vmem:[%s2646_s11 + $0x138] sm:$0xff] }
  0x6e   : > { %4942 = vst [vmem:[#allocation35_spill] sm:$0xff] %v2998_v13  ;;  %4943 = vst [vmem:[#allocation36_spill] sm:$0xff] %v3000_v54  ;;  %v3007_v35 = vadd.f32 -1.66, %v265_v60  ;;  %v3009_v57 = vmul.f32 0.95, %v265_v60 }
  0x6f   : > { %1286 = vst [vmem:[%s2683_s23 + $0x108] sm:$0xff] %v2094_v63  ;;  %v2095_v14 = vsel %vm4726_vm14, 1.0, %v2517_v12  ;;  %vm4732_vm15 = vcmp.gt.f32.partialorder %v2998_v13, 0.0  ;;  %v3016_v54 = vadd.f32 -1.66, %v266_v20  ;;  %v267_v63 = vld [vmem:[%s2646_s11 + $0x130] sm:$0xff] }
  0x70   : > { %4944 = vst [vmem:[#allocation37_spill] sm:$0xff] %v3007_v35  ;;  %4945 = vst [vmem:[#allocation38_spill] sm:$0xff] %v3009_v57  ;;  %v3018_v53 = vmul.f32 0.95, %v266_v20  ;;  %v2096_v60 = vsel %vm4732_vm15, 1.0, %v2517_v12  ;;  %vm4728_vm13 = vcmp.gt.f32.partialorder %v3007_v35, 0.0 }
  0x71   : > { %4946 = vst [vmem:[#allocation39_spill] sm:$0xff] %v3016_v54  ;;  %1287 = vst [vmem:[%s2683_s23 + $0x110] sm:$0xff] %v2095_v14  ;;  %v269_v43 = vld [vmem:[%s2646_s11 + $0x140] sm:$0xff]  ;;  %v2097_v57 = vsel %vm4728_vm13, 1.0, %v2517_v12  ;;  %vm4731_vm14 = vcmp.gt.f32.partialorder %v3016_v54, 0.0  ;;  %p3781_p11 = scmp.lt.s32.totalorder %s1930_s4, 31 }
  0x72   : > { %4947 = vst [vmem:[#allocation40_spill] sm:$0xff] %v3018_v53  ;;  %1288 = vst [vmem:[%s2683_s23 + $0x118] sm:$0xff] %v2096_v60  ;;  %v3033_v20 = vadd.f32 -1.66, %v267_v63  ;;  %v3035_v14 = vmul.f32 0.95, %v267_v63 }
  0x73   : > { %1289 = vst [vmem:[%s2683_s23 + $0x120] sm:$0xff] %v2097_v57  ;;  %v2098_v13 = vsel %vm4731_vm14, 1.0, %v2517_v12  ;;  %v3041_v53 = vadd.f32 -1.66, %v268_v40  ;;  %v3043_v17 = vmul.f32 0.95, %v268_v40 }
  0x74   : > { %4948 = vst [vmem:[#allocation41_spill] sm:$0xff] %v3033_v20  ;;  %4949 = vst [vmem:[#allocation42_spill] sm:$0xff] %v3035_v14  ;;  %v270_v60 = vld [vmem:[%s2646_s11 + $0x148] sm:$0xff]  ;;  %vm4733_vm13 = vcmp.gt.f32.partialorder %v3033_v20, 0.0  ;;  %v3048_v35 = vadd.f32 -1.66, %v269_v43 }
  0x75   : > { %4950 = vst [vmem:[#allocation43_spill] sm:$0xff] %v3041_v53  ;;  %4951 = vst [vmem:[#allocation44_spill] sm:$0xff] %v3043_v17  ;;  %v3050_v63 = vmul.f32 0.95, %v269_v43  ;;  %v271_v57 = vld [vmem:[%s2646_s11 + $0x150] sm:$0xff]  ;;  %v2099_v54 = vsel %vm4733_vm13, 1.0, %v2517_v12 }
  0x76   : > { %1290 = vst [vmem:[%s2683_s23 + $0x128] sm:$0xff] %v2098_v13  ;;  %4952 = vst [vmem:[#allocation45_spill] sm:$0xff] %v3048_v35  ;;  %vm4736_vm14 = vcmp.gt.f32.partialorder %v3041_v53, 0.0  ;;  %v3057_v40 = vadd.f32 -1.66, %v270_v60  ;;  %vm4742_vm15 = vcmp.gt.f32.partialorder %v3048_v35, 0.0 }
  0x77   : > { %4953 = vst [vmem:[#allocation46_spill] sm:$0xff] %v3050_v63  ;;  %v3059_v13 = vmul.f32 0.95, %v270_v60  ;;  %1291 = vst [vmem:[%s2683_s23 + $0x130] sm:$0xff] %v2099_v54  ;;  %v2100_v43 = vsel %vm4736_vm14, 1.0, %v2517_v12  ;;  %v2101_v60 = vsel %vm4742_vm15, 1.0, %v2517_v12 }
  0x78   : > { %4954 = vst [vmem:[#allocation47_spill] sm:$0xff] %v3057_v40  ;;  %v3066_v63 = vadd.f32 -1.66, %v271_v57  ;;  %v3068_v17 = vmul.f32 0.95, %v271_v57  ;;  %1292 = vst [vmem:[%s2683_s23 + $0x138] sm:$0xff] %v2100_v43 }
  0x79   : > { %4955 = vst [vmem:[#allocation48_spill] sm:$0xff] %v3059_v13  ;;  %vm4738_vm13 = vcmp.gt.f32.partialorder %v3057_v40, 0.0  ;;  %v272_v54 = vld [vmem:[%s2646_s11 + $0x158] sm:$0xff]  ;;  %v273_v13 = vld [vmem:[%s2646_s11 + $0x160] sm:$0xff]  ;;  %v274_v53 = vld [vmem:[%s2646_s11 + $0x168] sm:$0xff]  ;;  %s5459_s4 = smov (!%p3781_p11, %s1930_s4), 31 }
  0x7a   : > { %4956 = vst [vmem:[#allocation49_spill] sm:$0xff] %v3066_v63  ;;  %4957 = vst [vmem:[#allocation50_spill] sm:$0xff] %v3068_v17  ;;  %v2102_v20 = vsel %vm4738_vm13, 1.0, %v2517_v12  ;;  %vm4741_vm14 = vcmp.gt.f32.partialorder %v3066_v63, 0.0  ;;  %v3083_v57 = vadd.f32 -1.66, %v272_v54 }
  0x7b   : > { %1293 = vst [vmem:[%s2683_s23 + $0x140] sm:$0xff] %v2101_v60  ;;  %v3085_v43 = vmul.f32 0.95, %v272_v54  ;;  %1294 = vst [vmem:[%s2683_s23 + $0x148] sm:$0xff] %v2102_v20  ;;  %v2103_v35 = vsel %vm4741_vm14, 1.0, %v2517_v12  ;;  %v275_v60 = vld [vmem:[%s2646_s11 + $0x170] sm:$0xff] }
  0x7c   : > { %4958 = vst [vmem:[#allocation51_spill] sm:$0xff] %v3083_v57  ;;  %v3091_v17 = vadd.f32 -1.66, %v273_v13  ;;  %v3093_v14 = vmul.f32 0.95, %v273_v13  ;;  %1295 = vst [vmem:[%s2683_s23 + $0x150] sm:$0xff] %v2103_v35 }
  0x7d   : > { %4959 = vst [vmem:[#allocation52_spill] sm:$0xff] %v3085_v43  ;;  %vm4743_vm13 = vcmp.gt.f32.partialorder %v3083_v57, 0.0  ;;  %v3098_v40 = vadd.f32 -1.66, %v274_v53  ;;  %v3100_v54 = vmul.f32 0.95, %v274_v53 }
  0x7e   : > { %4960 = vst [vmem:[#allocation53_spill] sm:$0xff] %v3091_v17  ;;  %4961 = vst [vmem:[#allocation54_spill] sm:$0xff] %v3093_v14  ;;  %v276_v20 = vld [vmem:[%s2646_s11 + $0x178] sm:$0xff]  ;;  %v2104_v63 = vsel %vm4743_vm13, 1.0, %v2517_v12  ;;  %vm4746_vm14 = vcmp.gt.f32.partialorder %v3091_v17, 0.0  ;;  %v278_v57 = vld [vmem:[%s2646_s11 + $0x188] sm:$0xff] }
  0x7f   : > { %4962 = vst [vmem:[#allocation55_spill] sm:$0xff] %v3098_v40  ;;  %4963 = vst [vmem:[#allocation56_spill] sm:$0xff] %v3100_v54  ;;  %v3107_v13 = vadd.f32 -1.66, %v275_v60  ;;  %v3109_v35 = vmul.f32 0.95, %v275_v60 }
  0x80   : > { %1296 = vst [vmem:[%s2683_s23 + $0x158] sm:$0xff] %v2104_v63  ;;  %v2105_v53 = vsel %vm4746_vm14, 1.0, %v2517_v12  ;;  %vm4752_vm15 = vcmp.gt.f32.partialorder %v3098_v40, 0.0  ;;  %v3116_v54 = vadd.f32 -1.66, %v276_v20  ;;  %v277_v63 = vld [vmem:[%s2646_s11 + $0x180] sm:$0xff] }
  0x81   : > { %4964 = vst [vmem:[#allocation57_spill] sm:$0xff] %v3107_v13  ;;  %4965 = vst [vmem:[#allocation58_spill] sm:$0xff] %v3109_v35  ;;  %v3118_v14 = vmul.f32 0.95, %v276_v20  ;;  %v2106_v60 = vsel %vm4752_vm15, 1.0, %v2517_v12  ;;  %vm4748_vm13 = vcmp.gt.f32.partialorder %v3107_v13, 0.0 }
  0x82   : > { %4966 = vst [vmem:[#allocation59_spill] sm:$0xff] %v3116_v54  ;;  %1297 = vst [vmem:[%s2683_s23 + $0x160] sm:$0xff] %v2105_v53  ;;  %v279_v17 = vld [vmem:[%s2646_s11 + $0x190] sm:$0xff]  ;;  %v2107_v35 = vsel %vm4748_vm13, 1.0, %v2517_v12  ;;  %vm4751_vm14 = vcmp.gt.f32.partialorder %v3116_v54, 0.0  ;;  %s2329_s7 = sshll.u32 %s5459_s4, 6 }
  0x83   : > { %4967 = vst [vmem:[#allocation60_spill] sm:$0xff] %v3118_v14  ;;  %1298 = vst [vmem:[%s2683_s23 + $0x168] sm:$0xff] %v2106_v60  ;;  %v3133_v20 = vadd.f32 -1.66, %v277_v63  ;;  %v3135_v53 = vmul.f32 0.95, %v277_v63  ;;  %s3920_s19 = scalar_lea.vmem %s4688_s0, %s2329_s7 }
  0x84   : > { %1299 = vst [vmem:[%s2683_s23 + $0x170] sm:$0xff] %v2107_v35  ;;  %v2108_v40 = vsel %vm4751_vm14, 1.0, %v2517_v12  ;;  %v3141_v14 = vadd.f32 -1.66, %v278_v57  ;;  %v3143_v43 = vmul.f32 0.95, %v278_v57 }
  0x85   : > { %4968 = vst [vmem:[#allocation61_spill] sm:$0xff] %v3133_v20  ;;  %4969 = vst [vmem:[#allocation62_spill] sm:$0xff] %v3135_v53  ;;  %v280_v60 = vld [vmem:[%s2646_s11 + $0x198] sm:$0xff]  ;;  %vm4753_vm13 = vcmp.gt.f32.partialorder %v3133_v20, 0.0  ;;  %v3148_v13 = vadd.f32 -1.66, %v279_v17 }
  0x86   : > { %4970 = vst [vmem:[#allocation63_spill] sm:$0xff] %v3141_v14  ;;  %4971 = vst [vmem:[#allocation64_spill] sm:$0xff] %v3143_v43  ;;  %v3150_v63 = vmul.f32 0.95, %v279_v17  ;;  %v281_v35 = vld [vmem:[%s2646_s11 + $0x1a0] sm:$0xff]  ;;  %v2109_v54 = vsel %vm4753_vm13, 1.0, %v2517_v12 }
  0x87   : > { %1300 = vst [vmem:[%s2683_s23 + $0x178] sm:$0xff] %v2108_v40  ;;  %4972 = vst [vmem:[#allocation65_spill] sm:$0xff] %v3148_v13  ;;  %vm4756_vm14 = vcmp.gt.f32.partialorder %v3141_v14, 0.0  ;;  %v3157_v57 = vadd.f32 -1.66, %v280_v60  ;;  %vm4762_vm15 = vcmp.gt.f32.partialorder %v3148_v13, 0.0 }
  0x88   : > { %4973 = vst [vmem:[#allocation66_spill] sm:$0xff] %v3150_v63  ;;  %v3159_v40 = vmul.f32 0.95, %v280_v60  ;;  %1301 = vst [vmem:[%s2683_s23 + $0x180] sm:$0xff] %v2109_v54  ;;  %v2110_v17 = vsel %vm4756_vm14, 1.0, %v2517_v12  ;;  %v2111_v60 = vsel %vm4762_vm15, 1.0, %v2517_v12 }
  0x89   : > { %4974 = vst [vmem:[#allocation67_spill] sm:$0xff] %v3157_v57  ;;  %v3166_v63 = vadd.f32 -1.66, %v281_v35  ;;  %v3168_v43 = vmul.f32 0.95, %v281_v35  ;;  %1302 = vst [vmem:[%s2683_s23 + $0x188] sm:$0xff] %v2110_v17 }
  0x8a   : > { %4975 = vst [vmem:[#allocation68_spill] sm:$0xff] %v3159_v40  ;;  %vm4758_vm13 = vcmp.gt.f32.partialorder %v3157_v57, 0.0  ;;  %v282_v54 = vld [vmem:[%s2646_s11 + $0x1a8] sm:$0xff]  ;;  %v283_v20 = vld [vmem:[%s2646_s11 + $0x1b0] sm:$0xff]  ;;  %v284_v14 = vld [vmem:[%s2646_s11 + $0x1b8] sm:$0xff]  ;;  %s3980_s20 = scalar_lea.vmem [#allocation6], %s2642_s9 }
  0x8b   : > { %4976 = vst [vmem:[#allocation69_spill] sm:$0xff] %v3166_v63  ;;  %4977 = vst [vmem:[#allocation70_spill] sm:$0xff] %v3168_v43  ;;  %v2112_v40 = vsel %vm4758_vm13, 1.0, %v2517_v12  ;;  %vm4761_vm14 = vcmp.gt.f32.partialorder %v3166_v63, 0.0  ;;  %v3183_v35 = vadd.f32 -1.66, %v282_v54 }
  0x8c   : > { %1303 = vst [vmem:[%s2683_s23 + $0x190] sm:$0xff] %v2111_v60  ;;  %v3185_v17 = vmul.f32 0.95, %v282_v54  ;;  %1304 = vst [vmem:[%s2683_s23 + $0x198] sm:$0xff] %v2112_v40  ;;  %v2113_v13 = vsel %vm4761_vm14, 1.0, %v2517_v12  ;;  %v285_v60 = vld [vmem:[%s2646_s11 + $0x1c0] sm:$0xff] }
  0x8d   : > { %4978 = vst [vmem:[#allocation71_spill] sm:$0xff] %v3183_v35  ;;  %v3191_v43 = vadd.f32 -1.66, %v283_v20  ;;  %v3193_v53 = vmul.f32 0.95, %v283_v20  ;;  %1305 = vst [vmem:[%s2683_s23 + $0x1a0] sm:$0xff] %v2113_v13 }
  0x8e   : > { %4979 = vst [vmem:[#allocation72_spill] sm:$0xff] %v3185_v17  ;;  %vm4763_vm13 = vcmp.gt.f32.partialorder %v3183_v35, 0.0  ;;  %v3198_v57 = vadd.f32 -1.66, %v284_v14  ;;  %v3200_v54 = vmul.f32 0.95, %v284_v14 }
  0x8f   : > { %4980 = vst [vmem:[#allocation73_spill] sm:$0xff] %v3191_v43  ;;  %4981 = vst [vmem:[#allocation74_spill] sm:$0xff] %v3193_v53  ;;  %v286_v40 = vld [vmem:[%s2646_s11 + $0x1c8] sm:$0xff]  ;;  %v2114_v63 = vsel %vm4763_vm13, 1.0, %v2517_v12  ;;  %vm4766_vm14 = vcmp.gt.f32.partialorder %v3191_v43, 0.0  ;;  %v289_v43 = vld [vmem:[%s2646_s11 + $0x1e0] sm:$0xff] }
  0x90   : > { %4982 = vst [vmem:[#allocation75_spill] sm:$0xff] %v3198_v57  ;;  %4983 = vst [vmem:[#allocation76_spill] sm:$0xff] %v3200_v54  ;;  %v3207_v20 = vadd.f32 -1.66, %v285_v60  ;;  %v3209_v13 = vmul.f32 0.95, %v285_v60 }
  0x91   : > { %1306 = vst [vmem:[%s2683_s23 + $0x1a8] sm:$0xff] %v2114_v63  ;;  %v2115_v14 = vsel %vm4766_vm14, 1.0, %v2517_v12  ;;  %vm4772_vm15 = vcmp.gt.f32.partialorder %v3198_v57, 0.0  ;;  %v3216_v54 = vadd.f32 -1.66, %v286_v40  ;;  %v287_v63 = vld [vmem:[%s2646_s11 + $0x1d0] sm:$0xff] }
  0x92   : > { %4984 = vst [vmem:[#allocation77_spill] sm:$0xff] %v3207_v20  ;;  %4985 = vst [vmem:[#allocation78_spill] sm:$0xff] %v3209_v13  ;;  %v3218_v53 = vmul.f32 0.95, %v286_v40  ;;  %v2116_v60 = vsel %vm4772_vm15, 1.0, %v2517_v12  ;;  %vm4768_vm13 = vcmp.gt.f32.partialorder %v3207_v20, 0.0 }
  0x93   : > { %4986 = vst [vmem:[#allocation79_spill] sm:$0xff] %v3216_v54  ;;  %1307 = vst [vmem:[%s2683_s23 + $0x1b0] sm:$0xff] %v2115_v14  ;;  %v288_v13 = vld [vmem:[%s2646_s11 + $0x1d8] sm:$0xff]  ;;  %v2117_v35 = vsel %vm4768_vm13, 1.0, %v2517_v12  ;;  %vm4771_vm14 = vcmp.gt.f32.partialorder %v3216_v54, 0.0  ;;  %v363_v27 = vld [vmem:[%s3920_s19 + $0x30] sm:$0xff] }
  0x94   : > { %4987 = vst [vmem:[#allocation80_spill] sm:$0xff] %v3218_v53  ;;  %1308 = vst [vmem:[%s2683_s23 + $0x1b8] sm:$0xff] %v2116_v60  ;;  %v3233_v40 = vadd.f32 -1.66, %v287_v63  ;;  %v3235_v14 = vmul.f32 0.95, %v287_v63 }
  0x95   : > { %1309 = vst [vmem:[%s2683_s23 + $0x1c0] sm:$0xff] %v2117_v35  ;;  %v2118_v57 = vsel %vm4771_vm14, 1.0, %v2517_v12  ;;  %v3241_v53 = vadd.f32 -1.66, %v288_v13  ;;  %v3243_v17 = vmul.f32 0.95, %v288_v13 }
  0x96   : > { %4988 = vst [vmem:[#allocation81_spill] sm:$0xff] %v3233_v40  ;;  %4989 = vst [vmem:[#allocation82_spill] sm:$0xff] %v3235_v14  ;;  %v290_v60 = vld [vmem:[%s2646_s11 + $0x1e8] sm:$0xff]  ;;  %vm4773_vm13 = vcmp.gt.f32.partialorder %v3233_v40, 0.0  ;;  %v3248_v20 = vadd.f32 -1.66, %v289_v43 }
  0x97   : > { %4990 = vst [vmem:[#allocation83_spill] sm:$0xff] %v3241_v53  ;;  %4991 = vst [vmem:[#allocation84_spill] sm:$0xff] %v3243_v17  ;;  %v3250_v63 = vmul.f32 0.95, %v289_v43  ;;  %v291_v35 = vld [vmem:[%s2646_s11 + $0x1f0] sm:$0xff]  ;;  %v2119_v54 = vsel %vm4773_vm13, 1.0, %v2517_v12 }
  0x98   : > { %1310 = vst [vmem:[%s2683_s23 + $0x1c8] sm:$0xff] %v2118_v57  ;;  %4992 = vst [vmem:[#allocation85_spill] sm:$0xff] %v3248_v20  ;;  %vm4776_vm14 = vcmp.gt.f32.partialorder %v3241_v53, 0.0  ;;  %v3257_v13 = vadd.f32 -1.66, %v290_v60  ;;  %vm4782_vm15 = vcmp.gt.f32.partialorder %v3248_v20, 0.0 }
  0x99   : > { %4993 = vst [vmem:[#allocation86_spill] sm:$0xff] %v3250_v63  ;;  %v3259_v57 = vmul.f32 0.95, %v290_v60  ;;  %1311 = vst [vmem:[%s2683_s23 + $0x1d0] sm:$0xff] %v2119_v54  ;;  %v2120_v43 = vsel %vm4776_vm14, 1.0, %v2517_v12  ;;  %v2121_v60 = vsel %vm4782_vm15, 1.0, %v2517_v12 }
  0x9a   : > { %4994 = vst [vmem:[#allocation87_spill] sm:$0xff] %v3257_v13  ;;  %v3266_v63 = vadd.f32 -1.66, %v291_v35  ;;  %v3268_v17 = vmul.f32 0.95, %v291_v35  ;;  %1312 = vst [vmem:[%s2683_s23 + $0x1d8] sm:$0xff] %v2120_v43 }
  0x9b   : > { %4995 = vst [vmem:[#allocation88_spill] sm:$0xff] %v3259_v57  ;;  %vm4778_vm13 = vcmp.gt.f32.partialorder %v3257_v13, 0.0  ;;  %v292_v54 = vld [vmem:[%s2646_s11 + $0x1f8] sm:$0xff]  ;;  %v293_v40 = vld [vmem:[%s2646_s11 + $0x200] sm:$0xff]  ;;  %v294_v53 = vld [vmem:[%s2646_s11 + $0x208] sm:$0xff]  ;;  %s2331_s22 = sshll.u32 %s2563_s16, 14 }
  0x9c   : > { %4996 = vst [vmem:[#allocation89_spill] sm:$0xff] %v3266_v63  ;;  %4997 = vst [vmem:[#allocation90_spill] sm:$0xff] %v3268_v17  ;;  %v2122_v57 = vsel %vm4778_vm13, 1.0, %v2517_v12  ;;  %vm4781_vm14 = vcmp.gt.f32.partialorder %v3266_v63, 0.0  ;;  %v3283_v35 = vadd.f32 -1.66, %v292_v54  ;;  %s4319_s29 = scalar_lea.hbm %s4690_s2, %s2331_s22 }
  0x9d   : > { %1313 = vst [vmem:[%s2683_s23 + $0x1e0] sm:$0xff] %v2121_v60  ;;  %v3285_v43 = vmul.f32 0.95, %v292_v54  ;;  %1314 = vst [vmem:[%s2683_s23 + $0x1e8] sm:$0xff] %v2122_v57  ;;  %v2123_v20 = vsel %vm4781_vm14, 1.0, %v2517_v12  ;;  %v295_v60 = vld [vmem:[%s2646_s11 + $0x210] sm:$0xff] }
  0x9e   : > { %4998 = vst [vmem:[#allocation91_spill] sm:$0xff] %v3283_v35  ;;  %v3291_v17 = vadd.f32 -1.66, %v293_v40  ;;  %v3293_v14 = vmul.f32 0.95, %v293_v40  ;;  %1315 = vst [vmem:[%s2683_s23 + $0x1f0] sm:$0xff] %v2123_v20 }
  0x9f   : > { %4999 = vst [vmem:[#allocation92_spill] sm:$0xff] %v3285_v43  ;;  %vm4783_vm13 = vcmp.gt.f32.partialorder %v3283_v35, 0.0  ;;  %v3298_v13 = vadd.f32 -1.66, %v294_v53  ;;  %v3300_v54 = vmul.f32 0.95, %v294_v53 }
  0xa0   : > { %5000 = vst [vmem:[#allocation93_spill] sm:$0xff] %v3291_v17  ;;  %5001 = vst [vmem:[#allocation94_spill] sm:$0xff] %v3293_v14  ;;  %v296_v57 = vld [vmem:[%s2646_s11 + $0x218] sm:$0xff]  ;;  %v2124_v63 = vsel %vm4783_vm13, 1.0, %v2517_v12  ;;  %vm4786_vm14 = vcmp.gt.f32.partialorder %v3291_v17, 0.0  ;;  %v299_v17 = vld [vmem:[%s2646_s11 + $0x230] sm:$0xff] }
  0xa1   : > { %5002 = vst [vmem:[#allocation95_spill] sm:$0xff] %v3298_v13  ;;  %5003 = vst [vmem:[#allocation96_spill] sm:$0xff] %v3300_v54  ;;  %v3307_v40 = vadd.f32 -1.66, %v295_v60  ;;  %v3309_v20 = vmul.f32 0.95, %v295_v60 }
  0xa2   : > { %1316 = vst [vmem:[%s2683_s23 + $0x1f8] sm:$0xff] %v2124_v63  ;;  %v2125_v53 = vsel %vm4786_vm14, 1.0, %v2517_v12  ;;  %vm4792_vm15 = vcmp.gt.f32.partialorder %v3298_v13, 0.0  ;;  %v3316_v54 = vadd.f32 -1.66, %v296_v57  ;;  %v297_v63 = vld [vmem:[%s2646_s11 + $0x220] sm:$0xff] }
  0xa3   : > { %5004 = vst [vmem:[#allocation97_spill] sm:$0xff] %v3307_v40  ;;  %5005 = vst [vmem:[#allocation98_spill] sm:$0xff] %v3309_v20  ;;  %v3318_v14 = vmul.f32 0.95, %v296_v57  ;;  %v2126_v60 = vsel %vm4792_vm15, 1.0, %v2517_v12  ;;  %vm4788_vm13 = vcmp.gt.f32.partialorder %v3307_v40, 0.0 }
  0xa4   : > { %5006 = vst [vmem:[#allocation99_spill] sm:$0xff] %v3316_v54  ;;  %1317 = vst [vmem:[%s2683_s23 + $0x200] sm:$0xff] %v2125_v53  ;;  %v298_v20 = vld [vmem:[%s2646_s11 + $0x228] sm:$0xff]  ;;  %v2127_v35 = vsel %vm4788_vm13, 1.0, %v2517_v12  ;;  %vm4791_vm14 = vcmp.gt.f32.partialorder %v3316_v54, 0.0  ;;  %v367_v16 = vld [vmem:[%s3920_s19 + $0x50] sm:$0xff] }
  0xa5   : > { %5007 = vst [vmem:[#allocation100_spill] sm:$0xff] %v3318_v14  ;;  %1318 = vst [vmem:[%s2683_s23 + $0x208] sm:$0xff] %v2126_v60  ;;  %v3333_v57 = vadd.f32 -1.66, %v297_v63  ;;  %v3335_v53 = vmul.f32 0.95, %v297_v63 }
  0xa6   : > { %1319 = vst [vmem:[%s2683_s23 + $0x210] sm:$0xff] %v2127_v35  ;;  %v2128_v13 = vsel %vm4791_vm14, 1.0, %v2517_v12  ;;  %v3341_v14 = vadd.f32 -1.66, %v298_v20  ;;  %v3343_v43 = vmul.f32 0.95, %v298_v20 }
  0xa7   : > { %5008 = vst [vmem:[#allocation101_spill] sm:$0xff] %v3333_v57  ;;  %5009 = vst [vmem:[#allocation102_spill] sm:$0xff] %v3335_v53  ;;  %v300_v60 = vld [vmem:[%s2646_s11 + $0x238] sm:$0xff]  ;;  %vm4793_vm13 = vcmp.gt.f32.partialorder %v3333_v57, 0.0  ;;  %v3348_v40 = vadd.f32 -1.66, %v299_v17 }
  0xa8   : > { %5010 = vst [vmem:[#allocation103_spill] sm:$0xff] %v3341_v14  ;;  %5011 = vst [vmem:[#allocation104_spill] sm:$0xff] %v3343_v43  ;;  %v3350_v63 = vmul.f32 0.95, %v299_v17  ;;  %v301_v35 = vld [vmem:[%s2646_s11 + $0x240] sm:$0xff]  ;;  %v2129_v54 = vsel %vm4793_vm13, 1.0, %v2517_v12 }
  0xa9   : > { %1320 = vst [vmem:[%s2683_s23 + $0x218] sm:$0xff] %v2128_v13  ;;  %5012 = vst [vmem:[#allocation105_spill] sm:$0xff] %v3348_v40  ;;  %vm4796_vm14 = vcmp.gt.f32.partialorder %v3341_v14, 0.0  ;;  %v3357_v20 = vadd.f32 -1.66, %v300_v60  ;;  %vm4802_vm15 = vcmp.gt.f32.partialorder %v3348_v40, 0.0 }
  0xaa   : > { %5013 = vst [vmem:[#allocation106_spill] sm:$0xff] %v3350_v63  ;;  %v3359_v13 = vmul.f32 0.95, %v300_v60  ;;  %1321 = vst [vmem:[%s2683_s23 + $0x220] sm:$0xff] %v2129_v54  ;;  %v2130_v17 = vsel %vm4796_vm14, 1.0, %v2517_v12  ;;  %v2131_v60 = vsel %vm4802_vm15, 1.0, %v2517_v12 }
  0xab   : > { %5014 = vst [vmem:[#allocation107_spill] sm:$0xff] %v3357_v20  ;;  %v3366_v63 = vadd.f32 -1.66, %v301_v35  ;;  %v3368_v43 = vmul.f32 0.95, %v301_v35  ;;  %1322 = vst [vmem:[%s2683_s23 + $0x228] sm:$0xff] %v2130_v17 }
  0xac   : > { %5015 = vst [vmem:[#allocation108_spill] sm:$0xff] %v3359_v13  ;;  %vm4798_vm13 = vcmp.gt.f32.partialorder %v3357_v20, 0.0  ;;  %v302_v54 = vld [vmem:[%s2646_s11 + $0x248] sm:$0xff]  ;;  %v303_v57 = vld [vmem:[%s2646_s11 + $0x250] sm:$0xff]  ;;  %v304_v14 = vld [vmem:[%s2646_s11 + $0x258] sm:$0xff]  ;;  %s1785_s26 = sshll.u32 %s2683_s23, 4  ;;  %s4333_s26 = int_to_ptr.vmem [resolvable:$true] %s1785_s26 }
  0xad   : > { %5016 = vst [vmem:[#allocation109_spill] sm:$0xff] %v3366_v63  ;;  %5017 = vst [vmem:[#allocation110_spill] sm:$0xff] %v3368_v43  ;;  %v2132_v13 = vsel %vm4798_vm13, 1.0, %v2517_v12  ;;  %vm4801_vm14 = vcmp.gt.f32.partialorder %v3366_v63, 0.0  ;;  %v3383_v35 = vadd.f32 -1.66, %v302_v54 }
  0xae   : > { %1323 = vst [vmem:[%s2683_s23 + $0x230] sm:$0xff] %v2131_v60  ;;  %v3385_v17 = vmul.f32 0.95, %v302_v54  ;;  %1324 = vst [vmem:[%s2683_s23 + $0x238] sm:$0xff] %v2132_v13  ;;  %v2133_v43 = vsel %vm4801_vm14, 1.0, %v2517_v12  ;;  %v305_v60 = vld [vmem:[%s2646_s11 + $0x260] sm:$0xff] }
  0xaf   : > { %5018 = vst [vmem:[#allocation111_spill] sm:$0xff] %v3383_v35  ;;  %v3391_v40 = vadd.f32 -1.66, %v303_v57  ;;  %v3393_v53 = vmul.f32 0.95, %v303_v57  ;;  %1325 = vst [vmem:[%s2683_s23 + $0x240] sm:$0xff] %v2133_v43 }
  0xb0   : > { %5019 = vst [vmem:[#allocation112_spill] sm:$0xff] %v3385_v17  ;;  %vm4803_vm13 = vcmp.gt.f32.partialorder %v3383_v35, 0.0  ;;  %v3398_v20 = vadd.f32 -1.66, %v304_v14  ;;  %v3400_v54 = vmul.f32 0.95, %v304_v14 }
  0xb1   : > { %5020 = vst [vmem:[#allocation113_spill] sm:$0xff] %v3391_v40  ;;  %5021 = vst [vmem:[#allocation114_spill] sm:$0xff] %v3393_v53  ;;  %v306_v13 = vld [vmem:[%s2646_s11 + $0x268] sm:$0xff]  ;;  %v2134_v63 = vsel %vm4803_vm13, 1.0, %v2517_v12  ;;  %vm4806_vm14 = vcmp.gt.f32.partialorder %v3391_v40, 0.0  ;;  %v308_v35 = vld [vmem:[%s2646_s11 + $0x278] sm:$0xff] }
  0xb2   : > { %5022 = vst [vmem:[#allocation115_spill] sm:$0xff] %v3398_v20  ;;  %5023 = vst [vmem:[#allocation116_spill] sm:$0xff] %v3400_v54  ;;  %v3407_v57 = vadd.f32 -1.66, %v305_v60  ;;  %v3409_v43 = vmul.f32 0.95, %v305_v60 }
  0xb3   : > { %1326 = vst [vmem:[%s2683_s23 + $0x248] sm:$0xff] %v2134_v63  ;;  %v2135_v14 = vsel %vm4806_vm14, 1.0, %v2517_v12  ;;  %vm4812_vm15 = vcmp.gt.f32.partialorder %v3398_v20, 0.0  ;;  %v3416_v54 = vadd.f32 -1.66, %v306_v13  ;;  %v307_v63 = vld [vmem:[%s2646_s11 + $0x270] sm:$0xff] }
  0xb4   : > { %5024 = vst [vmem:[#allocation117_spill] sm:$0xff] %v3407_v57  ;;  %5025 = vst [vmem:[#allocation118_spill] sm:$0xff] %v3409_v43  ;;  %v3418_v53 = vmul.f32 0.95, %v306_v13  ;;  %v2136_v60 = vsel %vm4812_vm15, 1.0, %v2517_v12  ;;  %vm4808_vm13 = vcmp.gt.f32.partialorder %v3407_v57, 0.0 }
  0xb5   : > { %5026 = vst [vmem:[#allocation119_spill] sm:$0xff] %v3416_v54  ;;  %1327 = vst [vmem:[%s2683_s23 + $0x250] sm:$0xff] %v2135_v14  ;;  %v309_v40 = vld [vmem:[%s2646_s11 + $0x280] sm:$0xff]  ;;  %v2137_v43 = vsel %vm4808_vm13, 1.0, %v2517_v12  ;;  %vm4811_vm14 = vcmp.gt.f32.partialorder %v3416_v54, 0.0  ;;  %v374_v29 = vld [vmem:[%s3920_s19 + $0x88] sm:$0xff] }
  0xb6   : > { %5027 = vst [vmem:[#allocation120_spill] sm:$0xff] %v3418_v53  ;;  %1328 = vst [vmem:[%s2683_s23 + $0x258] sm:$0xff] %v2136_v60  ;;  %v3433_v13 = vadd.f32 -1.66, %v307_v63  ;;  %v3435_v14 = vmul.f32 0.95, %v307_v63  ;;  %v886_v48 = vadd.f32 %v2818_v11, %v374_v29 }
  0xb7   : > { %1329 = vst [vmem:[%s2683_s23 + $0x260] sm:$0xff] %v2137_v43  ;;  %v2138_v20 = vsel %vm4811_vm14, 1.0, %v2517_v12  ;;  %v3441_v53 = vadd.f32 -1.66, %v308_v35  ;;  %v3443_v17 = vmul.f32 0.95, %v308_v35 }
  0xb8   : > { %5028 = vst [vmem:[#allocation121_spill] sm:$0xff] %v3433_v13  ;;  %5029 = vst [vmem:[#allocation122_spill] sm:$0xff] %v3435_v14  ;;  %v310_v60 = vld [vmem:[%s2646_s11 + $0x288] sm:$0xff]  ;;  %vm4813_vm13 = vcmp.gt.f32.partialorder %v3433_v13, 0.0  ;;  %v3448_v57 = vadd.f32 -1.66, %v309_v40 }
  0xb9   : > { %5030 = vst [vmem:[#allocation123_spill] sm:$0xff] %v3441_v53  ;;  %5031 = vst [vmem:[#allocation124_spill] sm:$0xff] %v3443_v17  ;;  %v3450_v63 = vmul.f32 0.95, %v309_v40  ;;  %v311_v43 = vld [vmem:[%s2646_s11 + $0x290] sm:$0xff]  ;;  %v2139_v54 = vsel %vm4813_vm13, 1.0, %v2517_v12 }
  0xba   : > { %1330 = vst [vmem:[%s2683_s23 + $0x268] sm:$0xff] %v2138_v20  ;;  %5032 = vst [vmem:[#allocation125_spill] sm:$0xff] %v3448_v57  ;;  %vm4816_vm14 = vcmp.gt.f32.partialorder %v3441_v53, 0.0  ;;  %v3457_v35 = vadd.f32 -1.66, %v310_v60  ;;  %vm4822_vm15 = vcmp.gt.f32.partialorder %v3448_v57, 0.0 }
  0xbb   : > { %5033 = vst [vmem:[#allocation126_spill] sm:$0xff] %v3450_v63  ;;  %v3459_v20 = vmul.f32 0.95, %v310_v60  ;;  %1331 = vst [vmem:[%s2683_s23 + $0x270] sm:$0xff] %v2139_v54  ;;  %v2140_v40 = vsel %vm4816_vm14, 1.0, %v2517_v12  ;;  %v2141_v60 = vsel %vm4822_vm15, 1.0, %v2517_v12 }
  0xbc   : > { %5034 = vst [vmem:[#allocation127_spill] sm:$0xff] %v3457_v35  ;;  %v3466_v63 = vadd.f32 -1.66, %v311_v43  ;;  %v3468_v17 = vmul.f32 0.95, %v311_v43  ;;  %1332 = vst [vmem:[%s2683_s23 + $0x278] sm:$0xff] %v2140_v40 }
  0xbd   : > { %5035 = vst [vmem:[#allocation128_spill] sm:$0xff] %v3459_v20  ;;  %vm4818_vm13 = vcmp.gt.f32.partialorder %v3457_v35, 0.0  ;;  %v312_v54 = vld [vmem:[%s2646_s11 + $0x298] sm:$0xff]  ;;  %v313_v20 = vld [vmem:[%s2646_s11 + $0x2a0] sm:$0xff]  ;;  %v314_v53 = vld [vmem:[%s2646_s11 + $0x2a8] sm:$0xff]  ;;  %s1766_s30 = scalar_lea.sflag [#allocation4], %s2639_s5 }
  0xbe   : > { %5036 = vst [vmem:[#allocation129_spill] sm:$0xff] %v3466_v63  ;;  %5037 = vst [vmem:[#allocation130_spill] sm:$0xff] %v3468_v17  ;;  %v2142_v13 = vsel %vm4818_vm13, 1.0, %v2517_v12  ;;  %vm4821_vm14 = vcmp.gt.f32.partialorder %v3466_v63, 0.0  ;;  %v3483_v43 = vadd.f32 -1.66, %v312_v54 }
  0xbf   : > { %1333 = vst [vmem:[%s2683_s23 + $0x280] sm:$0xff] %v2141_v60  ;;  %v3485_v40 = vmul.f32 0.95, %v312_v54  ;;  %1334 = vst [vmem:[%s2683_s23 + $0x288] sm:$0xff] %v2142_v13  ;;  %v2143_v57 = vsel %vm4821_vm14, 1.0, %v2517_v12  ;;  %v315_v60 = vld [vmem:[%s2646_s11 + $0x2b0] sm:$0xff] }
  0xc0   : > { %5038 = vst [vmem:[#allocation131_spill] sm:$0xff] %v3483_v43  ;;  %v3491_v17 = vadd.f32 -1.66, %v313_v20  ;;  %v3493_v14 = vmul.f32 0.95, %v313_v20  ;;  %1335 = vst [vmem:[%s2683_s23 + $0x290] sm:$0xff] %v2143_v57 }
  0xc1   : > { %5039 = vst [vmem:[#allocation132_spill] sm:$0xff] %v3485_v40  ;;  %vm4823_vm13 = vcmp.gt.f32.partialorder %v3483_v43, 0.0  ;;  %v3498_v35 = vadd.f32 -1.66, %v314_v53  ;;  %v3500_v54 = vmul.f32 0.95, %v314_v53 }
  0xc2   : > { %5040 = vst [vmem:[#allocation133_spill] sm:$0xff] %v3491_v17  ;;  %5041 = vst [vmem:[#allocation134_spill] sm:$0xff] %v3493_v14  ;;  %v316_v13 = vld [vmem:[%s2646_s11 + $0x2b8] sm:$0xff]  ;;  %v2144_v63 = vsel %vm4823_vm13, 1.0, %v2517_v12  ;;  %vm4826_vm14 = vcmp.gt.f32.partialorder %v3491_v17, 0.0  ;;  %v318_v43 = vld [vmem:[%s2646_s11 + $0x2c8] sm:$0xff] }
  0xc3   : > { %5042 = vst [vmem:[#allocation135_spill] sm:$0xff] %v3498_v35  ;;  %5043 = vst [vmem:[#allocation136_spill] sm:$0xff] %v3500_v54  ;;  %v3507_v20 = vadd.f32 -1.66, %v315_v60  ;;  %v3509_v57 = vmul.f32 0.95, %v315_v60 }
  0xc4   : > { %1336 = vst [vmem:[%s2683_s23 + $0x298] sm:$0xff] %v2144_v63  ;;  %v2145_v53 = vsel %vm4826_vm14, 1.0, %v2517_v12  ;;  %vm4832_vm15 = vcmp.gt.f32.partialorder %v3498_v35, 0.0  ;;  %v3516_v54 = vadd.f32 -1.66, %v316_v13  ;;  %v317_v63 = vld [vmem:[%s2646_s11 + $0x2c0] sm:$0xff] }
  0xc5   : > { %5044 = vst [vmem:[#allocation137_spill] sm:$0xff] %v3507_v20  ;;  %5045 = vst [vmem:[#allocation138_spill] sm:$0xff] %v3509_v57  ;;  %v3518_v14 = vmul.f32 0.95, %v316_v13  ;;  %v2146_v60 = vsel %vm4832_vm15, 1.0, %v2517_v12  ;;  %vm4828_vm13 = vcmp.gt.f32.partialorder %v3507_v20, 0.0 }
  0xc6   : > { %5046 = vst [vmem:[#allocation139_spill] sm:$0xff] %v3516_v54  ;;  %1337 = vst [vmem:[%s2683_s23 + $0x2a0] sm:$0xff] %v2145_v53  ;;  %v319_v17 = vld [vmem:[%s2646_s11 + $0x2d0] sm:$0xff]  ;;  %v2147_v57 = vsel %vm4828_vm13, 1.0, %v2517_v12  ;;  %vm4831_vm14 = vcmp.gt.f32.partialorder %v3516_v54, 0.0  ;;  %v373_v26 = vld [vmem:[%s3920_s19 + $0x80] sm:$0xff] }
  0xc7   : > { %5047 = vst [vmem:[#allocation140_spill] sm:$0xff] %v3518_v14  ;;  %1338 = vst [vmem:[%s2683_s23 + $0x2a8] sm:$0xff] %v2146_v60  ;;  %v3533_v13 = vadd.f32 -1.66, %v317_v63  ;;  %v3535_v53 = vmul.f32 0.95, %v317_v63  ;;  %v885_v44 = vadd.f32 %v2809_v2, %v373_v26 }
  0xc8   : > { %1339 = vst [vmem:[%s2683_s23 + $0x2b0] sm:$0xff] %v2147_v57  ;;  %v2148_v35 = vsel %vm4831_vm14, 1.0, %v2517_v12  ;;  %v3541_v14 = vadd.f32 -1.66, %v318_v43  ;;  %v3543_v40 = vmul.f32 0.95, %v318_v43 }
  0xc9   : > { %5048 = vst [vmem:[#allocation141_spill] sm:$0xff] %v3533_v13  ;;  %5049 = vst [vmem:[#allocation142_spill] sm:$0xff] %v3535_v53  ;;  %v320_v60 = vld [vmem:[%s2646_s11 + $0x2d8] sm:$0xff]  ;;  %vm4833_vm13 = vcmp.gt.f32.partialorder %v3533_v13, 0.0  ;;  %v3548_v20 = vadd.f32 -1.66, %v319_v17 }
  0xca   : > { %5050 = vst [vmem:[#allocation143_spill] sm:$0xff] %v3541_v14  ;;  %5051 = vst [vmem:[#allocation144_spill] sm:$0xff] %v3543_v40  ;;  %v3550_v63 = vmul.f32 0.95, %v319_v17  ;;  %v321_v57 = vld [vmem:[%s2646_s11 + $0x2e0] sm:$0xff]  ;;  %v2149_v54 = vsel %vm4833_vm13, 1.0, %v2517_v12 }
  0xcb   : > { %1340 = vst [vmem:[%s2683_s23 + $0x2b8] sm:$0xff] %v2148_v35  ;;  %5052 = vst [vmem:[#allocation145_spill] sm:$0xff] %v3548_v20  ;;  %vm4836_vm14 = vcmp.gt.f32.partialorder %v3541_v14, 0.0  ;;  %v3557_v43 = vadd.f32 -1.66, %v320_v60  ;;  %vm4842_vm15 = vcmp.gt.f32.partialorder %v3548_v20, 0.0 }
  0xcc   : > { %5053 = vst [vmem:[#allocation146_spill] sm:$0xff] %v3550_v63  ;;  %v3559_v35 = vmul.f32 0.95, %v320_v60  ;;  %1341 = vst [vmem:[%s2683_s23 + $0x2c0] sm:$0xff] %v2149_v54  ;;  %v2150_v17 = vsel %vm4836_vm14, 1.0, %v2517_v12  ;;  %v2151_v60 = vsel %vm4842_vm15, 1.0, %v2517_v12 }
  0xcd   : > { %5054 = vst [vmem:[#allocation147_spill] sm:$0xff] %v3557_v43  ;;  %v3566_v63 = vadd.f32 -1.66, %v321_v57  ;;  %v3568_v40 = vmul.f32 0.95, %v321_v57  ;;  %1342 = vst [vmem:[%s2683_s23 + $0x2c8] sm:$0xff] %v2150_v17 }
  0xce   : > { %5055 = vst [vmem:[#allocation148_spill] sm:$0xff] %v3559_v35  ;;  %vm4838_vm13 = vcmp.gt.f32.partialorder %v3557_v43, 0.0  ;;  %v322_v54 = vld [vmem:[%s2646_s11 + $0x2e8] sm:$0xff]  ;;  %v323_v13 = vld [vmem:[%s2646_s11 + $0x2f0] sm:$0xff]  ;;  %v324_v14 = vld [vmem:[%s2646_s11 + $0x2f8] sm:$0xff]  ;;  %s2418_s9 = scalar_lea.vmem %s4333_s26, 16384 }
  0xcf   : > { %5056 = vst [vmem:[#allocation149_spill] sm:$0xff] %v3566_v63  ;;  %5057 = vst [vmem:[#allocation150_spill] sm:$0xff] %v3568_v40  ;;  %v2152_v35 = vsel %vm4838_vm13, 1.0, %v2517_v12  ;;  %vm4841_vm14 = vcmp.gt.f32.partialorder %v3566_v63, 0.0  ;;  %v3583_v57 = vadd.f32 -1.66, %v322_v54  ;;  %p2419_p12 = scmp.ne.s32.totalorder %s4333_s26, %s2418_s9 }
  0xd0   : > { %1343 = vst [vmem:[%s2683_s23 + $0x2d0] sm:$0xff] %v2151_v60  ;;  %v3585_v17 = vmul.f32 0.95, %v322_v54  ;;  %1344 = vst [vmem:[%s2683_s23 + $0x2d8] sm:$0xff] %v2152_v35  ;;  %v2153_v20 = vsel %vm4841_vm14, 1.0, %v2517_v12  ;;  %v325_v60 = vld [vmem:[%s2646_s11 + $0x300] sm:$0xff] }
  0xd1   : > { %5058 = vst [vmem:[#allocation151_spill] sm:$0xff] %v3583_v57  ;;  %v3591_v40 = vadd.f32 -1.66, %v323_v13  ;;  %v3593_v53 = vmul.f32 0.95, %v323_v13  ;;  %1345 = vst [vmem:[%s2683_s23 + $0x2e0] sm:$0xff] %v2153_v20 }
  0xd2   : > { %5059 = vst [vmem:[#allocation152_spill] sm:$0xff] %v3585_v17  ;;  %vm4843_vm13 = vcmp.gt.f32.partialorder %v3583_v57, 0.0  ;;  %v3598_v43 = vadd.f32 -1.66, %v324_v14  ;;  %v3600_v54 = vmul.f32 0.95, %v324_v14 }
  0xd3   : > { %5060 = vst [vmem:[#allocation153_spill] sm:$0xff] %v3591_v40  ;;  %5061 = vst [vmem:[#allocation154_spill] sm:$0xff] %v3593_v53  ;;  %v326_v35 = vld [vmem:[%s2646_s11 + $0x308] sm:$0xff]  ;;  %v2154_v63 = vsel %vm4843_vm13, 1.0, %v2517_v12  ;;  %vm4846_vm14 = vcmp.gt.f32.partialorder %v3591_v40, 0.0  ;;  %v329_v40 = vld [vmem:[%s2646_s11 + $0x320] sm:$0xff] }
  0xd4   : > { %5062 = vst [vmem:[#allocation155_spill] sm:$0xff] %v3598_v43  ;;  %5063 = vst [vmem:[#allocation156_spill] sm:$0xff] %v3600_v54  ;;  %v3607_v13 = vadd.f32 -1.66, %v325_v60  ;;  %v3609_v20 = vmul.f32 0.95, %v325_v60 }
  0xd5   : > { %1346 = vst [vmem:[%s2683_s23 + $0x2e8] sm:$0xff] %v2154_v63  ;;  %v2155_v14 = vsel %vm4846_vm14, 1.0, %v2517_v12  ;;  %vm4852_vm15 = vcmp.gt.f32.partialorder %v3598_v43, 0.0  ;;  %v3616_v54 = vadd.f32 -1.66, %v326_v35  ;;  %v327_v63 = vld [vmem:[%s2646_s11 + $0x310] sm:$0xff] }
  0xd6   : > { %5064 = vst [vmem:[#allocation157_spill] sm:$0xff] %v3607_v13  ;;  %5065 = vst [vmem:[#allocation158_spill] sm:$0xff] %v3609_v20  ;;  %v3618_v53 = vmul.f32 0.95, %v326_v35  ;;  %v2156_v60 = vsel %vm4852_vm15, 1.0, %v2517_v12  ;;  %vm4848_vm13 = vcmp.gt.f32.partialorder %v3607_v13, 0.0 }
  0xd7   : > { %5066 = vst [vmem:[#allocation159_spill] sm:$0xff] %v3616_v54  ;;  %1347 = vst [vmem:[%s2683_s23 + $0x2f0] sm:$0xff] %v2155_v14  ;;  %v328_v20 = vld [vmem:[%s2646_s11 + $0x318] sm:$0xff]  ;;  %v2157_v57 = vsel %vm4848_vm13, 1.0, %v2517_v12  ;;  %vm4851_vm14 = vcmp.gt.f32.partialorder %v3616_v54, 0.0  ;;  %v5142_v26 = vld [vmem:[#allocation12_spill] sm:$0xff] }
  0xd8   : > { %5067 = vst [vmem:[#allocation160_spill] sm:$0xff] %v3618_v53  ;;  %1348 = vst [vmem:[%s2683_s23 + $0x2f8] sm:$0xff] %v2156_v60  ;;  %v3633_v35 = vadd.f32 -1.66, %v327_v63  ;;  %v3635_v14 = vmul.f32 0.95, %v327_v63 }
  0xd9   : > { %1349 = vst [vmem:[%s2683_s23 + $0x300] sm:$0xff] %v2157_v57  ;;  %v2158_v43 = vsel %vm4851_vm14, 1.0, %v2517_v12  ;;  %v3641_v53 = vadd.f32 -1.66, %v328_v20  ;;  %v3643_v17 = vmul.f32 0.95, %v328_v20 }
  0xda   : > { %5068 = vst [vmem:[#allocation161_spill] sm:$0xff] %v3633_v35  ;;  %5069 = vst [vmem:[#allocation162_spill] sm:$0xff] %v3635_v14  ;;  %v330_v60 = vld [vmem:[%s2646_s11 + $0x328] sm:$0xff]  ;;  %vm4853_vm13 = vcmp.gt.f32.partialorder %v3633_v35, 0.0  ;;  %v3648_v13 = vadd.f32 -1.66, %v329_v40 }
  0xdb   : > { %5070 = vst [vmem:[#allocation163_spill] sm:$0xff] %v3641_v53  ;;  %5071 = vst [vmem:[#allocation164_spill] sm:$0xff] %v3643_v17  ;;  %v3650_v63 = vmul.f32 0.95, %v329_v40  ;;  %v331_v57 = vld [vmem:[%s2646_s11 + $0x330] sm:$0xff]  ;;  %v2159_v54 = vsel %vm4853_vm13, 1.0, %v2517_v12 }
  0xdc   : > { %1350 = vst [vmem:[%s2683_s23 + $0x308] sm:$0xff] %v2158_v43  ;;  %5072 = vst [vmem:[#allocation165_spill] sm:$0xff] %v3648_v13  ;;  %vm4856_vm14 = vcmp.gt.f32.partialorder %v3641_v53, 0.0  ;;  %v3657_v20 = vadd.f32 -1.66, %v330_v60  ;;  %vm4862_vm15 = vcmp.gt.f32.partialorder %v3648_v13, 0.0 }
  0xdd   : > { %5073 = vst [vmem:[#allocation166_spill] sm:$0xff] %v3650_v63  ;;  %v3659_v43 = vmul.f32 0.95, %v330_v60  ;;  %1351 = vst [vmem:[%s2683_s23 + $0x310] sm:$0xff] %v2159_v54  ;;  %v2160_v40 = vsel %vm4856_vm14, 1.0, %v2517_v12  ;;  %v2161_v60 = vsel %vm4862_vm15, 1.0, %v2517_v12 }
  0xde   : > { %5074 = vst [vmem:[#allocation167_spill] sm:$0xff] %v3657_v20  ;;  %v3666_v63 = vadd.f32 -1.66, %v331_v57  ;;  %v3668_v17 = vmul.f32 0.95, %v331_v57  ;;  %1352 = vst [vmem:[%s2683_s23 + $0x318] sm:$0xff] %v2160_v40 }
  0xdf   : > { %5075 = vst [vmem:[#allocation168_spill] sm:$0xff] %v3659_v43  ;;  %vm4858_vm13 = vcmp.gt.f32.partialorder %v3657_v20, 0.0  ;;  %v332_v54 = vld [vmem:[%s2646_s11 + $0x338] sm:$0xff]  ;;  %v333_v35 = vld [vmem:[%s2646_s11 + $0x340] sm:$0xff]  ;;  %v334_v53 = vld [vmem:[%s2646_s11 + $0x348] sm:$0xff]  ;;  %p5298_p13 = scmp.ne.s32.totalorder %s4914_s24, 0 }
  0xe0   : > { %5076 = vst [vmem:[#allocation169_spill] sm:$0xff] %v3666_v63  ;;  %5077 = vst [vmem:[#allocation170_spill] sm:$0xff] %v3668_v17  ;;  %v2162_v43 = vsel %vm4858_vm13, 1.0, %v2517_v12  ;;  %vm4861_vm14 = vcmp.gt.f32.partialorder %v3666_v63, 0.0  ;;  %v3683_v57 = vadd.f32 -1.66, %v332_v54 }
  0xe1   : > { %1353 = vst [vmem:[%s2683_s23 + $0x320] sm:$0xff] %v2161_v60  ;;  %v3685_v40 = vmul.f32 0.95, %v332_v54  ;;  %1354 = vst [vmem:[%s2683_s23 + $0x328] sm:$0xff] %v2162_v43  ;;  %v2163_v13 = vsel %vm4861_vm14, 1.0, %v2517_v12  ;;  %v335_v60 = vld [vmem:[%s2646_s11 + $0x350] sm:$0xff]  ;;  %p2420_p4 = pnand %p2419_p12, %p5298_p13 }
  0xe2   : > { %5078 = vst [vmem:[#allocation171_spill] sm:$0xff] %v3683_v57  ;;  %v3691_v17 = vadd.f32 -1.66, %v333_v35  ;;  %v3693_v14 = vmul.f32 0.95, %v333_v35  ;;  %1355 = vst [vmem:[%s2683_s23 + $0x330] sm:$0xff] %v2163_v13 }
  0xe3   : > { %5079 = vst [vmem:[#allocation172_spill] sm:$0xff] %v3685_v40  ;;  %vm4864_vm13 = vcmp.gt.f32.partialorder %v3683_v57, 0.0  ;;  %v3698_v20 = vadd.f32 -1.66, %v334_v53  ;;  %v3700_v54 = vmul.f32 0.95, %v334_v53  ;;  %p2421_p5 = pneg %p2420_p4 }
  0xe4   : > { %5080 = vst [vmem:[#allocation173_spill] sm:$0xff] %v3691_v17  ;;  %5081 = vst [vmem:[#allocation174_spill] sm:$0xff] %v3693_v14  ;;  %v336_v43 = vld [vmem:[%s2646_s11 + $0x358] sm:$0xff]  ;;  %v2164_v63 = vsel %vm4864_vm13, 1.0, %v2517_v12  ;;  %vm4866_vm14 = vcmp.gt.f32.partialorder %v3691_v17, 0.0  ;;  %v339_v17 = vld [vmem:[%s2646_s11 + $0x370] sm:$0xff] }
  0xe5   : > { %5082 = vst [vmem:[#allocation175_spill] sm:$0xff] %v3698_v20  ;;  %5083 = vst [vmem:[#allocation176_spill] sm:$0xff] %v3700_v54  ;;  %v3707_v35 = vadd.f32 -1.66, %v335_v60  ;;  %v3709_v13 = vmul.f32 0.95, %v335_v60 }
  0xe6   : > { %1356 = vst [vmem:[%s2683_s23 + $0x338] sm:$0xff] %v2164_v63  ;;  %v2165_v53 = vsel %vm4866_vm14, 1.0, %v2517_v12  ;;  %vm4872_vm15 = vcmp.gt.f32.partialorder %v3698_v20, 0.0  ;;  %v3716_v54 = vadd.f32 -1.66, %v336_v43  ;;  %v337_v63 = vld [vmem:[%s2646_s11 + $0x360] sm:$0xff] }
  0xe7   : > { %5084 = vst [vmem:[#allocation177_spill] sm:$0xff] %v3707_v35  ;;  %5085 = vst [vmem:[#allocation178_spill] sm:$0xff] %v3709_v13  ;;  %v3718_v57 = vmul.f32 0.95, %v336_v43  ;;  %v2166_v14 = vsel %vm4872_vm15, 1.0, %v2517_v12  ;;  %vm4868_vm13 = vcmp.gt.f32.partialorder %v3707_v35, 0.0 }
  0xe8   : > { %5086 = vst [vmem:[#allocation179_spill] sm:$0xff] %v3716_v54  ;;  %1357 = vst [vmem:[%s2683_s23 + $0x340] sm:$0xff] %v2165_v53  ;;  %v338_v60 = vld [vmem:[%s2646_s11 + $0x368] sm:$0xff]  ;;  %v2167_v43 = vsel %vm4868_vm13, 1.0, %v2517_v12  ;;  %vm4871_vm14 = vcmp.gt.f32.partialorder %v3716_v54, 0.0  ;;  %v5146_v29 = vld [vmem:[#allocation22_spill] sm:$0xff] }
  0xe9   : > { %5087 = vst [vmem:[#allocation180_spill] sm:$0xff] %v3718_v57  ;;  %1358 = vst [vmem:[%s2683_s23 + $0x348] sm:$0xff] %v2166_v14  ;;  %v3734_v53 = vadd.f32 -1.66, %v337_v63  ;;  %v3736_v20 = vmul.f32 0.95, %v337_v63 }
  0xea   : > { %1359 = vst [vmem:[%s2683_s23 + $0x350] sm:$0xff] %v2167_v43  ;;  %v2168_v57 = vsel %vm4871_vm14, 1.0, %v2517_v12  ;;  %v3742_v13 = vadd.f32 -1.66, %v338_v60  ;;  %v3744_v40 = vmul.f32 0.95, %v338_v60 }
  0xeb   : > { %5088 = vst [vmem:[#allocation181_spill] sm:$0xff] %v3734_v53  ;;  %5089 = vst [vmem:[#allocation182_spill] sm:$0xff] %v3736_v20  ;;  %v340_v14 = vld [vmem:[%s2646_s11 + $0x378] sm:$0xff]  ;;  %vm4874_vm13 = vcmp.gt.f32.partialorder %v3734_v53, 0.0  ;;  %v3749_v35 = vadd.f32 -1.66, %v339_v17 }
  0xec   : > { %5090 = vst [vmem:[#allocation183_spill] sm:$0xff] %v3742_v13  ;;  %5091 = vst [vmem:[#allocation184_spill] sm:$0xff] %v3744_v40  ;;  %v3751_v63 = vmul.f32 0.95, %v339_v17  ;;  %v341_v43 = vld [vmem:[%s2646_s11 + $0x380] sm:$0xff]  ;;  %v2169_v54 = vsel %vm4874_vm13, 1.0, %v2517_v12 }
  0xed   : > { %1360 = vst [vmem:[%s2683_s23 + $0x358] sm:$0xff] %v2168_v57  ;;  %5092 = vst [vmem:[#allocation185_spill] sm:$0xff] %v3749_v35  ;;  %vm4876_vm14 = vcmp.gt.f32.partialorder %v3742_v13, 0.0  ;;  %v3758_v60 = vadd.f32 -1.66, %v340_v14  ;;  %vm4882_vm15 = vcmp.gt.f32.partialorder %v3749_v35, 0.0 }
  0xee   : > { %5093 = vst [vmem:[#allocation186_spill] sm:$0xff] %v3751_v63  ;;  %v3760_v57 = vmul.f32 0.95, %v340_v14  ;;  %1361 = vst [vmem:[%s2683_s23 + $0x360] sm:$0xff] %v2169_v54  ;;  %v2170_v17 = vsel %vm4876_vm14, 1.0, %v2517_v12  ;;  %v2171_v40 = vsel %vm4882_vm15, 1.0, %v2517_v12 }
  0xef   : > { %5094 = vst [vmem:[#allocation187_spill] sm:$0xff] %v3758_v60  ;;  %v3767_v63 = vadd.f32 -1.66, %v341_v43  ;;  %v3769_v53 = vmul.f32 0.95, %v341_v43  ;;  %1362 = vst [vmem:[%s2683_s23 + $0x368] sm:$0xff] %v2170_v17 }
  0xf0   : > { %5095 = vst [vmem:[#allocation188_spill] sm:$0xff] %v3760_v57  ;;  %vm4878_vm13 = vcmp.gt.f32.partialorder %v3758_v60, 0.0  ;;  %v342_v54 = vld [vmem:[%s2646_s11 + $0x388] sm:$0xff]  ;;  %v343_v14 = vld [vmem:[%s2646_s11 + $0x390] sm:$0xff]  ;;  %v344_v13 = vld [vmem:[%s2646_s11 + $0x398] sm:$0xff]  ;;  %s2518_s10 = smov [#allocation5]  }
  0xf1   : > { %5096 = vst [vmem:[#allocation189_spill] sm:$0xff] %v3767_v63  ;;  %5097 = vst [vmem:[#allocation190_spill] sm:$0xff] %v3769_v53  ;;  %v2172_v43 = vsel %vm4878_vm13, 1.0, %v2517_v12  ;;  %vm4880_vm14 = vcmp.gt.f32.partialorder %v3767_v63, 0.0  ;;  %v3790_v17 = vadd.f32 -1.66, %v342_v54 }
  0xf2   : > { %1363 = vst [vmem:[%s2683_s23 + $0x370] sm:$0xff] %v2171_v40  ;;  %v3792_v53 = vmul.f32 0.95, %v342_v54  ;;  %1364 = vst [vmem:[%s2683_s23 + $0x378] sm:$0xff] %v2172_v43  ;;  %v2173_v35 = vsel %vm4880_vm14, 1.0, %v2517_v12  ;;  %v345_v40 = vld [vmem:[%s2646_s11 + $0x3a0] sm:$0xff] }
  0xf3   : > { %5099 = vst [vmem:[#allocation191_spill] sm:$0xff] %v3790_v17  ;;  %v3798_v57 = vadd.f32 -1.66, %v343_v14  ;;  %v3800_v20 = vmul.f32 0.95, %v343_v14  ;;  %1365 = vst [vmem:[%s2683_s23 + $0x380] sm:$0xff] %v2173_v35 }
  0xf4   : > { %5100 = vst [vmem:[#allocation192_spill] sm:$0xff] %v3792_v53  ;;  %vm4884_vm13 = vcmp.gt.f32.partialorder %v3790_v17, 0.0  ;;  %v3805_v60 = vadd.f32 -1.66, %v344_v13  ;;  %v3807_v54 = vmul.f32 0.95, %v344_v13 }
  0xf5   : > { %5101 = vst [vmem:[#allocation193_spill] sm:$0xff] %v3798_v57  ;;  %5102 = vst [vmem:[#allocation194_spill] sm:$0xff] %v3800_v20  ;;  %v346_v43 = vld [vmem:[%s2646_s11 + $0x3a8] sm:$0xff]  ;;  %v2174_v14 = vsel %vm4884_vm13, 1.0, %v2517_v12  ;;  %vm4886_vm14 = vcmp.gt.f32.partialorder %v3798_v57, 0.0  ;;  %v349_v57 = vld [vmem:[%s2646_s11 + $0x3c0] sm:$0xff] }
  0xf6   : > { %5103 = vst [vmem:[#allocation195_spill] sm:$0xff] %v3805_v60  ;;  %5104 = vst [vmem:[#allocation196_spill] sm:$0xff] %v3807_v54  ;;  %v3814_v35 = vadd.f32 -1.66, %v345_v40  ;;  %v3816_v63 = vmul.f32 0.95, %v345_v40 }
  0xf7   : > { %1366 = vst [vmem:[%s2683_s23 + $0x388] sm:$0xff] %v2174_v14  ;;  %v2175_v13 = vsel %vm4886_vm14, 1.0, %v2517_v12  ;;  %vm4892_vm15 = vcmp.gt.f32.partialorder %v3805_v60, 0.0  ;;  %v3823_v54 = vadd.f32 -1.66, %v346_v43  ;;  %v347_v40 = vld [vmem:[%s2646_s11 + $0x3b0] sm:$0xff] }
  0xf8   : > { %5105 = vst [vmem:[#allocation197_spill] sm:$0xff] %v3814_v35  ;;  %5106 = vst [vmem:[#allocation198_spill] sm:$0xff] %v3816_v63  ;;  %v3825_v17 = vmul.f32 0.95, %v346_v43  ;;  %v2176_v20 = vsel %vm4892_vm15, 1.0, %v2517_v12  ;;  %vm4888_vm13 = vcmp.gt.f32.partialorder %v3814_v35, 0.0 }
  0xf9   : > { %5107 = vst [vmem:[#allocation199_spill] sm:$0xff] %v3823_v54  ;;  %1367 = vst [vmem:[%s2683_s23 + $0x390] sm:$0xff] %v2175_v13  ;;  %v348_v14 = vld [vmem:[%s2646_s11 + $0x3b8] sm:$0xff]  ;;  %v2177_v43 = vsel %vm4888_vm13, 1.0, %v2517_v12  ;;  %vm4891_vm14 = vcmp.gt.f32.partialorder %v3823_v54, 0.0 }
  0xfa   : > { %5108 = vst [vmem:[#allocation200_spill] sm:$0xff] %v3825_v17  ;;  %1368 = vst [vmem:[%s2683_s23 + $0x398] sm:$0xff] %v2176_v20  ;;  %v3846_v13 = vadd.f32 -1.66, %v347_v40  ;;  %v3848_v60 = vmul.f32 0.95, %v347_v40 }
  0xfb   : > { %1369 = vst [vmem:[%s2683_s23 + $0x3a0] sm:$0xff] %v2177_v43  ;;  %v2178_v17 = vsel %vm4891_vm14, 1.0, %v2517_v12  ;;  %v3854_v63 = vadd.f32 -1.66, %v348_v14  ;;  %v3856_v53 = vmul.f32 0.95, %v348_v14 }
  0xfc   : > { %5109 = vst [vmem:[#allocation201_spill] sm:$0xff] %v3846_v13  ;;  %5110 = vst [vmem:[#allocation202_spill] sm:$0xff] %v3848_v60  ;;  %v350_v20 = vld [vmem:[%s2646_s11 + $0x3c8] sm:$0xff]  ;;  %vm4894_vm13 = vcmp.gt.f32.partialorder %v3846_v13, 0.0  ;;  %v3861_v35 = vadd.f32 -1.66, %v349_v57 }
  0xfd   : > { %5111 = vst [vmem:[#allocation203_spill] sm:$0xff] %v3854_v63  ;;  %5112 = vst [vmem:[#allocation204_spill] sm:$0xff] %v3856_v53  ;;  %v3863_v40 = vmul.f32 0.95, %v349_v57  ;;  %v351_v43 = vld [vmem:[%s2646_s11 + $0x3d0] sm:$0xff]  ;;  %v2179_v54 = vsel %vm4894_vm13, 1.0, %v2517_v12 }
  0xfe   : > { %1370 = vst [vmem:[%s2683_s23 + $0x3a8] sm:$0xff] %v2178_v17  ;;  %5113 = vst [vmem:[#allocation205_spill] sm:$0xff] %v3861_v35  ;;  %vm4896_vm14 = vcmp.gt.f32.partialorder %v3854_v63, 0.0  ;;  %v3870_v14 = vadd.f32 -1.66, %v350_v20  ;;  %vm4901_vm15 = vcmp.gt.f32.partialorder %v3861_v35, 0.0 }
  0xff   : > { %5114 = vst [vmem:[#allocation206_spill] sm:$0xff] %v3863_v40  ;;  %v3872_v17 = vmul.f32 0.95, %v350_v20  ;;  %1371 = vst [vmem:[%s2683_s23 + $0x3b0] sm:$0xff] %v2179_v54  ;;  %v2180_v57 = vsel %vm4896_vm14, 1.0, %v2517_v12  ;;  %v2181_v53 = vsel %vm4901_vm15, 1.0, %v2517_v12 }
 0x100   : > { %5115 = vst [vmem:[#allocation207_spill] sm:$0xff] %v3870_v14  ;;  %v3879_v40 = vadd.f32 -1.66, %v351_v43  ;;  %v3881_v13 = vmul.f32 0.95, %v351_v43  ;;  %1372 = vst [vmem:[%s2683_s23 + $0x3b8] sm:$0xff] %v2180_v57 }
 0x101   : > { %5116 = vst [vmem:[#allocation208_spill] sm:$0xff] %v3872_v17  ;;  %vm4898_vm13 = vcmp.gt.f32.partialorder %v3870_v14, 0.0  ;;  %v352_v54 = vld [vmem:[%s2646_s11 + $0x3d8] sm:$0xff]  ;;  %v353_v20 = vld [vmem:[%s2646_s11 + $0x3e0] sm:$0xff]  ;;  %v354_v63 = vld [vmem:[%s2646_s11 + $0x3e8] sm:$0xff] }
 0x102   : > { %5117 = vst [vmem:[#allocation209_spill] sm:$0xff] %v3879_v40  ;;  %5118 = vst [vmem:[#allocation210_spill] sm:$0xff] %v3881_v13  ;;  %v2182_v43 = vsel %vm4898_vm13, 1.0, %v2517_v12  ;;  %vm4900_vm14 = vcmp.gt.f32.partialorder %v3879_v40, 0.0  ;;  %v3897_v57 = vadd.f32 -1.66, %v352_v54 }
 0x103   : > { %1373 = vst [vmem:[%s2683_s23 + $0x3c0] sm:$0xff] %v2181_v53  ;;  %v3899_v35 = vmul.f32 0.95, %v352_v54  ;;  %1374 = vst [vmem:[%s2683_s23 + $0x3c8] sm:$0xff] %v2182_v43  ;;  %v2183_v13 = vsel %vm4900_vm14, 1.0, %v2517_v12  ;;  %v355_v53 = vld [vmem:[%s2646_s11 + $0x3f0] sm:$0xff] }
 0x104   : > { %5119 = vst [vmem:[#allocation211_spill] sm:$0xff] %v3897_v57  ;;  %v3905_v17 = vadd.f32 -1.66, %v353_v20  ;;  %v3907_v60 = vmul.f32 0.95, %v353_v20  ;;  %1375 = vst [vmem:[%s2683_s23 + $0x3d0] sm:$0xff] %v2183_v13 }
 0x105   : > { %5120 = vst [vmem:[#allocation212_spill] sm:$0xff] %v3899_v35  ;;  %vm4904_vm13 = vcmp.gt.f32.partialorder %v3897_v57, 0.0  ;;  %v3912_v14 = vadd.f32 -1.66, %v354_v63  ;;  %v3914_v50 = vmul.f32 0.95, %v354_v63 }
 0x106   : > { %5121 = vst [vmem:[#allocation213_spill] sm:$0xff] %v3905_v17  ;;  %5122 = vst [vmem:[#allocation214_spill] sm:$0xff] %v3907_v60  ;;  %v356_v54 = vld [vmem:[%s2646_s11 + $0x3f8] sm:$0xff]  ;;  %v2184_v13 = vsel %vm4904_vm13, 1.0, %v2517_v12  ;;  %vm4906_vm14 = vcmp.gt.f32.partialorder %v3905_v17, 0.0  ;;  %v358_v17 = vld [vmem:[%s3920_s19 + $0x8] sm:$0xff] }
 0x107   : > { %5123 = vst [vmem:[#allocation215_spill] sm:$0xff] %v3912_v14  ;;  %5124 = vst [vmem:[#allocation216_spill] sm:$0xff] %v3914_v50  ;;  %v3926_v20 = vadd.f32 -1.66, %v355_v53  ;;  %v3928_v63 = vmul.f32 0.95, %v355_v53 }
 0x108   : > { %1376 = vst [vmem:[%s2683_s23 + $0x3d8] sm:$0xff] %v2184_v13  ;;  %v2185_v43 = vsel %vm4906_vm14, 1.0, %v2517_v12  ;;  %vm738_vm15 = vcmp.gt.f32.partialorder %v3912_v14, 0.0  ;;  %v3935_v57 = vadd.f32 -1.66, %v356_v54  ;;  %v357_v13 = vld [vmem:[%s3920_s19] sm:$0xff]  ;;  %v870_v14 = vadd.f32 %v2661_v6, %v358_v17 }
 0x109   : > { %5125 = vst [vmem:[#allocation217_spill] sm:$0xff] %v3926_v20  ;;  %5126 = vst [vmem:[#allocation218_spill] sm:$0xff] %v3928_v63  ;;  %v3937_v40 = vmul.f32 0.95, %v356_v54  ;;  %v2186_v53 = vsel %vm738_vm15, 1.0, %v2517_v12  ;;  %vm739_vm13 = vcmp.gt.f32.partialorder %v3926_v20, 0.0 }
 0x10a   : > { %5127 = vst [vmem:[#allocation219_spill] sm:$0xff] %v3935_v57  ;;  %1377 = vst [vmem:[%s2683_s23 + $0x3e0] sm:$0xff] %v2185_v43  ;;  %v359_v63 = vld [vmem:[%s3920_s19 + $0x10] sm:$0xff]  ;;  %v2187_v54 = vsel %vm739_vm13, 1.0, %v2517_v12  ;;  %vm740_vm14 = vcmp.gt.f32.partialorder %v3935_v57, 0.0  ;;  %v869_v43 = vadd.f32 %v2657_v4, %v357_v13  ;;  %v361_v50 = vld [vmem:[%s3920_s19 + $0x20] sm:$0xff]  ;;  %v875_v57 = vadd.f32 %v2715_v28, %v363_v27 }
 0x10b   : > { %5128 = vst [vmem:[#allocation220_spill] sm:$0xff] %v3937_v40  ;;  %1378 = vst [vmem:[%s2683_s23 + $0x3e8] sm:$0xff] %v2186_v53  ;;  %v360_v40 = vld [vmem:[%s3920_s19 + $0x18] sm:$0xff]  ;;  %v362_v60 = vld [vmem:[%s3920_s19 + $0x28] sm:$0xff]  ;;  %v2188_v53 = vsel %vm740_vm14, 1.0, %v2517_v12  ;;  %v871_v20 = vadd.f32 %v2665_v8, %v359_v63  ;;  %v873_v0 = vadd.f32 %v2697_v21, %v361_v50  ;;  %s2422_s11 = sshll.u32 %s2518_s10, 4  ;;  %s2423_s11 = int_to_ptr.vmem [resolvable:$false] %s2422_s11 }
 0x10c   : > { %1379 = vst [vmem:[%s2683_s23 + $0x3f0] sm:$0xff] %v2187_v54  ;;  %v872_v35 = vadd.f32 %v2690_v18, %v360_v40  ;;  %v364_v4 = vld [vmem:[%s3920_s19 + $0x38] sm:$0xff]  ;;  %v365_v13 = vld [vmem:[%s3920_s19 + $0x40] sm:$0xff]  ;;  %1380 = vst [vmem:[%s2683_s23 + $0x3f8] sm:$0xff] %v2188_v53  ;;  %v2189_v6 = vadd.f32 -1.577, %v869_v43  ;;  %v874_v54 = vadd.f32 %v2706_v25, %v362_v60  ;;  %p2425_p7 = scmp.lt.s32.totalorder %s4333_s26, %s2423_s11 }
 0x10d   : > { %v2190_v17 = vadd.f32 -1.577, %v870_v14  ;;  %v366_v12 = vld [vmem:[%s3920_s19 + $0x48] sm:$0xff]  ;;  %v2191_v8 = vadd.f32 -1.577, %v871_v20  ;;  %v876_v21 = vadd.f32 %v2724_v31, %v364_v4  ;;  %v368_v25 = vld [vmem:[%s3920_s19 + $0x58] sm:$0xff]  ;;  %v877_v15 = vadd.f32 %v2733_v34, %v365_v13 }
 0x10e   : > { %v2192_v63 = vadd.f32 -1.577, %v872_v35  ;;  %v2193_v18 = vadd.f32 -1.577, %v873_v0  ;;  %v1509_v50 = vsel %vm613_vm0, %v2189_v6, %v869_v43  ;;  %v2194_v53 = vadd.f32 -1.577, %v874_v54 }
 0x10f   : > { %v1510_v40 = vsel %vm614_vm1, %v2190_v17, %v870_v14  ;;  %v2195_v51 = vadd.f32 -1.577, %v875_v57  ;;  %v369_v60 = vld [vmem:[%s3920_s19 + $0x60] sm:$0xff]  ;;  %1637 = vst [vmem:[%s3980_s20] sm:$0xff] %v1509_v50  ;;  %v1511_v3 = vsel %vm615_vm2, %v2191_v8, %v871_v20  ;;  %v2196_v31 = vadd.f32 -1.577, %v876_v21  ;;  %v370_v27 = vld [vmem:[%s3920_s19 + $0x68] sm:$0xff] }
 0x110   : > { %1638 = vst [vmem:[%s3980_s20 + $0x8] sm:$0xff] %v1510_v40  ;;  %v1512_v5 = vsel %vm616_vm3, %v2192_v63, %v872_v35  ;;  %v1513_v28 = vsel %vm617_vm4, %v2193_v18, %v873_v0  ;;  %v371_v14 = vld [vmem:[%s3920_s19 + $0x70] sm:$0xff]  ;;  %1639 = vst [vmem:[%s3980_s20 + $0x10] sm:$0xff] %v1511_v3  ;;  %v1514_v43 = vsel %vm618_vm5, %v2194_v53, %v874_v54  ;;  %v372_v0 = vld [vmem:[%s3920_s19 + $0x78] sm:$0xff]  ;;  %v2197_v34 = vadd.f32 -1.577, %v877_v15 }
 0x111   : > { %1640 = vst [vmem:[%s3980_s20 + $0x18] sm:$0xff] %v1512_v5  ;;  %1641 = vst [vmem:[%s3980_s20 + $0x20] sm:$0xff] %v1513_v28  ;;  %v1515_v7 = vsel %vm619_vm6, %v2195_v51, %v875_v57  ;;  %v878_v19 = vadd.f32 %v2744_v39, %v366_v12  ;;  %v1516_v35 = vsel %vm620_vm7, %v2196_v31, %v876_v21  ;;  %v375_v13 = vld [vmem:[%s3920_s19 + $0x90] sm:$0xff]  ;;  %v376_v54 = vld [vmem:[%s3920_s19 + $0x98] sm:$0xff]  ;;  %vm5129_vm0 = vcmp.gt.f32.partialorder %v2783_v55, 0.0  ;;  %s2424_s23 = scalar_lea.vmem %s2423_s11, 32768 }
 0x112   : > { %1642 = vst [vmem:[%s3980_s20 + $0x28] sm:$0xff] %v1514_v43  ;;  %1643 = vst [vmem:[%s3980_s20 + $0x30] sm:$0xff] %v1515_v7  ;;  %v879_v20 = vadd.f32 %v2752_v42, %v367_v16  ;;  %v880_v22 = vadd.f32 %v2759_v45, %v368_v25  ;;  %v881_v4 = vadd.f32 %v2768_v49, %v369_v60  ;;  %v377_v12 = vld [vmem:[%s3920_s19 + $0xa0] sm:$0xff]  ;;  %v378_v63 = vld [vmem:[%s3920_s19 + $0xa8] sm:$0xff]  ;;  %vm5130_vm1 = vcmp.gt.f32.partialorder %v2791_v58, 0.0  ;;  %p2426_p8 = scmp.lt.s32.totalorder %s2424_s23, %s2418_s9 }
 0x113   : > { %1644 = vst [vmem:[%s3980_s20 + $0x38] sm:$0xff] %v1516_v35  ;;  %v2198_v51 = vadd.f32 -1.577, %v878_v19  ;;  %v882_v39 = vadd.f32 %v2785_v56, %v370_v27  ;;  %v883_v57 = vadd.f32 %v2793_v59, %v371_v14  ;;  %v884_v49 = vadd.f32 %v2800_v62, %v372_v0  ;;  %v379_v18 = vld [vmem:[%s3920_s19 + $0xb0] sm:$0xff]  ;;  %v380_v50 = vld [vmem:[%s3920_s19 + $0xb8] sm:$0xff]  ;;  %v381_v58 = vld [vmem:[%s3920_s19 + $0xc0] sm:$0xff] }
 0x114   : > { %v2199_v6 = vadd.f32 -1.577, %v879_v20  ;;  %v2200_v42 = vadd.f32 -1.577, %v880_v22  ;;  %v2201_v45 = vadd.f32 -1.577, %v881_v4  ;;  %v1517_v16 = vsel %vm621_vm8, %v2197_v34, %v877_v15  ;;  %p2427_p10 = por %p2426_p8, %p2425_p7 }
 0x115   : > { %v1518_v56 = vsel %vm622_vm9, %v2198_v51, %v878_v19  ;;  %v2202_v17 = vadd.f32 -1.577, %v882_v39  ;;  %v2203_v59 = vadd.f32 -1.577, %v883_v57  ;;  %1645 = vst [vmem:[%s3980_s20 + $0x40] sm:$0xff] %v1517_v16  ;;  %vm5131_vm2 = vcmp.gt.f32.partialorder %v2798_v61, 0.0 }
 0x116   : > { %1646 = vst [vmem:[%s3980_s20 + $0x48] sm:$0xff] %v1518_v56  ;;  %v1519_v62 = vsel %vm623_vm10, %v2199_v6, %v879_v20  ;;  %v1520_v32 = vsel %vm624_vm11, %v2200_v42, %v880_v22  ;;  %v1521_v38 = vsel %vm625_vm12, %v2201_v45, %v881_v4  ;;  %v2204_v8 = vadd.f32 -1.577, %v884_v49  ;;  %v382_v61 = vld [vmem:[%s3920_s19 + $0xc8] sm:$0xff]  ;;  %v383_v5 = vld [vmem:[%s3920_s19 + $0xd0] sm:$0xff]  ;;  %v384_v14 = vld [vmem:[%s3920_s19 + $0xd8] sm:$0xff]  ;;  %p2428_p0 = pnand %p2427_p10, %p2421_p5 }
 0x117   : > { %1647 = vst [vmem:[%s3980_s20 + $0x50] sm:$0xff] %v1519_v62  ;;  %1648 = vst [vmem:[%s3980_s20 + $0x58] sm:$0xff] %v1520_v32  ;;  %v1522_v21 = vsel %vm5129_vm0, %v2202_v17, %v882_v39  ;;  %v1523_v41 = vsel %vm5130_vm1, %v2203_v59, %v883_v57  ;;  %v887_v53 = vadd.f32 %v2835_v24, %v375_v13  ;;  %v2205_v2 = vadd.f32 -1.577, %v885_v44  ;;  %v385_v43 = vld [vmem:[%s3920_s19 + $0xe0] sm:$0xff]  ;;  %v386_v15 = vld [vmem:[%s3920_s19 + $0xe8] sm:$0xff] }
 0x118   : > { %1649 = vst [vmem:[%s3980_s20 + $0x60] sm:$0xff] %v1521_v38  ;;  %1650 = vst [vmem:[%s3980_s20 + $0x68] sm:$0xff] %v1522_v21  ;;  %v1524_v40 = vsel %vm5131_vm2, %v2204_v8, %v884_v49  ;;  %v888_v55 = vadd.f32 %v2843_v33, %v376_v54  ;;  %v889_v25 = vadd.f32 %v2850_v37, %v377_v12  ;;  %v2206_v60 = vadd.f32 -1.577, %v886_v48  ;;  %v387_v19 = vld [vmem:[%s3920_s19 + $0xf0] sm:$0xff]  ;;  %v5140_v20 = vld [vmem:[#allocation14_spill] sm:$0xff] }
 0x119   : > { %1651 = vst [vmem:[%s3980_s20 + $0x70] sm:$0xff] %v1523_v41  ;;  %1652 = vst [vmem:[%s3980_s20 + $0x78] sm:$0xff] %v1524_v40  ;;  %v890_v11 = vadd.f32 %v2859_v47, %v378_v63  ;;  %v891_v3 = vadd.f32 %v2868_v52, %v379_v18  ;;  %v2207_v28 = vadd.f32 -1.577, %v887_v53  ;;  %v892_v37 = vadd.f32 %v2885_v9, %v380_v50  ;;  %v5141_v22 = vld [vmem:[#allocation16_spill] sm:$0xff]  ;;  %v388_v4 = vld [vmem:[%s3920_s19 + $0xf8] sm:$0xff] }
 0x11a   : > { %v2208_v24 = vadd.f32 -1.577, %v888_v55  ;;  %v2209_v33 = vadd.f32 -1.577, %v889_v25  ;;  %vm5132_vm3 = vcmp.gt.f32.partialorder %v2807_v1, 0.0  ;;  %vm5133_vm4 = vcmp.gt.f32.partialorder %v2816_v10, 0.0 }
 0x11b   : > { %v1525_v31 = vsel %vm5132_vm3, %v2205_v2, %v885_v44  ;;  %v1526_v47 = vsel %vm5133_vm4, %v2206_v60, %v886_v48  ;;  %v2210_v27 = vadd.f32 -1.577, %v890_v11  ;;  %v2211_v52 = vadd.f32 -1.577, %v891_v3  ;;  %v5144_v51 = vld [vmem:[#allocation18_spill] sm:$0xff]  ;;  %v5145_v57 = vld [vmem:[#allocation20_spill] sm:$0xff] }
 0x11c   : > { %1653 = vst [vmem:[%s3980_s20 + $0x80] sm:$0xff] %v1525_v31  ;;  %1654 = vst [vmem:[%s3980_s20 + $0x88] sm:$0xff] %v1526_v47  ;;  %vm5134_vm5 = vcmp.gt.f32.partialorder %v2833_v23, 0.0  ;;  %vm5135_vm6 = vcmp.gt.f32.partialorder %v2841_v30, 0.0  ;;  %vm5136_vm7 = vcmp.gt.f32.partialorder %v2848_v36, 0.0  ;;  %vm5137_vm8 = vcmp.gt.f32.partialorder %v2857_v46, 0.0 }
 0x11d   : > { %v1527_v9 = vsel %vm5134_vm5, %v2207_v28, %v887_v53  ;;  %v1528_v1 = vsel %vm5135_vm6, %v2208_v24, %v888_v55  ;;  %v1529_v10 = vsel %vm5136_vm7, %v2209_v33, %v889_v25  ;;  %v2212_v7 = vadd.f32 -1.577, %v892_v37  ;;  %v5138_v23 = vld [vmem:[#allocation11_spill] sm:$0xff]  ;;  %v5147_v49 = vld [vmem:[#allocation24_spill] sm:$0xff]  ;;  %v5148_v56 = vld [vmem:[#allocation26_spill] sm:$0xff] }
 0x11e   : > { %1655 = vst [vmem:[%s3980_s20 + $0x90] sm:$0xff] %v1527_v9  ;;  %1656 = vst [vmem:[%s3980_s20 + $0x98] sm:$0xff] %v1528_v1  ;;  %v1530_v0 = vsel %vm5137_vm8, %v2210_v27, %v890_v11  ;;  %vm5139_vm9 = vcmp.gt.f32.partialorder %v5138_v23, 0.0  ;;  %v893_v30 = vadd.f32 %v5140_v20, %v381_v58  ;;  %v894_v36 = vadd.f32 %v5141_v22, %v382_v61  ;;  %v389_v6 = vld [vmem:[%s3920_s19 + $0x100] sm:$0xff]  ;;  %v390_v59 = vld [vmem:[%s3920_s19 + $0x108] sm:$0xff] }
 0x11f   : > { %1657 = vst [vmem:[%s3980_s20 + $0xa0] sm:$0xff] %v1529_v10  ;;  %v1531_v35 = vsel %vm5139_vm9, %v2211_v52, %v891_v3  ;;  %1658 = vst [vmem:[%s3980_s20 + $0xa8] sm:$0xff] %v1530_v0  ;;  %vm5143_vm10 = vcmp.gt.f32.partialorder %v5142_v26, 0.0  ;;  %v895_v39 = vadd.f32 %v5144_v51, %v383_v5  ;;  %v896_v46 = vadd.f32 %v5145_v57, %v384_v14  ;;  %v391_v54 = vld [vmem:[%s3920_s19 + $0x110] sm:$0xff]  ;;  %v5149_v38 = vld [vmem:[#allocation28_spill] sm:$0xff] }
 0x120   : > { %1659 = vst [vmem:[%s3980_s20 + $0xb0] sm:$0xff] %v1531_v35  ;;  %v1532_v34 = vsel %vm5143_vm10, %v2212_v7, %v892_v37  ;;  %v897_v13 = vadd.f32 %v5146_v29, %v385_v43  ;;  %v2213_v42 = vadd.f32 -1.577, %v893_v30  ;;  %v2214_v45 = vadd.f32 -1.577, %v894_v36  ;;  %v5150_v63 = vld [vmem:[#allocation13_spill] sm:$0xff] }
 0x121   : > { %1660 = vst [vmem:[%s3980_s20 + $0xb8] sm:$0xff] %v1532_v34  ;;  %v898_v16 = vadd.f32 %v5147_v49, %v386_v15  ;;  %v899_v17 = vadd.f32 %v5148_v56, %v387_v19  ;;  %v2215_v12 = vadd.f32 -1.577, %v895_v39  ;;  %v2216_v62 = vadd.f32 -1.577, %v896_v46  ;;  %v5152_v21 = vld [vmem:[#allocation15_spill] sm:$0xff] }
 0x122   : > { %v2217_v32 = vadd.f32 -1.577, %v897_v13  ;;  %v900_v8 = vadd.f32 %v5149_v38, %v388_v4  ;;  %vm5151_vm11 = vcmp.gt.f32.partialorder %v5150_v63, 0.0  ;;  %vm5153_vm12 = vcmp.gt.f32.partialorder %v5152_v21, 0.0  ;;  %v392_v50 = vld [vmem:[%s3920_s19 + $0x118] sm:$0xff]  ;;  %v393_v40 = vld [vmem:[%s3920_s19 + $0x120] sm:$0xff] }
 0x123   : > { %v1533_v18 = vsel %vm5151_vm11, %v2213_v42, %v893_v30  ;;  %v1534_v41 = vsel %vm5153_vm12, %v2214_v45, %v894_v36  ;;  %v2218_v44 = vadd.f32 -1.577, %v898_v16  ;;  %v2219_v48 = vadd.f32 -1.577, %v899_v17  ;;  %v5154_v53 = vld [vmem:[#allocation17_spill] sm:$0xff]  ;;  %v5156_v25 = vld [vmem:[#allocation19_spill] sm:$0xff] }
 0x124   : > { %1661 = vst [vmem:[%s3980_s20 + $0xc0] sm:$0xff] %v1533_v18  ;;  %1662 = vst [vmem:[%s3980_s20 + $0xc8] sm:$0xff] %v1534_v41  ;;  %vm5155_vm0 = vcmp.gt.f32.partialorder %v5154_v53, 0.0  ;;  %vm5157_vm1 = vcmp.gt.f32.partialorder %v5156_v25, 0.0  ;;  %v5158_v2 = vld [vmem:[#allocation21_spill] sm:$0xff]  ;;  %v394_v3 = vld [vmem:[%s3920_s19 + $0x128] sm:$0xff] }
 0x125   : > { %v1535_v55 = vsel %vm5155_vm0, %v2215_v12, %v895_v39  ;;  %v1536_v58 = vsel %vm5157_vm1, %v2216_v62, %v896_v46  ;;  %vm5159_vm2 = vcmp.gt.f32.partialorder %v5158_v2, 0.0  ;;  %v2220_v11 = vadd.f32 -1.577, %v900_v8  ;;  %v395_v61 = vld [vmem:[%s3920_s19 + $0x130] sm:$0xff]  ;;  %v5160_v5 = vld [vmem:[#allocation23_spill] sm:$0xff]  ;;  %v5164_v37 = vld [vmem:[#allocation30_spill] sm:$0xff] }
 0x126   : > { %v1537_v60 = vsel %vm5159_vm2, %v2217_v32, %v897_v13  ;;  %1663 = vst [vmem:[%s3980_s20 + $0xd0] sm:$0xff] %v1535_v55  ;;  %1664 = vst [vmem:[%s3980_s20 + $0xd8] sm:$0xff] %v1536_v58  ;;  %vm5161_vm3 = vcmp.gt.f32.partialorder %v5160_v5, 0.0  ;;  %v5162_v24 = vld [vmem:[#allocation25_spill] sm:$0xff]  ;;  %v901_v31 = vadd.f32 %v5164_v37, %v389_v6  ;;  %v5165_v47 = vld [vmem:[#allocation32_spill] sm:$0xff] }
 0x127   : > { %1665 = vst [vmem:[%s3980_s20 + $0xe0] sm:$0xff] %v1537_v60  ;;  %v1538_v28 = vsel %vm5161_vm3, %v2218_v44, %v898_v16  ;;  %vm5163_vm4 = vcmp.gt.f32.partialorder %v5162_v24, 0.0  ;;  %v902_v27 = vadd.f32 %v5165_v47, %v390_v59  ;;  %v396_v52 = vld [vmem:[%s3920_s19 + $0x138] sm:$0xff]  ;;  %v5166_v14 = vld [vmem:[#allocation27_spill] sm:$0xff]  ;;  %v5169_v10 = vld [vmem:[#allocation36_spill] sm:$0xff] }
 0x128   : > { %v1539_v33 = vsel %vm5163_vm4, %v2219_v48, %v899_v17  ;;  %1666 = vst [vmem:[%s3980_s20 + $0xe8] sm:$0xff] %v1538_v28  ;;  %vm5167_vm5 = vcmp.gt.f32.partialorder %v5166_v14, 0.0  ;;  %v5168_v9 = vld [vmem:[#allocation34_spill] sm:$0xff]  ;;  %v904_v7 = vadd.f32 %v5169_v10, %v392_v50  ;;  %v397_v0 = vld [vmem:[%s3920_s19 + $0x140] sm:$0xff]  ;;  %v2221_v23 = vadd.f32 -1.577, %v901_v31 }
 0x129   : > { %1667 = vst [vmem:[%s3980_s20 + $0xf0] sm:$0xff] %v1539_v33  ;;  %v1540_v43 = vsel %vm5167_vm5, %v2220_v11, %v900_v8  ;;  %v903_v1 = vadd.f32 %v5168_v9, %v391_v54  ;;  %v5170_v15 = vld [vmem:[#allocation38_spill] sm:$0xff]  ;;  %v2222_v35 = vadd.f32 -1.577, %v902_v27  ;;  %v5171_v20 = vld [vmem:[#allocation40_spill] sm:$0xff]  ;;  %v399_v26 = vld [vmem:[%s3920_s19 + $0x150] sm:$0xff] }
 0x12a   : > { %v905_v19 = vadd.f32 %v5170_v15, %v393_v40  ;;  %1668 = vst [vmem:[%s3980_s20 + $0xf8] sm:$0xff] %v1540_v43  ;;  %v906_v30 = vadd.f32 %v5171_v20, %v394_v3  ;;  %v5172_v22 = vld [vmem:[#allocation42_spill] sm:$0xff]  ;;  %v398_v4 = vld [vmem:[%s3920_s19 + $0x148] sm:$0xff]  ;;  %v2224_v51 = vadd.f32 -1.577, %v904_v7  ;;  %v5174_v29 = vld [vmem:[#allocation29_spill] sm:$0xff] }
 0x12b   : > { %v907_v36 = vadd.f32 %v5172_v22, %v395_v61  ;;  %v2223_v34 = vadd.f32 -1.577, %v903_v1  ;;  %v5173_v57 = vld [vmem:[#allocation44_spill] sm:$0xff]  ;;  %vm5175_vm6 = vcmp.gt.f32.partialorder %v5174_v29, 0.0  ;;  %v5176_v6 = vld [vmem:[#allocation31_spill] sm:$0xff]  ;;  %v400_v16 = vld [vmem:[%s3920_s19 + $0x158] sm:$0xff] }
 0x12c   : > { %v2225_v39 = vadd.f32 -1.577, %v905_v19  ;;  %v908_v46 = vadd.f32 %v5173_v57, %v396_v52  ;;  %v1541_v13 = vsel %vm5175_vm6, %v2221_v23, %v901_v31  ;;  %vm5177_vm7 = vcmp.gt.f32.partialorder %v5176_v6, 0.0  ;;  %v401_v56 = vld [vmem:[%s3920_s19 + $0x160] sm:$0xff]  ;;  %v5178_v17 = vld [vmem:[#allocation33_spill] sm:$0xff]  ;;  %v402_v8 = vld [vmem:[%s3920_s19 + $0x168] sm:$0xff] }
 0x12d   : > { %v1542_v42 = vsel %vm5177_vm7, %v2222_v35, %v902_v27  ;;  %v2226_v45 = vadd.f32 -1.577, %v906_v30  ;;  %v2227_v49 = vadd.f32 -1.577, %v907_v36  ;;  %1669 = vst [vmem:[%s3980_s20 + $0x100] sm:$0xff] %v1541_v13  ;;  %vm5179_vm8 = vcmp.gt.f32.partialorder %v5178_v17, 0.0 }
 0x12e   : > { %1670 = vst [vmem:[%s3980_s20 + $0x108] sm:$0xff] %v1542_v42  ;;  %v1543_v59 = vsel %vm5179_vm8, %v2223_v34, %v903_v1  ;;  %v5180_v54 = vld [vmem:[#allocation35_spill] sm:$0xff]  ;;  %v5182_v62 = vld [vmem:[#allocation37_spill] sm:$0xff]  ;;  %v2228_v38 = vadd.f32 -1.577, %v908_v46  ;;  %v5188_v48 = vld [vmem:[#allocation46_spill] sm:$0xff] }
 0x12f   : > { %vm5181_vm9 = vcmp.gt.f32.partialorder %v5180_v54, 0.0  ;;  %vm5183_vm10 = vcmp.gt.f32.partialorder %v5182_v62, 0.0  ;;  %v403_v63 = vld [vmem:[%s3920_s19 + $0x170] sm:$0xff]  ;;  %1671 = vst [vmem:[%s3980_s20 + $0x110] sm:$0xff] %v1543_v59  ;;  %v5184_v18 = vld [vmem:[#allocation39_spill] sm:$0xff]  ;;  %v909_v50 = vadd.f32 %v5188_v48, %v397_v0  ;;  %v5189_v40 = vld [vmem:[#allocation48_spill] sm:$0xff] }
 0x130   : > { %v1544_v12 = vsel %vm5181_vm9, %v2224_v51, %v904_v7  ;;  %v1545_v32 = vsel %vm5183_vm10, %v2225_v39, %v905_v19  ;;  %vm5185_vm11 = vcmp.gt.f32.partialorder %v5184_v18, 0.0  ;;  %v5186_v41 = vld [vmem:[#allocation41_spill] sm:$0xff]  ;;  %v910_v53 = vadd.f32 %v5189_v40, %v398_v4  ;;  %v404_v55 = vld [vmem:[%s3920_s19 + $0x178] sm:$0xff]  ;;  %v5190_v25 = vld [vmem:[#allocation43_spill] sm:$0xff] }
 0x131   : > { %1672 = vst [vmem:[%s3980_s20 + $0x118] sm:$0xff] %v1544_v12  ;;  %1673 = vst [vmem:[%s3980_s20 + $0x120] sm:$0xff] %v1545_v32  ;;  %v1546_v21 = vsel %vm5185_vm11, %v2226_v45, %v906_v30  ;;  %vm5187_vm12 = vcmp.gt.f32.partialorder %v5186_v41, 0.0  ;;  %vm5191_vm0 = vcmp.gt.f32.partialorder %v5190_v25, 0.0  ;;  %v5192_v2 = vld [vmem:[#allocation50_spill] sm:$0xff]  ;;  %v5193_v11 = vld [vmem:[#allocation52_spill] sm:$0xff] }
 0x132   : > { %v1547_v44 = vsel %vm5187_vm12, %v2227_v49, %v907_v36  ;;  %1674 = vst [vmem:[%s3980_s20 + $0x128] sm:$0xff] %v1546_v21  ;;  %v1548_v58 = vsel %vm5191_vm0, %v2228_v38, %v908_v46  ;;  %v911_v60 = vadd.f32 %v5192_v2, %v399_v26  ;;  %v912_v3 = vadd.f32 %v5193_v11, %v400_v16  ;;  %v5194_v61 = vld [vmem:[#allocation54_spill] sm:$0xff]  ;;  %v405_v28 = vld [vmem:[%s3920_s19 + $0x180] sm:$0xff]  ;;  %v5195_v37 = vld [vmem:[#allocation56_spill] sm:$0xff] }
 0x133   : > { %1675 = vst [vmem:[%s3980_s20 + $0x130] sm:$0xff] %v1547_v44  ;;  %v913_v5 = vadd.f32 %v5194_v61, %v401_v56  ;;  %1676 = vst [vmem:[%s3980_s20 + $0x138] sm:$0xff] %v1548_v58  ;;  %v2229_v24 = vadd.f32 -1.577, %v909_v50  ;;  %v2230_v33 = vadd.f32 -1.577, %v910_v53  ;;  %v914_v31 = vadd.f32 %v5195_v37, %v402_v8 }
 0x134   : > { %v5196_v47 = vld [vmem:[#allocation58_spill] sm:$0xff]  ;;  %v406_v52 = vld [vmem:[%s3920_s19 + $0x188] sm:$0xff]  ;;  %v407_v14 = vld [vmem:[%s3920_s19 + $0x190] sm:$0xff]  ;;  %v2231_v43 = vadd.f32 -1.577, %v911_v60 }
 0x135   : > { %v915_v27 = vadd.f32 %v5196_v47, %v403_v63  ;;  %v2232_v9 = vadd.f32 -1.577, %v912_v3  ;;  %v2233_v1 = vadd.f32 -1.577, %v913_v5  ;;  %v5197_v10 = vld [vmem:[#allocation60_spill] sm:$0xff]  ;;  %v5198_v15 = vld [vmem:[#allocation45_spill] sm:$0xff] }
 0x136   : > { %v916_v7 = vadd.f32 %v5197_v10, %v404_v55  ;;  %vm5199_vm1 = vcmp.gt.f32.partialorder %v5198_v15, 0.0  ;;  %v5200_v0 = vld [vmem:[#allocation47_spill] sm:$0xff]  ;;  %v2234_v35 = vadd.f32 -1.577, %v914_v31  ;;  %v408_v30 = vld [vmem:[%s3920_s19 + $0x198] sm:$0xff]  ;;  %v5202_v36 = vld [vmem:[#allocation49_spill] sm:$0xff] }
 0x137   : > { %v1549_v19 = vsel %vm5199_vm1, %v2229_v24, %v909_v50  ;;  %vm5201_vm2 = vcmp.gt.f32.partialorder %v5200_v0, 0.0  ;;  %v2235_v20 = vadd.f32 -1.577, %v915_v27  ;;  %v409_v22 = vld [vmem:[%s3920_s19 + $0x1a0] sm:$0xff]  ;;  %vm5203_vm3 = vcmp.gt.f32.partialorder %v5202_v36, 0.0  ;;  %v5206_v51 = vld [vmem:[#allocation53_spill] sm:$0xff] }
 0x138   : > { %v1550_v23 = vsel %vm5201_vm2, %v2230_v33, %v910_v53  ;;  %1677 = vst [vmem:[%s3980_s20 + $0x140] sm:$0xff] %v1549_v19  ;;  %v1551_v4 = vsel %vm5203_vm3, %v2231_v43, %v911_v60  ;;  %v5204_v26 = vld [vmem:[#allocation51_spill] sm:$0xff]  ;;  %vm5207_vm5 = vcmp.gt.f32.partialorder %v5206_v51, 0.0  ;;  %v2236_v57 = vadd.f32 -1.577, %v916_v7  ;;  %v410_v46 = vld [vmem:[%s3920_s19 + $0x1a8] sm:$0xff] }
 0x139   : > { %1678 = vst [vmem:[%s3980_s20 + $0x148] sm:$0xff] %v1550_v23  ;;  %vm5205_vm4 = vcmp.gt.f32.partialorder %v5204_v26, 0.0  ;;  %v1553_v39 = vsel %vm5207_vm5, %v2233_v1, %v913_v5  ;;  %v411_v29 = vld [vmem:[%s3920_s19 + $0x1b0] sm:$0xff]  ;;  %1679 = vst [vmem:[%s3980_s20 + $0x150] sm:$0xff] %v1551_v4  ;;  %v5208_v13 = vld [vmem:[#allocation55_spill] sm:$0xff] }
 0x13a   : > { %v1552_v34 = vsel %vm5205_vm4, %v2232_v9, %v912_v3  ;;  %1681 = vst [vmem:[%s3980_s20 + $0x160] sm:$0xff] %v1553_v39  ;;  %vm5209_vm6 = vcmp.gt.f32.partialorder %v5208_v13, 0.0  ;;  %v5210_v42 = vld [vmem:[#allocation57_spill] sm:$0xff]  ;;  %v5212_v49 = vld [vmem:[#allocation62_spill] sm:$0xff]  ;;  %v5213_v56 = vld [vmem:[#allocation64_spill] sm:$0xff] }
 0x13b   : > { %1680 = vst [vmem:[%s3980_s20 + $0x158] sm:$0xff] %v1552_v34  ;;  %v1554_v6 = vsel %vm5209_vm6, %v2234_v35, %v914_v31  ;;  %vm5211_vm7 = vcmp.gt.f32.partialorder %v5210_v42, 0.0  ;;  %v917_v16 = vadd.f32 %v5212_v49, %v405_v28  ;;  %v918_v17 = vadd.f32 %v5213_v56, %v406_v52  ;;  %v412_v59 = vld [vmem:[%s3920_s19 + $0x1b8] sm:$0xff]  ;;  %v5214_v54 = vld [vmem:[#allocation59_spill] sm:$0xff]  ;;  %v5217_v38 = vld [vmem:[#allocation68_spill] sm:$0xff] }
 0x13c   : > { %v1555_v45 = vsel %vm5211_vm7, %v2235_v20, %v915_v27  ;;  %1682 = vst [vmem:[%s3980_s20 + $0x168] sm:$0xff] %v1554_v6  ;;  %vm5215_vm8 = vcmp.gt.f32.partialorder %v5214_v54, 0.0  ;;  %v5216_v62 = vld [vmem:[#allocation66_spill] sm:$0xff]  ;;  %v920_v8 = vadd.f32 %v5217_v38, %v408_v30  ;;  %v413_v21 = vld [vmem:[%s3920_s19 + $0x1c0] sm:$0xff]  ;;  %v5219_v48 = vld [vmem:[#allocation72_spill] sm:$0xff] }
 0x13d   : > { %1683 = vst [vmem:[%s3980_s20 + $0x170] sm:$0xff] %v1555_v45  ;;  %v1556_v12 = vsel %vm5215_vm8, %v2236_v57, %v916_v7  ;;  %v919_v32 = vadd.f32 %v5216_v62, %v407_v14  ;;  %v5218_v63 = vld [vmem:[#allocation70_spill] sm:$0xff]  ;;  %v2237_v41 = vadd.f32 -1.577, %v917_v16  ;;  %v2238_v44 = vadd.f32 -1.577, %v918_v17 }
 0x13e   : > { %v921_v18 = vadd.f32 %v5218_v63, %v409_v22  ;;  %1684 = vst [vmem:[%s3980_s20 + $0x178] sm:$0xff] %v1556_v12  ;;  %v922_v50 = vadd.f32 %v5219_v48, %v410_v46  ;;  %v5220_v40 = vld [vmem:[#allocation74_spill] sm:$0xff]  ;;  %v414_v55 = vld [vmem:[%s3920_s19 + $0x1c8] sm:$0xff]  ;;  %v415_v25 = vld [vmem:[%s3920_s19 + $0x1d0] sm:$0xff]  ;;  %v2240_v2 = vadd.f32 -1.577, %v920_v8 }
 0x13f   : > { %v923_v53 = vadd.f32 %v5220_v40, %v411_v29  ;;  %v2239_v58 = vadd.f32 -1.577, %v919_v32  ;;  %v5221_v11 = vld [vmem:[#allocation76_spill] sm:$0xff]  ;;  %v5222_v61 = vld [vmem:[#allocation61_spill] sm:$0xff]  ;;  %v5224_v28 = vld [vmem:[#allocation63_spill] sm:$0xff] }
 0x140   : > { %v2241_v60 = vadd.f32 -1.577, %v921_v18  ;;  %v924_v3 = vadd.f32 %v5221_v11, %v412_v59  ;;  %vm5223_vm9 = vcmp.gt.f32.partialorder %v5222_v61, 0.0  ;;  %vm5225_vm10 = vcmp.gt.f32.partialorder %v5224_v28, 0.0  ;;  %v416_v31 = vld [vmem:[%s3920_s19 + $0x1d8] sm:$0xff]  ;;  %v417_v47 = vld [vmem:[%s3920_s19 + $0x1e0] sm:$0xff] }
 0x141   : > { %v1557_v5 = vsel %vm5223_vm9, %v2237_v41, %v917_v16  ;;  %v1558_v24 = vsel %vm5225_vm10, %v2238_v44, %v918_v17  ;;  %v2242_v33 = vadd.f32 -1.577, %v922_v50  ;;  %v2243_v37 = vadd.f32 -1.577, %v923_v53  ;;  %v5226_v27 = vld [vmem:[#allocation65_spill] sm:$0xff]  ;;  %v5228_v14 = vld [vmem:[#allocation67_spill] sm:$0xff] }
 0x142   : > { %1685 = vst [vmem:[%s3980_s20 + $0x180] sm:$0xff] %v1557_v5  ;;  %1686 = vst [vmem:[%s3980_s20 + $0x188] sm:$0xff] %v1558_v24  ;;  %vm5227_vm11 = vcmp.gt.f32.partialorder %v5226_v27, 0.0  ;;  %vm5229_vm12 = vcmp.gt.f32.partialorder %v5228_v14, 0.0  ;;  %v5230_v9 = vld [vmem:[#allocation69_spill] sm:$0xff]  ;;  %v418_v7 = vld [vmem:[%s3920_s19 + $0x1e8] sm:$0xff] }
 0x143   : > { %v1559_v52 = vsel %vm5227_vm11, %v2239_v58, %v919_v32  ;;  %v1560_v43 = vsel %vm5229_vm12, %v2240_v2, %v920_v8  ;;  %vm5231_vm0 = vcmp.gt.f32.partialorder %v5230_v9, 0.0  ;;  %v2244_v10 = vadd.f32 -1.577, %v924_v3  ;;  %v419_v15 = vld [vmem:[%s3920_s19 + $0x1f0] sm:$0xff]  ;;  %v5232_v19 = vld [vmem:[#allocation71_spill] sm:$0xff]  ;;  %v5236_v20 = vld [vmem:[#allocation78_spill] sm:$0xff] }
 0x144   : > { %v1561_v1 = vsel %vm5231_vm0, %v2241_v60, %v921_v18  ;;  %1687 = vst [vmem:[%s3980_s20 + $0x190] sm:$0xff] %v1559_v52  ;;  %1688 = vst [vmem:[%s3980_s20 + $0x198] sm:$0xff] %v1560_v43  ;;  %vm5233_vm1 = vcmp.gt.f32.partialorder %v5232_v19, 0.0  ;;  %v5234_v23 = vld [vmem:[#allocation73_spill] sm:$0xff]  ;;  %v925_v30 = vadd.f32 %v5236_v20, %v413_v21  ;;  %v5237_v22 = vld [vmem:[#allocation80_spill] sm:$0xff] }
 0x145   : > { %1689 = vst [vmem:[%s3980_s20 + $0x1a0] sm:$0xff] %v1561_v1  ;;  %v1562_v0 = vsel %vm5233_vm1, %v2242_v33, %v922_v50  ;;  %vm5235_vm2 = vcmp.gt.f32.partialorder %v5234_v23, 0.0  ;;  %v926_v36 = vadd.f32 %v5237_v22, %v414_v55  ;;  %v420_v4 = vld [vmem:[%s3920_s19 + $0x1f8] sm:$0xff]  ;;  %v5238_v26 = vld [vmem:[#allocation75_spill] sm:$0xff]  ;;  %v5241_v57 = vld [vmem:[#allocation84_spill] sm:$0xff] }
 0x146   : > { %v1563_v35 = vsel %vm5235_vm2, %v2243_v37, %v923_v53  ;;  %1690 = vst [vmem:[%s3980_s20 + $0x1a8] sm:$0xff] %v1562_v0  ;;  %vm5239_vm3 = vcmp.gt.f32.partialorder %v5238_v26, 0.0  ;;  %v5240_v51 = vld [vmem:[#allocation82_spill] sm:$0xff]  ;;  %v928_v46 = vadd.f32 %v5241_v57, %v416_v31  ;;  %v421_v6 = vld [vmem:[%s3920_s19 + $0x200] sm:$0xff]  ;;  %v2245_v42 = vadd.f32 -1.577, %v925_v30 }
 0x147   : > { %1691 = vst [vmem:[%s3980_s20 + $0x1b0] sm:$0xff] %v1563_v35  ;;  %v1564_v34 = vsel %vm5239_vm3, %v2244_v10, %v924_v3  ;;  %v927_v39 = vadd.f32 %v5240_v51, %v415_v25  ;;  %v5242_v29 = vld [vmem:[#allocation86_spill] sm:$0xff]  ;;  %v2246_v45 = vadd.f32 -1.577, %v926_v36  ;;  %v5243_v49 = vld [vmem:[#allocation88_spill] sm:$0xff]  ;;  %v423_v54 = vld [vmem:[%s3920_s19 + $0x210] sm:$0xff] }
 0x148   : > { %v929_v13 = vadd.f32 %v5242_v29, %v417_v47  ;;  %1692 = vst [vmem:[%s3980_s20 + $0x1b8] sm:$0xff] %v1564_v34  ;;  %v930_v16 = vadd.f32 %v5243_v49, %v418_v7  ;;  %v5244_v56 = vld [vmem:[#allocation90_spill] sm:$0xff]  ;;  %v422_v59 = vld [vmem:[%s3920_s19 + $0x208] sm:$0xff]  ;;  %v2248_v62 = vadd.f32 -1.577, %v928_v46  ;;  %v5246_v63 = vld [vmem:[#allocation77_spill] sm:$0xff] }
 0x149   : > { %v931_v17 = vadd.f32 %v5244_v56, %v419_v15  ;;  %v2247_v12 = vadd.f32 -1.577, %v927_v39  ;;  %v5245_v38 = vld [vmem:[#allocation92_spill] sm:$0xff]  ;;  %vm5247_vm4 = vcmp.gt.f32.partialorder %v5246_v63, 0.0  ;;  %v5248_v21 = vld [vmem:[#allocation79_spill] sm:$0xff]  ;;  %v424_v50 = vld [vmem:[%s3920_s19 + $0x218] sm:$0xff] }
 0x14a   : > { %v2249_v32 = vadd.f32 -1.577, %v929_v13  ;;  %v932_v8 = vadd.f32 %v5245_v38, %v420_v4  ;;  %v1565_v18 = vsel %vm5247_vm4, %v2245_v42, %v925_v30  ;;  %vm5249_vm5 = vcmp.gt.f32.partialorder %v5248_v21, 0.0  ;;  %v425_v40 = vld [vmem:[%s3920_s19 + $0x220] sm:$0xff]  ;;  %v5250_v53 = vld [vmem:[#allocation81_spill] sm:$0xff]  ;;  %v426_v3 = vld [vmem:[%s3920_s19 + $0x228] sm:$0xff] }
 0x14b   : > { %v1566_v41 = vsel %vm5249_vm5, %v2246_v45, %v926_v36  ;;  %v2250_v44 = vadd.f32 -1.577, %v930_v16  ;;  %v2251_v48 = vadd.f32 -1.577, %v931_v17  ;;  %1693 = vst [vmem:[%s3980_s20 + $0x1c0] sm:$0xff] %v1565_v18  ;;  %vm5251_vm6 = vcmp.gt.f32.partialorder %v5250_v53, 0.0 }
 0x14c   : > { %1694 = vst [vmem:[%s3980_s20 + $0x1c8] sm:$0xff] %v1566_v41  ;;  %v1567_v55 = vsel %vm5251_vm6, %v2247_v12, %v927_v39  ;;  %v5252_v25 = vld [vmem:[#allocation83_spill] sm:$0xff]  ;;  %v5254_v2 = vld [vmem:[#allocation85_spill] sm:$0xff]  ;;  %v2252_v11 = vadd.f32 -1.577, %v932_v8  ;;  %v5260_v37 = vld [vmem:[#allocation94_spill] sm:$0xff] }
 0x14d   : > { %vm5253_vm7 = vcmp.gt.f32.partialorder %v5252_v25, 0.0  ;;  %vm5255_vm8 = vcmp.gt.f32.partialorder %v5254_v2, 0.0  ;;  %v427_v61 = vld [vmem:[%s3920_s19 + $0x230] sm:$0xff]  ;;  %1695 = vst [vmem:[%s3980_s20 + $0x1d0] sm:$0xff] %v1567_v55  ;;  %v5256_v5 = vld [vmem:[#allocation87_spill] sm:$0xff]  ;;  %v933_v31 = vadd.f32 %v5260_v37, %v421_v6  ;;  %v5261_v47 = vld [vmem:[#allocation96_spill] sm:$0xff] }
 0x14e   : > { %v1568_v58 = vsel %vm5253_vm7, %v2248_v62, %v928_v46  ;;  %v1569_v60 = vsel %vm5255_vm8, %v2249_v32, %v929_v13  ;;  %vm5257_vm9 = vcmp.gt.f32.partialorder %v5256_v5, 0.0  ;;  %v5258_v24 = vld [vmem:[#allocation89_spill] sm:$0xff]  ;;  %v934_v27 = vadd.f32 %v5261_v47, %v422_v59  ;;  %v428_v52 = vld [vmem:[%s3920_s19 + $0x238] sm:$0xff]  ;;  %v5262_v14 = vld [vmem:[#allocation91_spill] sm:$0xff] }
 0x14f   : > { %1696 = vst [vmem:[%s3980_s20 + $0x1d8] sm:$0xff] %v1568_v58  ;;  %1697 = vst [vmem:[%s3980_s20 + $0x1e0] sm:$0xff] %v1569_v60  ;;  %v1570_v28 = vsel %vm5257_vm9, %v2250_v44, %v930_v16  ;;  %vm5259_vm10 = vcmp.gt.f32.partialorder %v5258_v24, 0.0  ;;  %vm5263_vm11 = vcmp.gt.f32.partialorder %v5262_v14, 0.0  ;;  %v5264_v9 = vld [vmem:[#allocation98_spill] sm:$0xff]  ;;  %v5265_v10 = vld [vmem:[#allocation100_spill] sm:$0xff] }
 0x150   : > { %v1571_v33 = vsel %vm5259_vm10, %v2251_v48, %v931_v17  ;;  %1698 = vst [vmem:[%s3980_s20 + $0x1e8] sm:$0xff] %v1570_v28  ;;  %v1572_v43 = vsel %vm5263_vm11, %v2252_v11, %v932_v8  ;;  %v935_v1 = vadd.f32 %v5264_v9, %v423_v54  ;;  %v936_v7 = vadd.f32 %v5265_v10, %v424_v50  ;;  %v5266_v15 = vld [vmem:[#allocation102_spill] sm:$0xff]  ;;  %v429_v0 = vld [vmem:[%s3920_s19 + $0x240] sm:$0xff]  ;;  %v5267_v20 = vld [vmem:[#allocation104_spill] sm:$0xff] }
 0x151   : > { %1699 = vst [vmem:[%s3980_s20 + $0x1f0] sm:$0xff] %v1571_v33  ;;  %v937_v19 = vadd.f32 %v5266_v15, %v425_v40  ;;  %1700 = vst [vmem:[%s3980_s20 + $0x1f8] sm:$0xff] %v1572_v43  ;;  %v2253_v23 = vadd.f32 -1.577, %v933_v31  ;;  %v2254_v35 = vadd.f32 -1.577, %v934_v27  ;;  %v938_v30 = vadd.f32 %v5267_v20, %v426_v3 }
 0x152   : > { %v5268_v22 = vld [vmem:[#allocation106_spill] sm:$0xff]  ;;  %v430_v4 = vld [vmem:[%s3920_s19 + $0x248] sm:$0xff]  ;;  %v431_v26 = vld [vmem:[%s3920_s19 + $0x250] sm:$0xff]  ;;  %v2255_v34 = vadd.f32 -1.577, %v935_v1 }
 0x153   : > { %v939_v36 = vadd.f32 %v5268_v22, %v427_v61  ;;  %v2256_v51 = vadd.f32 -1.577, %v936_v7  ;;  %v2257_v39 = vadd.f32 -1.577, %v937_v19  ;;  %v5269_v57 = vld [vmem:[#allocation108_spill] sm:$0xff]  ;;  %v5270_v29 = vld [vmem:[#allocation93_spill] sm:$0xff] }
 0x154   : > { %v940_v46 = vadd.f32 %v5269_v57, %v428_v52  ;;  %vm5271_vm12 = vcmp.gt.f32.partialorder %v5270_v29, 0.0  ;;  %v5272_v6 = vld [vmem:[#allocation95_spill] sm:$0xff]  ;;  %v2258_v45 = vadd.f32 -1.577, %v938_v30  ;;  %v432_v16 = vld [vmem:[%s3920_s19 + $0x258] sm:$0xff]  ;;  %v5274_v17 = vld [vmem:[#allocation97_spill] sm:$0xff] }
 0x155   : > { %v1573_v13 = vsel %vm5271_vm12, %v2253_v23, %v933_v31  ;;  %vm5273_vm0 = vcmp.gt.f32.partialorder %v5272_v6, 0.0  ;;  %v2259_v49 = vadd.f32 -1.577, %v939_v36  ;;  %v433_v56 = vld [vmem:[%s3920_s19 + $0x260] sm:$0xff]  ;;  %vm5275_vm1 = vcmp.gt.f32.partialorder %v5274_v17, 0.0  ;;  %v5278_v62 = vld [vmem:[#allocation101_spill] sm:$0xff] }
 0x156   : > { %v1574_v42 = vsel %vm5273_vm0, %v2254_v35, %v934_v27  ;;  %1701 = vst [vmem:[%s3980_s20 + $0x200] sm:$0xff] %v1573_v13  ;;  %v1575_v59 = vsel %vm5275_vm1, %v2255_v34, %v935_v1  ;;  %v5276_v54 = vld [vmem:[#allocation99_spill] sm:$0xff]  ;;  %vm5279_vm3 = vcmp.gt.f32.partialorder %v5278_v62, 0.0  ;;  %v2260_v38 = vadd.f32 -1.577, %v940_v46  ;;  %v434_v8 = vld [vmem:[%s3920_s19 + $0x268] sm:$0xff] }
 0x157   : > { %1702 = vst [vmem:[%s3980_s20 + $0x208] sm:$0xff] %v1574_v42  ;;  %vm5277_vm2 = vcmp.gt.f32.partialorder %v5276_v54, 0.0  ;;  %v1577_v32 = vsel %vm5279_vm3, %v2257_v39, %v937_v19  ;;  %v435_v63 = vld [vmem:[%s3920_s19 + $0x270] sm:$0xff]  ;;  %1703 = vst [vmem:[%s3980_s20 + $0x210] sm:$0xff] %v1575_v59  ;;  %v5280_v18 = vld [vmem:[#allocation103_spill] sm:$0xff] }
 0x158   : > { %v1576_v12 = vsel %vm5277_vm2, %v2256_v51, %v936_v7  ;;  %1705 = vst [vmem:[%s3980_s20 + $0x220] sm:$0xff] %v1577_v32  ;;  %vm5281_vm4 = vcmp.gt.f32.partialorder %v5280_v18, 0.0  ;;  %v5282_v41 = vld [vmem:[#allocation105_spill] sm:$0xff]  ;;  %v5284_v48 = vld [vmem:[#allocation110_spill] sm:$0xff]  ;;  %v5285_v40 = vld [vmem:[#allocation112_spill] sm:$0xff] }
 0x159   : > { %1704 = vst [vmem:[%s3980_s20 + $0x218] sm:$0xff] %v1576_v12  ;;  %v1578_v21 = vsel %vm5281_vm4, %v2258_v45, %v938_v30  ;;  %vm5283_vm5 = vcmp.gt.f32.partialorder %v5282_v41, 0.0  ;;  %v941_v50 = vadd.f32 %v5284_v48, %v429_v0  ;;  %v942_v53 = vadd.f32 %v5285_v40, %v430_v4  ;;  %v436_v55 = vld [vmem:[%s3920_s19 + $0x278] sm:$0xff]  ;;  %v5286_v25 = vld [vmem:[#allocation107_spill] sm:$0xff]  ;;  %v5289_v11 = vld [vmem:[#allocation116_spill] sm:$0xff] }
 0x15a   : > { %v1579_v44 = vsel %vm5283_vm5, %v2259_v49, %v939_v36  ;;  %1706 = vst [vmem:[%s3980_s20 + $0x228] sm:$0xff] %v1578_v21  ;;  %vm5287_vm6 = vcmp.gt.f32.partialorder %v5286_v25, 0.0  ;;  %v5288_v2 = vld [vmem:[#allocation114_spill] sm:$0xff]  ;;  %v944_v3 = vadd.f32 %v5289_v11, %v432_v16  ;;  %v437_v28 = vld [vmem:[%s3920_s19 + $0x280] sm:$0xff]  ;;  %v438_v24 = vld [vmem:[%s3920_s19 + $0x288] sm:$0xff] }
 0x15b   : > { %1707 = vst [vmem:[%s3980_s20 + $0x230] sm:$0xff] %v1579_v44  ;;  %v1580_v58 = vsel %vm5287_vm6, %v2260_v38, %v940_v46  ;;  %v943_v60 = vadd.f32 %v5288_v2, %v431_v26  ;;  %v5290_v61 = vld [vmem:[#allocation118_spill] sm:$0xff]  ;;  %v2261_v33 = vadd.f32 -1.577, %v941_v50  ;;  %v2262_v37 = vadd.f32 -1.577, %v942_v53 }
 0x15c   : > { %v945_v5 = vadd.f32 %v5290_v61, %v433_v56  ;;  %1708 = vst [vmem:[%s3980_s20 + $0x238] sm:$0xff] %v1580_v58  ;;  %v5291_v31 = vld [vmem:[#allocation120_spill] sm:$0xff]  ;;  %v5292_v27 = vld [vmem:[#allocation122_spill] sm:$0xff]  ;;  %v439_v14 = vld [vmem:[%s3920_s19 + $0x290] sm:$0xff]  ;;  %v2264_v10 = vadd.f32 -1.577, %v944_v3 }
 0x15d   : > { %v946_v47 = vadd.f32 %v5291_v31, %v434_v8  ;;  %v947_v52 = vadd.f32 %v5292_v27, %v435_v63  ;;  %v440_v43 = vld [vmem:[%s3920_s19 + $0x298] sm:$0xff]  ;;  %v441_v9 = vld [vmem:[%s3920_s19 + $0x2a0] sm:$0xff]  ;;  %v2263_v1 = vadd.f32 -1.577, %v943_v60  ;;  %v5293_v15 = vld [vmem:[#allocation124_spill] sm:$0xff] }
 0x15e   : > { %v2265_v7 = vadd.f32 -1.577, %v945_v5  ;;  %v948_v19 = vadd.f32 %v5293_v15, %v436_v55  ;;  %v5294_v0 = vld [vmem:[#allocation109_spill] sm:$0xff]  ;;  %v5296_v35 = vld [vmem:[#allocation111_spill] sm:$0xff] }
 0x15f   : > { %vm5295_vm7 = vcmp.gt.f32.partialorder %v5294_v0, 0.0  ;;  %vm5297_vm8 = vcmp.gt.f32.partialorder %v5296_v35, 0.0  ;;  %v2266_v30 = vadd.f32 -1.577, %v946_v47  ;;  %v2267_v22 = vadd.f32 -1.577, %v947_v52 }
 0x160   : > { %v1581_v23 = vsel %vm5295_vm7, %v2261_v33, %v941_v50  ;;  %v1582_v20 = vsel %vm5297_vm8, %v2262_v37, %v942_v53 }
 0x161   : > { %2431 = shalt.err (!%p2428_p0)
}
 0x162   : > { %s2432_s4 = scalar_lea.hbm %s4319_s29, 16384  ;;  %s2436_s8 = scalar_lea.hbm %s4690_s2, 32768 }
 0x163   : > { %p2433_p2 = scmp.ne.s32.totalorder %s4319_s29, %s2432_s4  ;;  %p2437_p3 = scmp.lt.s32.totalorder %s4319_s29, %s4690_s2 }
 0x164   : > { %p2438_p6 = scmp.lt.s32.totalorder %s2436_s8, %s2432_s4 }
 0x165   : > { %p2434_p9 = pnand %p2433_p2, %p5298_p13 }
 0x166   : > { %p2439_p11 = por %p2438_p6, %p2437_p3 }
 0x167   : > { %p2435_p1 = pneg %p2434_p9 }
 0x169   : > { %p2440_p12 = pnand %p2439_p11, %p2435_p1 }
 0x16b   : > { %2443 = shalt.err (!%p2440_p12)
}
 0x16c   : > { %s2519_s28 = smov 1024   ;;  %s2520_s9 = smov 64   ;;  %1709 = vst [vmem:[%s3980_s20 + $0x240] sm:$0xff] %v1581_v23  ;;  %1710 = vst [vmem:[%s3980_s20 + $0x248] sm:$0xff] %v1582_v20  ;;  %v5299_v36 = vld [vmem:[#allocation113_spill] sm:$0xff]  ;;  %v5301_v26 = vld [vmem:[#allocation115_spill] sm:$0xff] }
 0x16d   : > { %2336 = dma.vmem_to_hbm [thread:$0]  (%p5298_p13), %s4333_s26, 16384, %s4319_s29, %s1766_s30, %s2519_s28, %s2519_s28, %s2520_s9   ;;  %vm5300_vm9 = vcmp.gt.f32.partialorder %v5299_v36, 0.0  ;;  %vm5302_vm10 = vcmp.gt.f32.partialorder %v5301_v26, 0.0  ;;  %v5303_v51 = vld [vmem:[#allocation117_spill] sm:$0xff]  ;;  %v2268_v57 = vadd.f32 -1.577, %v948_v19 }
 0x16e   : > { %v1583_v4 = vsel %vm5300_vm9, %v2263_v1, %v943_v60  ;;  %v1584_v34 = vsel %vm5302_vm10, %v2264_v10, %v944_v3  ;;  %vm5304_vm11 = vcmp.gt.f32.partialorder %v5303_v51, 0.0  ;;  %v442_v46 = vld [vmem:[%s3920_s19 + $0x2a8] sm:$0xff]  ;;  %v443_v29 = vld [vmem:[%s3920_s19 + $0x2b0] sm:$0xff]  ;;  %v5305_v13 = vld [vmem:[#allocation119_spill] sm:$0xff]  ;;  %s4630_s30 = scalar_lea.hbm %s4691_s3, %s2331_s22  ;;  %s1771_s16 = scalar_lea.sflag [#allocation7], %s2639_s5 }
 0x16f   : > { %v1585_v39 = vsel %vm5304_vm11, %v2265_v7, %v945_v5  ;;  %1711 = vst [vmem:[%s3980_s20 + $0x250] sm:$0xff] %v1583_v4  ;;  %1712 = vst [vmem:[%s3980_s20 + $0x258] sm:$0xff] %v1584_v34  ;;  %vm5306_vm12 = vcmp.gt.f32.partialorder %v5305_v13, 0.0  ;;  %v5307_v42 = vld [vmem:[#allocation121_spill] sm:$0xff]  ;;  %v5309_v49 = vld [vmem:[#allocation126_spill] sm:$0xff]  ;;  %s2521_s10 = smov [#allocation6]  }
 0x170   : > { %1713 = vst [vmem:[%s3980_s20 + $0x260] sm:$0xff] %v1585_v39  ;;  %v1586_v6 = vsel %vm5306_vm12, %v2266_v30, %v946_v47  ;;  %vm5308_vm0 = vcmp.gt.f32.partialorder %v5307_v42, 0.0  ;;  %v949_v16 = vadd.f32 %v5309_v49, %v437_v28  ;;  %v5310_v56 = vld [vmem:[#allocation128_spill] sm:$0xff]  ;;  %v444_v59 = vld [vmem:[%s3920_s19 + $0x2b8] sm:$0xff]  ;;  %v5311_v54 = vld [vmem:[#allocation123_spill] sm:$0xff]  ;;  %s2448_s11 = sshll.u32 %s2521_s10, 4  ;;  %s2449_s11 = int_to_ptr.vmem [resolvable:$false] %s2448_s11 }
 0x171   : > { %v1587_v45 = vsel %vm5308_vm0, %v2267_v22, %v947_v52  ;;  %v950_v17 = vadd.f32 %v5310_v56, %v438_v24  ;;  %1714 = vst [vmem:[%s3980_s20 + $0x268] sm:$0xff] %v1586_v6  ;;  %vm5312_vm1 = vcmp.gt.f32.partialorder %v5311_v54, 0.0  ;;  %v5313_v62 = vld [vmem:[#allocation130_spill] sm:$0xff]  ;;  %v5314_v38 = vld [vmem:[#allocation132_spill] sm:$0xff]  ;;  %v445_v21 = vld [vmem:[%s3920_s19 + $0x2c0] sm:$0xff]  ;;  %s2450_s23 = scalar_lea.vmem %s2449_s11, 32768 }
 0x172   : > { %1715 = vst [vmem:[%s3980_s20 + $0x270] sm:$0xff] %v1587_v45  ;;  %v1588_v12 = vsel %vm5312_vm1, %v2268_v57, %v948_v19  ;;  %v951_v32 = vadd.f32 %v5313_v62, %v439_v14  ;;  %v952_v8 = vadd.f32 %v5314_v38, %v440_v43  ;;  %v5315_v63 = vld [vmem:[#allocation134_spill] sm:$0xff]  ;;  %v2269_v41 = vadd.f32 -1.577, %v949_v16  ;;  %v5316_v48 = vld [vmem:[#allocation136_spill] sm:$0xff]  ;;  %v447_v25 = vld [vmem:[%s3920_s19 + $0x2d0] sm:$0xff] }
 0x173   : > { %v953_v18 = vadd.f32 %v5315_v63, %v441_v9  ;;  %1716 = vst [vmem:[%s3980_s20 + $0x278] sm:$0xff] %v1588_v12  ;;  %v2270_v44 = vadd.f32 -1.577, %v950_v17  ;;  %v954_v50 = vadd.f32 %v5316_v48, %v442_v46  ;;  %v5317_v40 = vld [vmem:[#allocation138_spill] sm:$0xff]  ;;  %v446_v55 = vld [vmem:[%s3920_s19 + $0x2c8] sm:$0xff]  ;;  %v5319_v61 = vld [vmem:[#allocation125_spill] sm:$0xff] }
 0x174   : > { %v955_v53 = vadd.f32 %v5317_v40, %v443_v29  ;;  %v2271_v58 = vadd.f32 -1.577, %v951_v32  ;;  %v2272_v2 = vadd.f32 -1.577, %v952_v8  ;;  %v5318_v11 = vld [vmem:[#allocation140_spill] sm:$0xff]  ;;  %vm5320_vm2 = vcmp.gt.f32.partialorder %v5319_v61, 0.0 }
 0x175   : > { %v2273_v60 = vadd.f32 -1.577, %v953_v18  ;;  %v956_v3 = vadd.f32 %v5318_v11, %v444_v59  ;;  %v1589_v5 = vsel %vm5320_vm2, %v2269_v41, %v949_v16  ;;  %v5321_v28 = vld [vmem:[#allocation127_spill] sm:$0xff]  ;;  %v2274_v33 = vadd.f32 -1.577, %v954_v50  ;;  %v448_v31 = vld [vmem:[%s3920_s19 + $0x2d8] sm:$0xff] }
 0x176   : > { %vm5322_vm3 = vcmp.gt.f32.partialorder %v5321_v28, 0.0  ;;  %v2275_v37 = vadd.f32 -1.577, %v955_v53  ;;  %v449_v47 = vld [vmem:[%s3920_s19 + $0x2e0] sm:$0xff]  ;;  %1717 = vst [vmem:[%s3980_s20 + $0x280] sm:$0xff] %v1589_v5  ;;  %v5323_v27 = vld [vmem:[#allocation129_spill] sm:$0xff] }
 0x177   : > { %v1590_v24 = vsel %vm5322_vm3, %v2270_v44, %v950_v17  ;;  %vm5324_vm4 = vcmp.gt.f32.partialorder %v5323_v27, 0.0  ;;  %v5325_v14 = vld [vmem:[#allocation131_spill] sm:$0xff]  ;;  %v5327_v9 = vld [vmem:[#allocation133_spill] sm:$0xff]  ;;  %v2276_v10 = vadd.f32 -1.577, %v956_v3  ;;  %v450_v7 = vld [vmem:[%s3920_s19 + $0x2e8] sm:$0xff] }
 0x178   : > { %1718 = vst [vmem:[%s3980_s20 + $0x288] sm:$0xff] %v1590_v24  ;;  %v1591_v52 = vsel %vm5324_vm4, %v2271_v58, %v951_v32  ;;  %vm5326_vm5 = vcmp.gt.f32.partialorder %v5325_v14, 0.0  ;;  %vm5328_vm6 = vcmp.gt.f32.partialorder %v5327_v9, 0.0  ;;  %v451_v15 = vld [vmem:[%s3920_s19 + $0x2f0] sm:$0xff]  ;;  %v5329_v19 = vld [vmem:[#allocation135_spill] sm:$0xff]  ;;  %v5333_v20 = vld [vmem:[#allocation142_spill] sm:$0xff] }
 0x179   : > { %v1592_v43 = vsel %vm5326_vm5, %v2272_v2, %v952_v8  ;;  %v1593_v1 = vsel %vm5328_vm6, %v2273_v60, %v953_v18  ;;  %1719 = vst [vmem:[%s3980_s20 + $0x290] sm:$0xff] %v1591_v52  ;;  %vm5330_vm7 = vcmp.gt.f32.partialorder %v5329_v19, 0.0  ;;  %v5331_v23 = vld [vmem:[#allocation137_spill] sm:$0xff]  ;;  %v957_v30 = vadd.f32 %v5333_v20, %v445_v21  ;;  %v5334_v22 = vld [vmem:[#allocation144_spill] sm:$0xff]  ;;  %v452_v4 = vld [vmem:[%s3920_s19 + $0x2f8] sm:$0xff] }
 0x17a   : > { %1720 = vst [vmem:[%s3980_s20 + $0x298] sm:$0xff] %v1592_v43  ;;  %1721 = vst [vmem:[%s3980_s20 + $0x2a0] sm:$0xff] %v1593_v1  ;;  %v1594_v0 = vsel %vm5330_vm7, %v2274_v33, %v954_v50  ;;  %vm5332_vm8 = vcmp.gt.f32.partialorder %v5331_v23, 0.0  ;;  %v958_v36 = vadd.f32 %v5334_v22, %v446_v55  ;;  %v5335_v26 = vld [vmem:[#allocation139_spill] sm:$0xff]  ;;  %v5337_v51 = vld [vmem:[#allocation146_spill] sm:$0xff] }
 0x17b   : > { %v1595_v35 = vsel %vm5332_vm8, %v2275_v37, %v955_v53  ;;  %1722 = vst [vmem:[%s3980_s20 + $0x2a8] sm:$0xff] %v1594_v0  ;;  %vm5336_vm9 = vcmp.gt.f32.partialorder %v5335_v26, 0.0  ;;  %v959_v39 = vadd.f32 %v5337_v51, %v447_v25  ;;  %v5338_v57 = vld [vmem:[#allocation148_spill] sm:$0xff]  ;;  %v5339_v29 = vld [vmem:[#allocation150_spill] sm:$0xff]  ;;  %v453_v6 = vld [vmem:[%s3920_s19 + $0x300] sm:$0xff] }
 0x17c   : > { %1723 = vst [vmem:[%s3980_s20 + $0x2b0] sm:$0xff] %v1595_v35  ;;  %v1596_v34 = vsel %vm5336_vm9, %v2276_v10, %v956_v3  ;;  %v960_v46 = vadd.f32 %v5338_v57, %v448_v31  ;;  %v961_v13 = vadd.f32 %v5339_v29, %v449_v47  ;;  %v2277_v42 = vadd.f32 -1.577, %v957_v30  ;;  %v5340_v49 = vld [vmem:[#allocation152_spill] sm:$0xff]  ;;  %v5341_v56 = vld [vmem:[#allocation154_spill] sm:$0xff]  ;;  %v455_v54 = vld [vmem:[%s3920_s19 + $0x310] sm:$0xff] }
 0x17d   : > { %1724 = vst [vmem:[%s3980_s20 + $0x2b8] sm:$0xff] %v1596_v34  ;;  %v2278_v45 = vadd.f32 -1.577, %v958_v36  ;;  %v962_v16 = vadd.f32 %v5340_v49, %v450_v7  ;;  %v963_v17 = vadd.f32 %v5341_v56, %v451_v15  ;;  %v454_v59 = vld [vmem:[%s3920_s19 + $0x308] sm:$0xff]  ;;  %v2279_v12 = vadd.f32 -1.577, %v959_v39 }
 0x17e   : > { %v2280_v62 = vadd.f32 -1.577, %v960_v46  ;;  %v2281_v32 = vadd.f32 -1.577, %v961_v13  ;;  %v5342_v38 = vld [vmem:[#allocation156_spill] sm:$0xff]  ;;  %v5343_v63 = vld [vmem:[#allocation141_spill] sm:$0xff] }
 0x17f   : > { %v964_v8 = vadd.f32 %v5342_v38, %v452_v4  ;;  %vm5344_vm10 = vcmp.gt.f32.partialorder %v5343_v63, 0.0  ;;  %v5345_v21 = vld [vmem:[#allocation143_spill] sm:$0xff]  ;;  %v2282_v44 = vadd.f32 -1.577, %v962_v16  ;;  %v2283_v48 = vadd.f32 -1.577, %v963_v17 }
 0x180   : > { %v1597_v18 = vsel %vm5344_vm10, %v2277_v42, %v957_v30  ;;  %vm5346_vm11 = vcmp.gt.f32.partialorder %v5345_v21, 0.0  ;;  %v456_v50 = vld [vmem:[%s3920_s19 + $0x318] sm:$0xff]  ;;  %v457_v40 = vld [vmem:[%s3920_s19 + $0x320] sm:$0xff]  ;;  %v5347_v53 = vld [vmem:[#allocation145_spill] sm:$0xff] }
 0x181   : > { %v1598_v41 = vsel %vm5346_vm11, %v2278_v45, %v958_v36  ;;  %1725 = vst [vmem:[%s3980_s20 + $0x2c0] sm:$0xff] %v1597_v18  ;;  %vm5348_vm12 = vcmp.gt.f32.partialorder %v5347_v53, 0.0  ;;  %v5349_v25 = vld [vmem:[#allocation147_spill] sm:$0xff]  ;;  %v5351_v2 = vld [vmem:[#allocation149_spill] sm:$0xff]  ;;  %v2284_v11 = vadd.f32 -1.577, %v964_v8 }
 0x182   : > { %1726 = vst [vmem:[%s3980_s20 + $0x2c8] sm:$0xff] %v1598_v41  ;;  %v1599_v55 = vsel %vm5348_vm12, %v2279_v12, %v959_v39  ;;  %vm5350_vm0 = vcmp.gt.f32.partialorder %v5349_v25, 0.0  ;;  %vm5352_vm1 = vcmp.gt.f32.partialorder %v5351_v2, 0.0  ;;  %v458_v3 = vld [vmem:[%s3920_s19 + $0x328] sm:$0xff]  ;;  %v459_v61 = vld [vmem:[%s3920_s19 + $0x330] sm:$0xff]  ;;  %v5353_v5 = vld [vmem:[#allocation151_spill] sm:$0xff] }
 0x183   : > { %v1600_v58 = vsel %vm5350_vm0, %v2280_v62, %v960_v46  ;;  %v1601_v60 = vsel %vm5352_vm1, %v2281_v32, %v961_v13  ;;  %1727 = vst [vmem:[%s3980_s20 + $0x2d0] sm:$0xff] %v1599_v55  ;;  %vm5354_vm2 = vcmp.gt.f32.partialorder %v5353_v5, 0.0  ;;  %v5355_v24 = vld [vmem:[#allocation153_spill] sm:$0xff]  ;;  %v5357_v37 = vld [vmem:[#allocation158_spill] sm:$0xff]  ;;  %v5358_v47 = vld [vmem:[#allocation160_spill] sm:$0xff] }
 0x184   : > { %1728 = vst [vmem:[%s3980_s20 + $0x2d8] sm:$0xff] %v1600_v58  ;;  %1729 = vst [vmem:[%s3980_s20 + $0x2e0] sm:$0xff] %v1601_v60  ;;  %v1602_v28 = vsel %vm5354_vm2, %v2282_v44, %v962_v16  ;;  %vm5356_vm3 = vcmp.gt.f32.partialorder %v5355_v24, 0.0  ;;  %v965_v31 = vadd.f32 %v5357_v37, %v453_v6  ;;  %v966_v27 = vadd.f32 %v5358_v47, %v454_v59  ;;  %v460_v52 = vld [vmem:[%s3920_s19 + $0x338] sm:$0xff]  ;;  %v5359_v14 = vld [vmem:[#allocation155_spill] sm:$0xff] }
 0x185   : > { %v1603_v33 = vsel %vm5356_vm3, %v2283_v48, %v963_v17  ;;  %1730 = vst [vmem:[%s3980_s20 + $0x2e8] sm:$0xff] %v1602_v28  ;;  %vm5360_vm4 = vcmp.gt.f32.partialorder %v5359_v14, 0.0  ;;  %v5361_v9 = vld [vmem:[#allocation162_spill] sm:$0xff]  ;;  %v5362_v10 = vld [vmem:[#allocation164_spill] sm:$0xff]  ;;  %v461_v0 = vld [vmem:[%s3920_s19 + $0x340] sm:$0xff] }
 0x186   : > { %1731 = vst [vmem:[%s3980_s20 + $0x2f0] sm:$0xff] %v1603_v33  ;;  %v1604_v43 = vsel %vm5360_vm4, %v2284_v11, %v964_v8  ;;  %v967_v1 = vadd.f32 %v5361_v9, %v455_v54  ;;  %v968_v7 = vadd.f32 %v5362_v10, %v456_v50  ;;  %v5363_v15 = vld [vmem:[#allocation166_spill] sm:$0xff]  ;;  %v2285_v23 = vadd.f32 -1.577, %v965_v31  ;;  %v5364_v20 = vld [vmem:[#allocation168_spill] sm:$0xff]  ;;  %v463_v26 = vld [vmem:[%s3920_s19 + $0x350] sm:$0xff] }
 0x187   : > { %v969_v19 = vadd.f32 %v5363_v15, %v457_v40  ;;  %1732 = vst [vmem:[%s3980_s20 + $0x2f8] sm:$0xff] %v1604_v43  ;;  %v2286_v35 = vadd.f32 -1.577, %v966_v27  ;;  %v970_v30 = vadd.f32 %v5364_v20, %v458_v3  ;;  %v5365_v22 = vld [vmem:[#allocation170_spill] sm:$0xff]  ;;  %v462_v4 = vld [vmem:[%s3920_s19 + $0x348] sm:$0xff]  ;;  %v5367_v29 = vld [vmem:[#allocation157_spill] sm:$0xff] }
 0x188   : > { %v971_v36 = vadd.f32 %v5365_v22, %v459_v61  ;;  %v2287_v34 = vadd.f32 -1.577, %v967_v1  ;;  %v2288_v51 = vadd.f32 -1.577, %v968_v7  ;;  %v5366_v57 = vld [vmem:[#allocation172_spill] sm:$0xff]  ;;  %vm5368_vm5 = vcmp.gt.f32.partialorder %v5367_v29, 0.0 }
 0x189   : > { %v2289_v39 = vadd.f32 -1.577, %v969_v19  ;;  %v972_v46 = vadd.f32 %v5366_v57, %v460_v52  ;;  %v1605_v13 = vsel %vm5368_vm5, %v2285_v23, %v965_v31  ;;  %v5369_v6 = vld [vmem:[#allocation159_spill] sm:$0xff]  ;;  %v2290_v45 = vadd.f32 -1.577, %v970_v30  ;;  %v464_v16 = vld [vmem:[%s3920_s19 + $0x358] sm:$0xff] }
 0x18a   : > { %vm5370_vm6 = vcmp.gt.f32.partialorder %v5369_v6, 0.0  ;;  %v2291_v49 = vadd.f32 -1.577, %v971_v36  ;;  %v465_v56 = vld [vmem:[%s3920_s19 + $0x360] sm:$0xff]  ;;  %1733 = vst [vmem:[%s3980_s20 + $0x300] sm:$0xff] %v1605_v13  ;;  %v5371_v17 = vld [vmem:[#allocation161_spill] sm:$0xff] }
 0x18b   : > { %v1606_v42 = vsel %vm5370_vm6, %v2286_v35, %v966_v27  ;;  %vm5372_vm7 = vcmp.gt.f32.partialorder %v5371_v17, 0.0  ;;  %v5373_v54 = vld [vmem:[#allocation163_spill] sm:$0xff]  ;;  %v5375_v62 = vld [vmem:[#allocation165_spill] sm:$0xff]  ;;  %v2292_v38 = vadd.f32 -1.577, %v972_v46  ;;  %v466_v8 = vld [vmem:[%s3920_s19 + $0x368] sm:$0xff] }
 0x18c   : > { %1734 = vst [vmem:[%s3980_s20 + $0x308] sm:$0xff] %v1606_v42  ;;  %v1607_v59 = vsel %vm5372_vm7, %v2287_v34, %v967_v1  ;;  %vm5374_vm8 = vcmp.gt.f32.partialorder %v5373_v54, 0.0  ;;  %vm5376_vm9 = vcmp.gt.f32.partialorder %v5375_v62, 0.0  ;;  %v467_v63 = vld [vmem:[%s3920_s19 + $0x370] sm:$0xff]  ;;  %v5377_v18 = vld [vmem:[#allocation167_spill] sm:$0xff]  ;;  %v5381_v48 = vld [vmem:[#allocation174_spill] sm:$0xff] }
 0x18d   : > { %v1608_v12 = vsel %vm5374_vm8, %v2288_v51, %v968_v7  ;;  %v1609_v32 = vsel %vm5376_vm9, %v2289_v39, %v969_v19  ;;  %1735 = vst [vmem:[%s3980_s20 + $0x310] sm:$0xff] %v1607_v59  ;;  %vm5378_vm10 = vcmp.gt.f32.partialorder %v5377_v18, 0.0  ;;  %v5379_v41 = vld [vmem:[#allocation169_spill] sm:$0xff]  ;;  %v973_v50 = vadd.f32 %v5381_v48, %v461_v0  ;;  %v5382_v40 = vld [vmem:[#allocation176_spill] sm:$0xff]  ;;  %v468_v55 = vld [vmem:[%s3920_s19 + $0x378] sm:$0xff] }
 0x18e   : > { %1736 = vst [vmem:[%s3980_s20 + $0x318] sm:$0xff] %v1608_v12  ;;  %1737 = vst [vmem:[%s3980_s20 + $0x320] sm:$0xff] %v1609_v32  ;;  %v1610_v21 = vsel %vm5378_vm10, %v2290_v45, %v970_v30  ;;  %vm5380_vm11 = vcmp.gt.f32.partialorder %v5379_v41, 0.0  ;;  %v974_v53 = vadd.f32 %v5382_v40, %v462_v4  ;;  %v5383_v25 = vld [vmem:[#allocation171_spill] sm:$0xff]  ;;  %v5385_v2 = vld [vmem:[#allocation178_spill] sm:$0xff] }
 0x18f   : > { %v1611_v44 = vsel %vm5380_vm11, %v2291_v49, %v971_v36  ;;  %1738 = vst [vmem:[%s3980_s20 + $0x328] sm:$0xff] %v1610_v21  ;;  %vm5384_vm12 = vcmp.gt.f32.partialorder %v5383_v25, 0.0  ;;  %v975_v60 = vadd.f32 %v5385_v2, %v463_v26  ;;  %v5386_v11 = vld [vmem:[#allocation180_spill] sm:$0xff]  ;;  %v5387_v61 = vld [vmem:[#allocation182_spill] sm:$0xff]  ;;  %v469_v28 = vld [vmem:[%s3920_s19 + $0x380] sm:$0xff] }
 0x190   : > { %1739 = vst [vmem:[%s3980_s20 + $0x330] sm:$0xff] %v1611_v44  ;;  %v1612_v58 = vsel %vm5384_vm12, %v2292_v38, %v972_v46  ;;  %v976_v3 = vadd.f32 %v5386_v11, %v464_v16  ;;  %v977_v5 = vadd.f32 %v5387_v61, %v465_v56  ;;  %v2293_v24 = vadd.f32 -1.577, %v973_v50  ;;  %v5388_v37 = vld [vmem:[#allocation184_spill] sm:$0xff]  ;;  %v5389_v47 = vld [vmem:[#allocation186_spill] sm:$0xff]  ;;  %v471_v14 = vld [vmem:[%s3920_s19 + $0x390] sm:$0xff] }
 0x191   : > { %1740 = vst [vmem:[%s3980_s20 + $0x338] sm:$0xff] %v1612_v58  ;;  %v2294_v33 = vadd.f32 -1.577, %v974_v53  ;;  %v978_v31 = vadd.f32 %v5388_v37, %v466_v8  ;;  %v979_v27 = vadd.f32 %v5389_v47, %v467_v63  ;;  %v470_v52 = vld [vmem:[%s3920_s19 + $0x388] sm:$0xff]  ;;  %v2295_v43 = vadd.f32 -1.577, %v975_v60 }
 0x192   : > { %v2296_v9 = vadd.f32 -1.577, %v976_v3  ;;  %v2297_v1 = vadd.f32 -1.577, %v977_v5  ;;  %v5390_v10 = vld [vmem:[#allocation188_spill] sm:$0xff]  ;;  %v5391_v15 = vld [vmem:[#allocation173_spill] sm:$0xff] }
 0x193   : > { %v980_v7 = vadd.f32 %v5390_v10, %v468_v55  ;;  %vm5392_vm0 = vcmp.gt.f32.partialorder %v5391_v15, 0.0  ;;  %v5393_v0 = vld [vmem:[#allocation175_spill] sm:$0xff]  ;;  %v2298_v35 = vadd.f32 -1.577, %v978_v31  ;;  %v2299_v20 = vadd.f32 -1.577, %v979_v27 }
 0x194   : > { %v1613_v19 = vsel %vm5392_vm0, %v2293_v24, %v973_v50  ;;  %vm5394_vm1 = vcmp.gt.f32.partialorder %v5393_v0, 0.0  ;;  %v472_v30 = vld [vmem:[%s3920_s19 + $0x398] sm:$0xff]  ;;  %v473_v22 = vld [vmem:[%s3920_s19 + $0x3a0] sm:$0xff]  ;;  %v5395_v36 = vld [vmem:[#allocation177_spill] sm:$0xff] }
 0x195   : > { %v1614_v23 = vsel %vm5394_vm1, %v2294_v33, %v974_v53  ;;  %1741 = vst [vmem:[%s3980_s20 + $0x340] sm:$0xff] %v1613_v19  ;;  %vm5396_vm2 = vcmp.gt.f32.partialorder %v5395_v36, 0.0  ;;  %v5397_v26 = vld [vmem:[#allocation179_spill] sm:$0xff]  ;;  %v5399_v51 = vld [vmem:[#allocation181_spill] sm:$0xff]  ;;  %v2300_v57 = vadd.f32 -1.577, %v980_v7 }
 0x196   : > { %1742 = vst [vmem:[%s3980_s20 + $0x348] sm:$0xff] %v1614_v23  ;;  %v1615_v4 = vsel %vm5396_vm2, %v2295_v43, %v975_v60  ;;  %vm5398_vm3 = vcmp.gt.f32.partialorder %v5397_v26, 0.0  ;;  %vm5400_vm4 = vcmp.gt.f32.partialorder %v5399_v51, 0.0  ;;  %v474_v46 = vld [vmem:[%s3920_s19 + $0x3a8] sm:$0xff]  ;;  %v475_v29 = vld [vmem:[%s3920_s19 + $0x3b0] sm:$0xff]  ;;  %v5401_v13 = vld [vmem:[#allocation183_spill] sm:$0xff] }
 0x197   : > { %v1616_v34 = vsel %vm5398_vm3, %v2296_v9, %v976_v3  ;;  %v1617_v39 = vsel %vm5400_vm4, %v2297_v1, %v977_v5  ;;  %1743 = vst [vmem:[%s3980_s20 + $0x350] sm:$0xff] %v1615_v4  ;;  %vm5402_vm5 = vcmp.gt.f32.partialorder %v5401_v13, 0.0  ;;  %v5403_v42 = vld [vmem:[#allocation185_spill] sm:$0xff]  ;;  %v5405_v49 = vld [vmem:[#allocation190_spill] sm:$0xff]  ;;  %v5406_v56 = vld [vmem:[#allocation192_spill] sm:$0xff] }
 0x198   : > { %1744 = vst [vmem:[%s3980_s20 + $0x358] sm:$0xff] %v1616_v34  ;;  %1745 = vst [vmem:[%s3980_s20 + $0x360] sm:$0xff] %v1617_v39  ;;  %v1618_v6 = vsel %vm5402_vm5, %v2298_v35, %v978_v31  ;;  %vm5404_vm6 = vcmp.gt.f32.partialorder %v5403_v42, 0.0  ;;  %v981_v16 = vadd.f32 %v5405_v49, %v469_v28  ;;  %v982_v17 = vadd.f32 %v5406_v56, %v470_v52  ;;  %v476_v59 = vld [vmem:[%s3920_s19 + $0x3b8] sm:$0xff]  ;;  %v5407_v54 = vld [vmem:[#allocation187_spill] sm:$0xff] }
 0x199   : > { %v1619_v45 = vsel %vm5404_vm6, %v2299_v20, %v979_v27  ;;  %1746 = vst [vmem:[%s3980_s20 + $0x368] sm:$0xff] %v1618_v6  ;;  %vm5408_vm7 = vcmp.gt.f32.partialorder %v5407_v54, 0.0  ;;  %v5409_v62 = vld [vmem:[#allocation194_spill] sm:$0xff]  ;;  %v5410_v38 = vld [vmem:[#allocation196_spill] sm:$0xff]  ;;  %v477_v21 = vld [vmem:[%s3920_s19 + $0x3c0] sm:$0xff] }
 0x19a   : > { %1747 = vst [vmem:[%s3980_s20 + $0x370] sm:$0xff] %v1619_v45  ;;  %v1620_v12 = vsel %vm5408_vm7, %v2300_v57, %v980_v7  ;;  %v983_v32 = vadd.f32 %v5409_v62, %v471_v14  ;;  %v984_v8 = vadd.f32 %v5410_v38, %v472_v30  ;;  %v5411_v63 = vld [vmem:[#allocation198_spill] sm:$0xff]  ;;  %v2301_v41 = vadd.f32 -1.577, %v981_v16  ;;  %v5412_v48 = vld [vmem:[#allocation200_spill] sm:$0xff]  ;;  %v479_v25 = vld [vmem:[%s3920_s19 + $0x3d0] sm:$0xff] }
 0x19b   : > { %v985_v18 = vadd.f32 %v5411_v63, %v473_v22  ;;  %1748 = vst [vmem:[%s3980_s20 + $0x378] sm:$0xff] %v1620_v12  ;;  %v2302_v44 = vadd.f32 -1.577, %v982_v17  ;;  %v986_v50 = vadd.f32 %v5412_v48, %v474_v46  ;;  %v5413_v40 = vld [vmem:[#allocation202_spill] sm:$0xff]  ;;  %v478_v55 = vld [vmem:[%s3920_s19 + $0x3c8] sm:$0xff]  ;;  %v5415_v61 = vld [vmem:[#allocation189_spill] sm:$0xff] }
 0x19c   : > { %v987_v53 = vadd.f32 %v5413_v40, %v475_v29  ;;  %v2303_v58 = vadd.f32 -1.577, %v983_v32  ;;  %v2304_v2 = vadd.f32 -1.577, %v984_v8  ;;  %v5414_v11 = vld [vmem:[#allocation204_spill] sm:$0xff]  ;;  %vm5416_vm8 = vcmp.gt.f32.partialorder %v5415_v61, 0.0 }
 0x19d   : > { %v2305_v60 = vadd.f32 -1.577, %v985_v18  ;;  %v988_v3 = vadd.f32 %v5414_v11, %v476_v59  ;;  %v1621_v5 = vsel %vm5416_vm8, %v2301_v41, %v981_v16  ;;  %v5417_v28 = vld [vmem:[#allocation191_spill] sm:$0xff]  ;;  %v2306_v33 = vadd.f32 -1.577, %v986_v50  ;;  %v480_v31 = vld [vmem:[%s3920_s19 + $0x3d8] sm:$0xff] }
 0x19e   : > { %vm5418_vm9 = vcmp.gt.f32.partialorder %v5417_v28, 0.0  ;;  %v2307_v37 = vadd.f32 -1.577, %v987_v53  ;;  %v481_v47 = vld [vmem:[%s3920_s19 + $0x3e0] sm:$0xff]  ;;  %1749 = vst [vmem:[%s3980_s20 + $0x380] sm:$0xff] %v1621_v5  ;;  %v5419_v27 = vld [vmem:[#allocation193_spill] sm:$0xff] }
 0x19f   : > { %v1622_v24 = vsel %vm5418_vm9, %v2302_v44, %v982_v17  ;;  %vm5420_vm10 = vcmp.gt.f32.partialorder %v5419_v27, 0.0  ;;  %v5421_v14 = vld [vmem:[#allocation195_spill] sm:$0xff]  ;;  %v5423_v9 = vld [vmem:[#allocation197_spill] sm:$0xff]  ;;  %v2308_v10 = vadd.f32 -1.577, %v988_v3  ;;  %v482_v7 = vld [vmem:[%s3920_s19 + $0x3e8] sm:$0xff] }
 0x1a0   : > { %1750 = vst [vmem:[%s3980_s20 + $0x388] sm:$0xff] %v1622_v24  ;;  %v1623_v52 = vsel %vm5420_vm10, %v2303_v58, %v983_v32  ;;  %vm5422_vm11 = vcmp.gt.f32.partialorder %v5421_v14, 0.0  ;;  %vm5424_vm12 = vcmp.gt.f32.partialorder %v5423_v9, 0.0  ;;  %v483_v15 = vld [vmem:[%s3920_s19 + $0x3f0] sm:$0xff]  ;;  %v5425_v19 = vld [vmem:[#allocation199_spill] sm:$0xff]  ;;  %v5429_v20 = vld [vmem:[#allocation206_spill] sm:$0xff] }
 0x1a1   : > { %v1624_v43 = vsel %vm5422_vm11, %v2304_v2, %v984_v8  ;;  %v1625_v1 = vsel %vm5424_vm12, %v2305_v60, %v985_v18  ;;  %1751 = vst [vmem:[%s3980_s20 + $0x390] sm:$0xff] %v1623_v52  ;;  %vm5426_vm0 = vcmp.gt.f32.partialorder %v5425_v19, 0.0  ;;  %v5427_v23 = vld [vmem:[#allocation201_spill] sm:$0xff]  ;;  %v989_v30 = vadd.f32 %v5429_v20, %v477_v21  ;;  %v5430_v22 = vld [vmem:[#allocation208_spill] sm:$0xff]  ;;  %v484_v4 = vld [vmem:[%s3920_s19 + $0x3f8] sm:$0xff]  ;;  %s1802_s19 = sshll.u32 %s3980_s20, 4  ;;  %s4639_s19 = int_to_ptr.vmem [resolvable:$true] %s1802_s19 }
 0x1a2   : > { %1752 = vst [vmem:[%s3980_s20 + $0x398] sm:$0xff] %v1624_v43  ;;  %1753 = vst [vmem:[%s3980_s20 + $0x3a0] sm:$0xff] %v1625_v1  ;;  %v1626_v0 = vsel %vm5426_vm0, %v2306_v33, %v986_v50  ;;  %vm5428_vm1 = vcmp.gt.f32.partialorder %v5427_v23, 0.0  ;;  %v990_v36 = vadd.f32 %v5430_v22, %v478_v55  ;;  %v5431_v26 = vld [vmem:[#allocation203_spill] sm:$0xff]  ;;  %v5433_v51 = vld [vmem:[#allocation210_spill] sm:$0xff]  ;;  %s2444_s22 = scalar_lea.vmem %s4639_s19, 16384  ;;  %p2451_p8 = scmp.lt.s32.totalorder %s4639_s19, %s2449_s11 }
 0x1a3   : > { %v1627_v35 = vsel %vm5428_vm1, %v2307_v37, %v987_v53  ;;  %1754 = vst [vmem:[%s3980_s20 + $0x3a8] sm:$0xff] %v1626_v0  ;;  %vm5432_vm2 = vcmp.gt.f32.partialorder %v5431_v26, 0.0  ;;  %v991_v39 = vadd.f32 %v5433_v51, %v479_v25  ;;  %v5434_v57 = vld [vmem:[#allocation212_spill] sm:$0xff]  ;;  %v5435_v29 = vld [vmem:[#allocation214_spill] sm:$0xff]  ;;  %v2309_v6 = vadd.f32 -1.577, %v989_v30  ;;  %p2445_p4 = scmp.ne.s32.totalorder %s4639_s19, %s2444_s22  ;;  %p2452_p10 = scmp.lt.s32.totalorder %s2450_s23, %s2444_s22 }
 0x1a4   : > { %1755 = vst [vmem:[%s3980_s20 + $0x3b0] sm:$0xff] %v1627_v35  ;;  %v1628_v34 = vsel %vm5432_vm2, %v2308_v10, %v988_v3  ;;  %v992_v46 = vadd.f32 %v5434_v57, %v480_v31  ;;  %v993_v13 = vadd.f32 %v5435_v29, %v481_v47  ;;  %v2310_v42 = vadd.f32 -1.577, %v990_v36  ;;  %v5436_v45 = vld [vmem:[#allocation216_spill] sm:$0xff]  ;;  %v5437_v16 = vld [vmem:[#allocation218_spill] sm:$0xff]  ;;  %v5439_v32 = vld [vmem:[#allocation205_spill] sm:$0xff] }
 0x1a5   : > { %1756 = vst [vmem:[%s3980_s20 + $0x3b8] sm:$0xff] %v1628_v34  ;;  %v994_v49 = vadd.f32 %v5436_v45, %v482_v7  ;;  %v995_v56 = vadd.f32 %v5437_v16, %v483_v15  ;;  %v2311_v17 = vadd.f32 -1.577, %v991_v39  ;;  %v5438_v12 = vld [vmem:[#allocation220_spill] sm:$0xff]  ;;  %vm5440_vm3 = vcmp.gt.f32.partialorder %v5439_v32, 0.0  ;;  %v5441_v8 = vld [vmem:[#allocation207_spill] sm:$0xff]  ;;  %p2446_p5 = pnand %p2445_p4, %p5298_p13  ;;  %p2453_p0 = por %p2452_p10, %p2451_p8 }
 0x1a6   : > { %v2312_v59 = vadd.f32 -1.577, %v992_v46  ;;  %v2313_v54 = vadd.f32 -1.577, %v993_v13  ;;  %v996_v62 = vadd.f32 %v5438_v12, %v484_v4  ;;  %v1629_v38 = vsel %vm5440_vm3, %v2309_v6, %v989_v30  ;;  %v5443_v41 = vld [vmem:[#allocation209_spill] sm:$0xff]  ;;  %v5445_v48 = vld [vmem:[#allocation211_spill] sm:$0xff] }
 0x1a7   : > { %vm5442_vm4 = vcmp.gt.f32.partialorder %v5441_v8, 0.0  ;;  %v2314_v18 = vadd.f32 -1.577, %v994_v49  ;;  %v2315_v21 = vadd.f32 -1.577, %v995_v56  ;;  %1757 = vst [vmem:[%s3980_s20 + $0x3c0] sm:$0xff] %v1629_v38  ;;  %p2447_p7 = pneg %p2446_p5 }
 0x1a8   : > { %v1630_v63 = vsel %vm5442_vm4, %v2310_v42, %v990_v36  ;;  %vm5444_vm5 = vcmp.gt.f32.partialorder %v5443_v41, 0.0  ;;  %vm5446_vm6 = vcmp.gt.f32.partialorder %v5445_v48, 0.0  ;;  %v5447_v40 = vld [vmem:[#allocation213_spill] sm:$0xff]  ;;  %v2316_v55 = vadd.f32 -1.577, %v996_v62 }
 0x1a9   : > { %1758 = vst [vmem:[%s3980_s20 + $0x3c8] sm:$0xff] %v1630_v63  ;;  %v1631_v44 = vsel %vm5444_vm5, %v2311_v17, %v991_v39  ;;  %v1632_v50 = vsel %vm5446_vm6, %v2312_v59, %v992_v46  ;;  %vm5448_vm7 = vcmp.gt.f32.partialorder %v5447_v40, 0.0  ;;  %v1634_v58 = vsel %vm738_vm15, %v2314_v18, %v994_v49  ;;  %p2454_p2 = pnand %p2453_p0, %p2447_p7 }
 0x1aa   : > { %v1633_v53 = vsel %vm5448_vm7, %v2313_v54, %v993_v13  ;;  %1759 = vst [vmem:[%s3980_s20 + $0x3d0] sm:$0xff] %v1631_v44  ;;  %1760 = vst [vmem:[%s3980_s20 + $0x3d8] sm:$0xff] %v1632_v50  ;;  %v1635_v60 = vsel %vm739_vm13, %v2315_v21, %v995_v56  ;;  %v1636_v3 = vsel %vm740_vm14, %v2316_v55, %v996_v62 }
 0x1ab   : > { %1761 = vst [vmem:[%s3980_s20 + $0x3e0] sm:$0xff] %v1633_v53  ;;  %1762 = vst [vmem:[%s3980_s20 + $0x3e8] sm:$0xff] %v1634_v58 }
 0x1ac   : > { %1763 = vst [vmem:[%s3980_s20 + $0x3f0] sm:$0xff] %v1635_v60  ;;  %1764 = vst [vmem:[%s3980_s20 + $0x3f8] sm:$0xff] %v1636_v3 }
 0x1ad   : > { %2457 = shalt.err (!%p2454_p2)
}
 0x1ae   : > { %s2458_s20 = scalar_lea.hbm %s4630_s30, 16384  ;;  %s2462_s6 = scalar_lea.hbm %s4691_s3, 32768 }
 0x1af   : > { %p2459_p9 = scmp.ne.s32.totalorder %s4630_s30, %s2458_s20  ;;  %p2463_p6 = scmp.lt.s32.totalorder %s4630_s30, %s4691_s3 }
 0x1b0   : > { %p2464_p11 = scmp.lt.s32.totalorder %s2462_s6, %s2458_s20 }
 0x1b1   : > { %p2460_p1 = pnand %p2459_p9, %p5298_p13 }
 0x1b2   : > { %p2465_p12 = por %p2464_p11, %p2463_p6 }
 0x1b3   : > { %p2461_p3 = pneg %p2460_p1 }
 0x1b5   : > { %p2466_p4 = pnand %p2465_p12, %p2461_p3 }
 0x1b7   : > { %2469 = shalt.err (!%p2466_p4)
}
 0x1b8   : > { %2337 = dma.vmem_to_hbm [thread:$0]  (%p5298_p13), %s4639_s19, 16384, %s4630_s30, %s1771_s16, %s2519_s28, %s2519_s28, %s2520_s9  }
 0x1b9 PF: > { %s1817_s17 = sand.u32 1, %s2500_s12   ;;  %p5452_p5 = scmp.ne.s32.totalorder %s4915_s25, 0 }
 0x1ba   : > { %p5453_p7 = scmp.ge.s32.totalorder %s2512_s15, 2  ;;  %s1818_s27 = scalar_lea.sflag [#allocation4], %s1817_s17 }
 0x1bc   : > { %p2345_p8 = pnand %p5453_p7, %p5452_p5 }
 0x1be   : > { %p2346_p10 = pneg %p2345_p8 }
 0x1c0   : > { %2491 = dma.done.wait (%p2346_p10), %s1818_s27, 16384  }
 0x1c1   : > { %2493 = vsyncadd (%p2346_p10), %s1818_s27, 4294950912  ;;  %s1827_s26 = scalar_lea.sflag [#allocation7], %s1817_s17 }
 0x1c2   : > { %2495 = dma.done.wait (%p2346_p10), %s1827_s26, 16384  }
 0x1c3   : > { %2497 = vsyncadd (%p2346_p10), %s1827_s26, 4294950912  ;;  %p20_p13 = scmp.ge.s32.totalorder %s2567_s18, 4   ;;  %s5454_s12 = smov %s2504_s13 }
 0x1c4   : > { %s5455_s13 = smov %s2508_s14  ;;  %s5456_s14 = smov %s2579_s21 }
 0x1c5   : > { %s5457_s15 = smov %s2567_s18  ;;  %22 = sbr.rel (!%p20_p13) target bundleno = 7 (0x7), region = 93 }
 0x1ca   :  { %1832 = vsyncpa [#allocation3], 1 }
 0x1cb   :  { %1834 = vsyncpa [#allocation3 + $0x1], 1 }
 0x1cc   :  { %1835 = vsyncpa [#allocation4], 1 }
 0x1cd   :  { %1837 = vsyncpa [#allocation4 + $0x1], 1 }
 0x1ce   :  { %1838 = vsyncpa [#allocation7], 1 }
 0x1cf   :  { %1840 = vsyncpa [#allocation7 + $0x1], 1 }

</bundles_post_ra>
